<compile_context>
chip_gen: v7x
topology: tpu7x:2x2x1
jax: 0.10.0
libtpu: 0.0.40
codegen_flags: <defaults>
</compile_context>

<pallas_src>
import functools

import jax
import jax.numpy as jnp
from jax.experimental import pallas as pl
from jax.experimental.pallas import tpu as pltpu

LEAKY_SLOPE = 0.1
BN_EPS = 1e-5


def _round_up(n, m):
    return (n + m - 1) // m * m


def _leaky(y):
    return jnp.where(y > 0, y, LEAKY_SLOPE * y)


@functools.lru_cache(maxsize=None)
def _vmem_budgets():
    """(vmem_limit_bytes, per-kernel working-set budget) per TPU generation."""
    cap = 64 * 1024 * 1024
    try:
        info = pltpu.get_tpu_info()
        cap = int(getattr(info, "vmem_capacity_bytes", 0) or cap)
    except Exception:
        pass
    # ~40 MiB on 64-MiB v7x, ~80 MiB on 128-MiB v5e/v6e.
    limit = min(cap * 5 // 8, 96 * 1024 * 1024)
    return limit, max(limit // 4, 8 * 1024 * 1024)


# ---------------------------------------------------------------------------
# Pallas kernels
# ---------------------------------------------------------------------------
def _mm2_kernel(x_ref, wa_ref, ba_ref, wb_ref, o_ref):
    # o = leaky(x @ wa + ba) @ wb     (conv1 fused with the x1-half of conv3)
    h = jnp.dot(x_ref[...], wa_ref[...], preferred_element_type=jnp.float32)
    h = _leaky(h + ba_ref[...])
    o = jnp.dot(h.astype(jnp.bfloat16), wb_ref[...],
                preferred_element_type=jnp.float32)
    o_ref[...] = o.astype(o_ref.dtype)


def _fused_conv23_up_kernel(x_ref, t_ref, wa_ref, ba_ref, wb_ref, bb_ref, o_ref):
    # x_ref: (1, th, W, Cin)      bf16  high-res input block
    # t_ref: (1, th//2, W, Cout)  bf16  low-res branch, already 2x-repeated in W
    # o     = leaky( leaky(x@wa+ba)@wb + row_upsample2x(t) + bb )
    x = x_ref[0]
    u = jax.lax.dot_general(x, wa_ref[...],
                            dimension_numbers=(((2,), (0,)), ((), ())),
                            preferred_element_type=jnp.float32)
    u = _leaky(u + ba_ref[...])
    u = jax.lax.dot_general(u.astype(jnp.bfloat16), wb_ref[...],
                            dimension_numbers=(((2,), (0,)), ((), ())),
                            preferred_element_type=jnp.float32)
    # In-kernel 2x nearest row upsample: leading-axis broadcast + reshape only
    # (the last two dims (W, C) are untouched -> no sublane/lane relayout).
    th2, W, Ct = t_ref.shape[1], t_ref.shape[2], t_ref.shape[3]
    t = t_ref[0].astype(jnp.float32)                       # (th//2, W, Ct)
    t = jnp.broadcast_to(t[:, None], (th2, 2, W, Ct)).reshape(2 * th2, W, Ct)
    o_ref[0] = _leaky(u + t + bb_ref[...]).astype(o_ref.dtype)


def _conv3x3_1x1_kernel(x_ref, w3_ref, b3_ref, w1_ref, b1_ref, o_ref):
    # x_ref : (1, th+2, Wp, Cin)  bf16 zero-padded row strip, Wp >= W+2, mult of 16
    # w3_ref: (3, 3, Cin, Cmid)   bf16, BN folded
    # b3_ref: (1, 1, Cmid)        f32
    # w1_ref: (Cmid, Cout)        bf16, BN folded (fused 1x1 epilogue)
    # b1_ref: (1, 1, Cout)        f32
    # o_ref : (1, th, W, Cout)
    th, W = o_ref.shape[1], o_ref.shape[2]
    Wp = x_ref.shape[2]
    Cmid = w3_ref.shape[3]
    Wa = _round_up(W, 8)                      # only accumulate the kept columns

    xa = x_ref[0].astype(jnp.float32)         # single hoisted upcast of the strip
    acc = jnp.zeros((th, Wa, Cmid), jnp.float32)
    for dx in range(3):
        # dx handled as a cyclic sublane rotation (XLU, cheap).  Wrapped columns
        # can only land at output columns >= W, which are sliced off below.
        xs = xa if dx == 0 else pltpu.roll(xa, shift=Wp - dx, axis=1)
        if Wa < Wp:
            xs = xs[:, :Wa, :]                # aligned sublane slice
        xs = xs.astype(jnp.bfloat16)
        for dy in range(3):                   # straight acc += chain (MRB-friendly)
            acc += jax.lax.dot_general(
                xs[dy:dy + th], w3_ref[dy, dx],
                dimension_numbers=(((2,), (0,)), ((), ())),
                preferred_element_type=jnp.float32)
    y = acc if Wa == W else acc[:, :W, :]
    y = _leaky(y + b3_ref[...])               # 3x3 epilogue (f32)
    z = jax.lax.dot_general(                  # fused 1x1 conv
        y.astype(jnp.bfloat16), w1_ref[...],
        dimension_numbers=(((2,), (0,)), ((), ())),
        preferred_element_type=jnp.float32)
    o_ref[0] = _leaky(z + b1_ref[...]).astype(o_ref.dtype)


# ---------------------------------------------------------------------------
# Tile-size selection and wrappers around pallas_call
# ---------------------------------------------------------------------------
def _pick_row_tile(M, bytes_per_row, budget, min_steps=4):
    """Row tile: multiple of 16 (bf16 packing), prefer an exact divisor of M
    (no pad copy), fit the VMEM budget, give each TensorCore >= 2 steps."""
    cap = max(16, budget // max(bytes_per_row, 1) // 16 * 16)
    want = max(16, _round_up(-(-M // min_steps), 16))
    tm = min(cap, want, _round_up(M, 16))
    for d in range(tm, 15, -16):              # largest mult-of-16 divisor of M
        if M % d == 0:
            return d
    for d in range(tm - tm % 8, 7, -8):       # then mult-of-8 divisors
        if M % d == 0:
            return d
    return max(16, tm)                        # padded-tail fallback


def _pad_rows(x2d, Mp):
    M = x2d.shape[0]
    return x2d if Mp == M else jnp.pad(x2d, ((0, Mp - M), (0, 0)))


def conv1x1_double_matmul(x_nhwc, wa, ba, wb):
    """t = leaky(x @ wa + ba) @ wb (bf16 out), tiled over rows of B*H*W."""
    B, H, W, Cin = x_nhwc.shape
    Ch, Cout = wa.shape[1], wb.shape[1]
    M = B * H * W
    vmem_limit, budget = _vmem_budgets()
    tm = _pick_row_tile(M, 4 * Cin + 4 * Ch + 8 * Cout, budget)
    Mp = _round_up(M, tm)
    xm = _pad_rows(x_nhwc.reshape(M, Cin), Mp)
    out = pl.pallas_call(
        _mm2_kernel,
        out_shape=jax.ShapeDtypeStruct((Mp, Cout), jnp.bfloat16),
        grid=(Mp // tm,),
        in_specs=[
            pl.BlockSpec((tm, Cin), lambda i: (i, 0)),
            pl.BlockSpec((Cin, Ch), lambda i: (0, 0)),
            pl.BlockSpec((1, Ch), lambda i: (0, 0)),
            pl.BlockSpec((Ch, Cout), lambda i: (0, 0)),
        ],
        out_specs=pl.BlockSpec((tm, Cout), lambda i: (i, 0)),
        compiler_params=pltpu.CompilerParams(
            dimension_semantics=("parallel",),
            vmem_limit_bytes=vmem_limit),
    )(xm, wa, ba.reshape(1, Ch), wb)
    if Mp != M:
        out = out[:M]
    return out.reshape(B, H, W, Cout)


def _pick_even_row_tile(B, H, row_bytes, budget, min_steps=4):
    """Even divisor of H whose tile fits VMEM; prefer >= min_steps grid steps."""
    divs = [d for d in range(H, 1, -1) if H % d == 0 and d % 2 == 0] or [H]
    fit = [d for d in divs if d * row_bytes <= budget] or [divs[-1]]
    for d in fit:
        if B * (H // d) >= min_steps:
            return d
    return fit[-1]


def conv1x1_up_add(x_nhwc, t_lowres, wa, ba, wb, bb):
    """leaky( leaky(x@wa+ba)@wb + 2x-row-upsample(t) + bb ), spatially tiled.

    `t_lowres` is the low-res branch already 2x-repeated along W (cheap XLA
    repeat on the small tensor); the 2x row upsample happens inside the kernel,
    so the full-resolution upsampled branch never round-trips HBM.
    """
    B, H, W, Cin = x_nhwc.shape
    Bt, H2, Wt, Ct = t_lowres.shape
    Cmid, Cout = wa.shape[1], wb.shape[1]
    assert Bt == B and H2 * 2 == H and Wt == W and Ct == Cout
    vmem_limit, budget = _vmem_budgets()
    row_bytes = W * (4 * Cin + 2 * Cout + 4 * Cmid + 2 * Cmid + 4 * Cout)
    th = _pick_even_row_tile(B, H, row_bytes, budget)
    out = pl.pallas_call(
        _fused_conv23_up_kernel,
        out_shape=jax.ShapeDtypeStruct((B, H, W, Cout), jnp.bfloat16),
        grid=(B, H // th),
        in_specs=[
            pl.BlockSpec((1, th, W, Cin), lambda b, i: (b, i, 0, 0)),
            pl.BlockSpec((1, th // 2, W, Cout), lambda b, i: (b, i, 0, 0)),
            pl.BlockSpec((Cin, Cmid), lambda b, i: (0, 0)),
            pl.BlockSpec((1, Cmid), lambda b, i: (0, 0)),
            pl.BlockSpec((Cmid, Cout), lambda b, i: (0, 0)),
            pl.BlockSpec((1, Cout), lambda b, i: (0, 0)),
        ],
        out_specs=pl.BlockSpec((1, th, W, Cout), lambda b, i: (b, i, 0, 0)),
        compiler_params=pltpu.CompilerParams(
            dimension_semantics=("parallel", "parallel"),
            vmem_limit_bytes=vmem_limit),
    )(x_nhwc, t_lowres, wa, ba.reshape(1, Cmid), wb, bb.reshape(1, Cout))
    return out


def _pick_row_strip(B, H, Wp, Wa, W, Cin, Cmid, Cout, out_bytes, budget):
    """Largest divisor of H whose per-strip working set fits the VMEM budget."""
    def need(th):
        return (2 * (th + 2) * Wp * Cin * 2        # bf16 strip, double-buffered
                + 2 * (th + 2) * Wp * Cin * 4      # f32 upcast + rolled copy
                + (th + 2) * Wa * Cin * 2          # bf16 MXU operand
                + th * Wa * Cmid * 4               # f32 accumulator
                + th * W * Cmid * 6                # epilogue (f32 + bf16)
                + 2 * th * W * Cout * out_bytes    # output, double-buffered
                + 9 * Cin * Cmid * 2 + Cmid * Cout * 2)
    divisors = [d for d in range(H, 0, -1) if H % d == 0]
    fit = [d for d in divisors if need(d) <= budget] or [divisors[-1]]
    th = fit[0]                  # largest fit => fewest strips (ideally 1, no halo stack)
    if H // th > 1:              # stacking unavoidable: then also want >= 4 grid steps
        for d in fit:
            if B * (H // d) >= 4 and d >= 4:
                th = d
                break
    return th


def conv3x3_1x1_bn_leaky(x_nhwc, w3, b3, w1, b1, out_dtype=jnp.bfloat16):
    """Fused: leaky(bn(conv3x3(x))) followed by leaky(bn(conv1x1(.)))."""
    B, H, W, Cin = x_nhwc.shape
    Cmid, Cout = w3.shape[3], w1.shape[1]
    Wp = _round_up(W + 2, 16)                 # bf16 sublane-aligned padded width
    Wa = _round_up(W, 8)
    vmem_limit, budget = _vmem_budgets()
    th = _pick_row_strip(B, H, Wp, Wa, W, Cin, Cmid, Cout,
                         jnp.dtype(out_dtype).itemsize, budget)
    n_strips = H // th

    # TODO(synk): fold this pad (and the rare halo stack below) into the kernel
    # via overlapping windows (manual make_async_copy halo DMA) so the padded
    # activation is never re-materialized in HBM.
    xp = jnp.pad(x_nhwc, ((0, 0), (1, 1), (1, Wp - W - 1), (0, 0)))
    if n_strips == 1:
        strips = xp                           # (B, H+2, Wp, Cin), no extra copy
    else:
        strips = jnp.stack(
            [xp[:, j * th:j * th + th + 2] for j in range(n_strips)], axis=1)
        strips = strips.reshape(B * n_strips, th + 2, Wp, Cin)

    out = pl.pallas_call(
        _conv3x3_1x1_kernel,
        out_shape=jax.ShapeDtypeStruct((B * n_strips, th, W, Cout), out_dtype),
        grid=(B * n_strips,),
        in_specs=[
            pl.BlockSpec((1, th + 2, Wp, Cin), lambda i: (i, 0, 0, 0)),
            pl.BlockSpec((3, 3, Cin, Cmid), lambda i: (0, 0, 0, 0)),
            pl.BlockSpec((1, 1, Cmid), lambda i: (0, 0, 0)),
            pl.BlockSpec((Cmid, Cout), lambda i: (0, 0)),
            pl.BlockSpec((1, 1, Cout), lambda i: (0, 0, 0)),
        ],
        out_specs=pl.BlockSpec((1, th, W, Cout), lambda i: (i, 0, 0, 0)),
        compiler_params=pltpu.CompilerParams(
            dimension_semantics=("parallel",),
            vmem_limit_bytes=vmem_limit),
    )(strips, w3, b3.reshape(1, 1, Cmid), w1, b1.reshape(1, 1, Cout))
    return out.reshape(B, H, W, Cout)


# ---------------------------------------------------------------------------
# Parameter construction (deterministic, synthetic) + BN folding
# ---------------------------------------------------------------------------
def make_conv_params(key, cin, cout, ksize):
    k1, k2, k3, k4 = jax.random.split(key, 4)
    if ksize == 1:
        w = 0.1 * jax.random.normal(k1, (cin, cout), jnp.float32)
    else:
        w = 0.05 * jax.random.normal(k1, (ksize, ksize, cin, cout), jnp.float32)
    gamma = 1.0 + 0.1 * jax.random.normal(k2, (cout,), jnp.float32)
    beta = 0.1 * jax.random.normal(k3, (cout,), jnp.float32)
    mean = 0.1 * jax.random.normal(k4, (cout,), jnp.float32)
    var = 0.5 * jnp.ones((cout,), jnp.float32)
    scale = gamma / jnp.sqrt(var + BN_EPS)        # fold BN into affine
    bias = beta - mean * scale
    return w, scale, bias


def make_upsample_block_params(key, in_channel):
    c, h = in_channel, in_channel // 2
    ks = jax.random.split(key, 7)
    return {
        "conv1": make_conv_params(ks[0], c, h, 1),
        "conv2": make_conv_params(ks[1], c, h, 1),
        "conv3": make_conv_params(ks[2], c, h, 1),   # input is cat(x, x1) = c
        "conv4": make_conv_params(ks[3], h, c, 3),
        "conv5": make_conv_params(ks[4], c, h, 1),
        "conv6": make_conv_params(ks[5], h, c, 3),
        "conv7": make_conv_params(ks[6], c, h, 1),
    }


def prepare_upsample_block_params(raw):
    """Fold BN scale into the conv weights (bf16) and split conv3 by cat-half."""
    def fold(name):
        w, s, b = raw[name]
        wf = w * s.reshape((1,) * (w.ndim - 1) + (-1,))
        return wf.astype(jnp.bfloat16), b.astype(jnp.float32)

    w1, b1 = fold("conv1")
    w2, b2 = fold("conv2")
    w3, b3 = fold("conv3")
    w4, b4 = fold("conv4")
    w5, b5 = fold("conv5")
    w6, b6 = fold("conv6")
    w7, b7 = fold("conv7")
    h = w3.shape[0] // 2
    return dict(w1=w1, b1=b1, w2=w2, b2=b2,
                w3_top=w3[:h], w3_bot=w3[h:], b3=b3,   # top: conv2 half, bot: x1 half
                w4=w4, b4=b4, w5=w5, b5=b5,
                w6=w6, b6=b6, w7=w7, b7=b7)


# ---------------------------------------------------------------------------
# Forward pass (semantics of UpSampleBlock.forward)
# ---------------------------------------------------------------------------
def upsample_block_forward(params, x_nchw, x1_nchw):
    assert x_nchw.shape[-1] > x1_nchw.shape[-1]
    assert x_nchw.shape[-1] == 2 * x1_nchw.shape[-1]
    assert x_nchw.shape[-2] == 2 * x1_nchw.shape[-2]
    # NCHW -> NHWC; activations are carried as bf16 between kernels (matmul
    # operands are bf16 anyway; bias/activation math stays in f32 in-kernel).
    x = jnp.transpose(x_nchw, (0, 2, 3, 1)).astype(jnp.bfloat16)
    x1 = jnp.transpose(x1_nchw, (0, 2, 3, 1)).astype(jnp.bfloat16)
    p = params

    # conv1 + the x1-half of conv3 fused at LOW resolution (1x1 convs commute
    # with nearest upsampling): 4x fewer FLOPs and no concat tensor.
    t = conv1x1_double_matmul(x1, p["w1"], p["b1"], p["w3_bot"])
    # Width-only 2x nearest repeat of the small low-res tensor (XLA).  The row
    # 2x repeat happens inside the next kernel, so the full-resolution
    # upsampled branch is never materialized in HBM.
    tw = jnp.repeat(t, 2, axis=2)

    # conv2 + the x-half of conv3 + branch add + conv3 bias + LeakyReLU, fused.
    y = conv1x1_up_add(x, tw, p["w2"], p["b2"], p["w3_top"], p["b3"])

    # conv4 (3x3) + conv5 (1x1) fused; conv6 (3x3) + conv7 (1x1) fused.
    y = conv3x3_1x1_bn_leaky(y, p["w4"], p["b4"], p["w5"], p["b5"],
                             out_dtype=jnp.bfloat16)
    y = conv3x3_1x1_bn_leaky(y, p["w6"], p["b6"], p["w7"], p["b7"],
                             out_dtype=jnp.float32)
    return jnp.transpose(y, (0, 3, 1, 2))        # NHWC -> NCHW


# ---------------------------------------------------------------------------
# Pure-JAX reference of the original layer-by-layer module (for validation)
# ---------------------------------------------------------------------------
def _ref_conv_bn_leaky(x_nhwc, w, scale, bias, ksize):
    if ksize == 1:
        y = jnp.einsum("bhwc,cd->bhwd", x_nhwc, w)
    else:
        y = jax.lax.conv_general_dilated(
            x_nhwc, w, window_strides=(1, 1), padding="SAME",
            dimension_numbers=("NHWC", "HWIO", "NHWC"))
    y = y * scale + bias
    return jnp.where(y > 0, y, LEAKY_SLOPE * y)


def upsample_block_reference(raw, x_nchw, x1_nchw):
    x = jnp.transpose(x_nchw, (0, 2, 3, 1))
    x1 = jnp.transpose(x1_nchw, (0, 2, 3, 1))
    x1 = _ref_conv_bn_leaky(x1, *raw["conv1"], 1)
    x1 = jnp.repeat(jnp.repeat(x1, 2, axis=1), 2, axis=2)
    x = _ref_conv_bn_leaky(x, *raw["conv2"], 1)
    x = jnp.concatenate([x, x1], axis=-1)
    x = _ref_conv_bn_leaky(x, *raw["conv3"], 1)
    x = _ref_conv_bn_leaky(x, *raw["conv4"], 3)
    x = _ref_conv_bn_leaky(x, *raw["conv5"], 1)
    x = _ref_conv_bn_leaky(x, *raw["conv6"], 3)
    x = _ref_conv_bn_leaky(x, *raw["conv7"], 1)
    return jnp.transpose(x, (0, 3, 1, 2))


if __name__ == "__main__":
    key = jax.random.PRNGKey(0)
    kp, kx, kx1 = jax.random.split(key, 3)

    C = 8                                                    # in_channel
    raw = make_upsample_block_params(kp, C)
    params = prepare_upsample_block_params(raw)

    x = jax.random.normal(kx, (2, C, 16, 16), jnp.float32)   # high-res branch
    x1 = jax.random.normal(kx1, (2, C, 8, 8), jnp.float32)   # low-res branch

    fwd = jax.jit(functools.partial(upsample_block_forward, params))
    out = fwd(x, x1)
    jax.block_until_ready(out)

    assert out.shape == (2, C // 2, 16, 16), out.shape
    assert bool(jnp.all(jnp.isfinite(out)))

    # Validate the fused/split Pallas pipeline against a plain-JAX reference of
    # the original module (tolerance sized for bf16 matmul operands + bf16
    # inter-stage activations).
    ref = jax.jit(functools.partial(upsample_block_reference, raw))(x, x1)
    jax.block_until_ready(ref)
    max_err = float(jnp.max(jnp.abs(out - ref)))
    assert max_err < 6e-2, f"max abs error vs reference: {max_err}"

    print("KERNEL_OK")
</pallas_src>

<mosaic_0001>
module attributes {stable_mosaic.version = 11 : i64} {
  func.func @_mm2_kernel(%arg0: i32, %arg1: memref<32x8xbf16, #tpu.memory_space<vmem>>, %arg2: memref<8x4xbf16, #tpu.memory_space<vmem>>, %arg3: memref<1x4xf32, #tpu.memory_space<vmem>>, %arg4: memref<4x4xbf16, #tpu.memory_space<vmem>>, %arg5: memref<32x4xbf16, #tpu.memory_space<vmem>>) attributes {dimension_semantics = [#tpu.dimension_semantics<parallel>], iteration_bounds = array<i64: 4>, scalar_prefetch = 0 : i64, scratch_operands = 0 : i64, tpu.core_type = #tpu.core_type<tc>, window_params = [{transform_indices = @transform_0, window_bounds = array<i64: 32, 8>}, {pipeline_mode = #tpu.pipeline_mode<synchronous>, transform_indices = @transform_1, window_bounds = array<i64: 8, 4>}, {pipeline_mode = #tpu.pipeline_mode<synchronous>, transform_indices = @transform_2, window_bounds = array<i64: 1, 4>}, {pipeline_mode = #tpu.pipeline_mode<synchronous>, transform_indices = @transform_3, window_bounds = array<i64: 4, 4>}, {transform_indices = @transform_4, window_bounds = array<i64: 32, 4>}]} {
    %c0 = arith.constant 0 : index
    %c0_0 = arith.constant 0 : index
    %0 = vector.load %arg1[%c0, %c0_0] : memref<32x8xbf16, #tpu.memory_space<vmem>>, vector<32x8xbf16>
    %c0_1 = arith.constant 0 : index
    %c0_2 = arith.constant 0 : index
    %1 = vector.load %arg2[%c0_1, %c0_2] : memref<8x4xbf16, #tpu.memory_space<vmem>>, vector<8x4xbf16>
    %cst = arith.constant dense<0.000000e+00> : vector<32x4xf32>
    %2 = tpu.matmul %0, %1, %cst {dimension_numbers = #tpu.dot_dimension_numbers<[1], [0], [0], [1], [0, 0, 1, 1], [], []>} : vector<32x8xbf16>, vector<8x4xbf16>, vector<32x4xf32> -> vector<32x4xf32>
    %c0_3 = arith.constant 0 : index
    %c0_4 = arith.constant 0 : index
    %3 = vector.load %arg3[%c0_3, %c0_4] : memref<1x4xf32, #tpu.memory_space<vmem>>, vector<1x4xf32>
    %4 = vector.broadcast %3 : vector<1x4xf32> to vector<32x4xf32>
    %5 = arith.addf %2, %4 : vector<32x4xf32>
    %cst_5 = arith.constant 0.000000e+00 : f32
    %6 = vector.broadcast %cst_5 : f32 to vector<32x4xf32>
    %7 = arith.cmpf ogt, %5, %6 : vector<32x4xf32>
    %cst_6 = arith.constant 1.000000e-01 : f32
    %8 = vector.broadcast %cst_6 : f32 to vector<32x4xf32>
    %9 = arith.mulf %8, %5 : vector<32x4xf32>
    %10 = arith.select %7, %5, %9 : vector<32x4xi1>, vector<32x4xf32>
    %11 = arith.truncf %10 : vector<32x4xf32> to vector<32x4xbf16>
    %c0_7 = arith.constant 0 : index
    %c0_8 = arith.constant 0 : index
    %12 = vector.load %arg4[%c0_7, %c0_8] : memref<4x4xbf16, #tpu.memory_space<vmem>>, vector<4x4xbf16>
    %cst_9 = arith.constant dense<0.000000e+00> : vector<32x4xf32>
    %13 = tpu.matmul %11, %12, %cst_9 {dimension_numbers = #tpu.dot_dimension_numbers<[1], [0], [0], [1], [0, 0, 1, 1], [], []>} : vector<32x4xbf16>, vector<4x4xbf16>, vector<32x4xf32> -> vector<32x4xf32>
    %14 = arith.truncf %13 : vector<32x4xf32> to vector<32x4xbf16>
    %c0_10 = arith.constant 0 : index
    %c0_11 = arith.constant 0 : index
    %15 = vector.load %arg5[%c0_10, %c0_11] : memref<32x4xbf16, #tpu.memory_space<vmem>>, vector<32x4xbf16>
    tpu.vector_store %arg5[%c0_10, %c0_11], %14 {strides = array<i32>} : memref<32x4xbf16, #tpu.memory_space<vmem>>, vector<32x4xbf16>,
    return
  }
  func.func @transform_0(%arg0: i32) -> (i32, i32) {
    %c0_i32 = arith.constant 0 : i32
    %c0_i32_0 = arith.constant 0 : i32
    return %arg0, %c0_i32 : i32, i32
  }
  func.func @transform_1(%arg0: i32) -> (i32, i32) {
    %c0_i32 = arith.constant 0 : i32
    %c0_i32_0 = arith.constant 0 : i32
    %c0_i32_1 = arith.constant 0 : i32
    return %c0_i32, %c0_i32_0 : i32, i32
  }
  func.func @transform_2(%arg0: i32) -> (i32, i32) {
    %c0_i32 = arith.constant 0 : i32
    %c0_i32_0 = arith.constant 0 : i32
    %c0_i32_1 = arith.constant 0 : i32
    return %c0_i32, %c0_i32_0 : i32, i32
  }
  func.func @transform_3(%arg0: i32) -> (i32, i32) {
    %c0_i32 = arith.constant 0 : i32
    %c0_i32_0 = arith.constant 0 : i32
    %c0_i32_1 = arith.constant 0 : i32
    return %c0_i32, %c0_i32_0 : i32, i32
  }
  func.func @transform_4(%arg0: i32) -> (i32, i32) {
    %c0_i32 = arith.constant 0 : i32
    %c0_i32_0 = arith.constant 0 : i32
    return %arg0, %c0_i32 : i32, i32
  }
}

module attributes {stable_mosaic.version = 11 : i64} {
  func.func @_fused_conv23_up_kernel(%arg0: i32, %arg1: i32, %arg2: memref<1x8x16x8xbf16, #tpu.memory_space<vmem>>, %arg3: memref<1x4x16x4xbf16, #tpu.memory_space<vmem>>, %arg4: memref<8x4xbf16, #tpu.memory_space<vmem>>, %arg5: memref<1x4xf32, #tpu.memory_space<vmem>>, %arg6: memref<4x4xbf16, #tpu.memory_space<vmem>>, %arg7: memref<1x4xf32, #tpu.memory_space<vmem>>, %arg8: memref<1x8x16x4xbf16, #tpu.memory_space<vmem>>) attributes {dimension_semantics = [#tpu.dimension_semantics<parallel>, #tpu.dimension_semantics<parallel>], iteration_bounds = array<i64: 2, 2>, scalar_prefetch = 0 : i64, scratch_operands = 0 : i64, tpu.core_type = #tpu.core_type<tc>, window_params = [{transform_indices = @transform_0, window_bounds = array<i64: 1, 8, 16, 8>}, {transform_indices = @transform_1, window_bounds = array<i64: 1, 4, 16, 4>}, {pipeline_mode = #tpu.pipeline_mode<synchronous>, transform_indices = @transform_2, window_bounds = array<i64: 8, 4>}, {pipeline_mode = #tpu.pipeline_mode<synchronous>, transform_indices = @transform_3, window_bounds = array<i64: 1, 4>}, {pipeline_mode = #tpu.pipeline_mode<synchronous>, transform_indices = @transform_4, window_bounds = array<i64: 4, 4>}, {pipeline_mode = #tpu.pipeline_mode<synchronous>, transform_indices = @transform_5, window_bounds = array<i64: 1, 4>}, {transform_indices = @transform_6, window_bounds = array<i64: 1, 8, 16, 4>}]} {
    %c0 = arith.constant 0 : index
    %c0_0 = arith.constant 0 : index
    %c0_1 = arith.constant 0 : index
    %c0_2 = arith.constant 0 : index
    %0 = vector.load %arg2[%c0, %c0_0, %c0_1, %c0_2] : memref<1x8x16x8xbf16, #tpu.memory_space<vmem>>, vector<1x8x16x8xbf16>
    %1 = vector.shape_cast %0 : vector<1x8x16x8xbf16> to vector<8x16x8xbf16>
    %c0_3 = arith.constant 0 : index
    %c0_4 = arith.constant 0 : index
    %2 = vector.load %arg4[%c0_3, %c0_4] : memref<8x4xbf16, #tpu.memory_space<vmem>>, vector<8x4xbf16>
    %cst = arith.constant dense<0.000000e+00> : vector<8x16x4xf32>
    %3 = tpu.matmul %1, %2, %cst {dimension_numbers = #tpu.dot_dimension_numbers<[2], [0], [0, 1], [1], [0, 0, 0, 1, 1, 1], [], []>} : vector<8x16x8xbf16>, vector<8x4xbf16>, vector<8x16x4xf32> -> vector<8x16x4xf32>
    %c0_5 = arith.constant 0 : index
    %c0_6 = arith.constant 0 : index
    %4 = vector.load %arg5[%c0_5, %c0_6] : memref<1x4xf32, #tpu.memory_space<vmem>>, vector<1x4xf32>
    %5 = vector.shape_cast %4 : vector<1x4xf32> to vector<1x1x4xf32>
    %6 = vector.broadcast %5 : vector<1x1x4xf32> to vector<8x16x4xf32>
    %7 = arith.addf %3, %6 : vector<8x16x4xf32>
    %cst_7 = arith.constant 0.000000e+00 : f32
    %8 = vector.broadcast %cst_7 : f32 to vector<8x16x4xf32>
    %9 = arith.cmpf ogt, %7, %8 : vector<8x16x4xf32>
    %cst_8 = arith.constant 1.000000e-01 : f32
    %10 = vector.broadcast %cst_8 : f32 to vector<8x16x4xf32>
    %11 = arith.mulf %10, %7 : vector<8x16x4xf32>
    %12 = arith.select %9, %7, %11 : vector<8x16x4xi1>, vector<8x16x4xf32>
    %13 = arith.truncf %12 : vector<8x16x4xf32> to vector<8x16x4xbf16>
    %c0_9 = arith.constant 0 : index
    %c0_10 = arith.constant 0 : index
    %14 = vector.load %arg6[%c0_9, %c0_10] : memref<4x4xbf16, #tpu.memory_space<vmem>>, vector<4x4xbf16>
    %cst_11 = arith.constant dense<0.000000e+00> : vector<8x16x4xf32>
    %15 = tpu.matmul %13, %14, %cst_11 {dimension_numbers = #tpu.dot_dimension_numbers<[2], [0], [0, 1], [1], [0, 0, 0, 1, 1, 1], [], []>} : vector<8x16x4xbf16>, vector<4x4xbf16>, vector<8x16x4xf32> -> vector<8x16x4xf32>
    %c0_12 = arith.constant 0 : index
    %c0_13 = arith.constant 0 : index
    %c0_14 = arith.constant 0 : index
    %c0_15 = arith.constant 0 : index
    %16 = vector.load %arg3[%c0_12, %c0_13, %c0_14, %c0_15] : memref<1x4x16x4xbf16, #tpu.memory_space<vmem>>, vector<1x4x16x4xbf16>
    %17 = vector.shape_cast %16 : vector<1x4x16x4xbf16> to vector<4x16x4xbf16>
    %18 = arith.extf %17 : vector<4x16x4xbf16> to vector<4x16x4xf32>
    %19 = vector.shape_cast %18 : vector<4x16x4xf32> to vector<4x1x16x4xf32>
    %20 = vector.shape_cast %19 : vector<4x1x16x4xf32> to vector<4x1x16x4xf32>
    %21 = vector.broadcast %20 : vector<4x1x16x4xf32> to vector<4x2x16x4xf32>
    %22 = vector.shape_cast %21 : vector<4x2x16x4xf32> to vector<8x16x4xf32>
    %23 = arith.addf %15, %22 : vector<8x16x4xf32>
    %c0_16 = arith.constant 0 : index
    %c0_17 = arith.constant 0 : index
    %24 = vector.load %arg7[%c0_16, %c0_17] : memref<1x4xf32, #tpu.memory_space<vmem>>, vector<1x4xf32>
    %25 = vector.shape_cast %24 : vector<1x4xf32> to vector<1x1x4xf32>
    %26 = vector.broadcast %25 : vector<1x1x4xf32> to vector<8x16x4xf32>
    %27 = arith.addf %23, %26 : vector<8x16x4xf32>
    %cst_18 = arith.constant 0.000000e+00 : f32
    %28 = vector.broadcast %cst_18 : f32 to vector<8x16x4xf32>
    %29 = arith.cmpf ogt, %27, %28 : vector<8x16x4xf32>
    %cst_19 = arith.constant 1.000000e-01 : f32
    %30 = vector.broadcast %cst_19 : f32 to vector<8x16x4xf32>
    %31 = arith.mulf %30, %27 : vector<8x16x4xf32>
    %32 = arith.select %29, %27, %31 : vector<8x16x4xi1>, vector<8x16x4xf32>
    %33 = arith.truncf %32 : vector<8x16x4xf32> to vector<8x16x4xbf16>
    %c0_20 = arith.constant 0 : index
    %c0_21 = arith.constant 0 : index
    %c0_22 = arith.constant 0 : index
    %c0_23 = arith.constant 0 : index
    %34 = vector.load %arg8[%c0_20, %c0_21, %c0_22, %c0_23] : memref<1x8x16x4xbf16, #tpu.memory_space<vmem>>, vector<1x8x16x4xbf16>
    %35 = vector.shape_cast %34 : vector<1x8x16x4xbf16> to vector<8x16x4xbf16>
    %36 = vector.shape_cast %33 : vector<8x16x4xbf16> to vector<1x8x16x4xbf16>
    tpu.vector_store %arg8[%c0_20, %c0_21, %c0_22, %c0_23], %36 {strides = array<i32>} : memref<1x8x16x4xbf16, #tpu.memory_space<vmem>>, vector<1x8x16x4xbf16>,
    return
  }
  func.func @transform_0(%arg0: i32, %arg1: i32) -> (i32, i32, i32, i32) {
    %c0_i32 = arith.constant 0 : i32
    %c0_i32_0 = arith.constant 0 : i32
    %c0_i32_1 = arith.constant 0 : i32
    return %arg0, %arg1, %c0_i32, %c0_i32_0 : i32, i32, i32, i32
  }
  func.func @transform_1(%arg0: i32, %arg1: i32) -> (i32, i32, i32, i32) {
    %c0_i32 = arith.constant 0 : i32
    %c0_i32_0 = arith.constant 0 : i32
    %c0_i32_1 = arith.constant 0 : i32
    return %arg0, %arg1, %c0_i32, %c0_i32_0 : i32, i32, i32, i32
  }
  func.func @transform_2(%arg0: i32, %arg1: i32) -> (i32, i32) {
    %c0_i32 = arith.constant 0 : i32
    %c0_i32_0 = arith.constant 0 : i32
    %c0_i32_1 = arith.constant 0 : i32
    return %c0_i32, %c0_i32_0 : i32, i32
  }
  func.func @transform_3(%arg0: i32, %arg1: i32) -> (i32, i32) {
    %c0_i32 = arith.constant 0 : i32
    %c0_i32_0 = arith.constant 0 : i32
    %c0_i32_1 = arith.constant 0 : i32
    return %c0_i32, %c0_i32_0 : i32, i32
  }
  func.func @transform_4(%arg0: i32, %arg1: i32) -> (i32, i32) {
    %c0_i32 = arith.constant 0 : i32
    %c0_i32_0 = arith.constant 0 : i32
    %c0_i32_1 = arith.constant 0 : i32
    return %c0_i32, %c0_i32_0 : i32, i32
  }
  func.func @transform_5(%arg0: i32, %arg1: i32) -> (i32, i32) {
    %c0_i32 = arith.constant 0 : i32
    %c0_i32_0 = arith.constant 0 : i32
    %c0_i32_1 = arith.constant 0 : i32
    return %c0_i32, %c0_i32_0 : i32, i32
  }
  func.func @transform_6(%arg0: i32, %arg1: i32) -> (i32, i32, i32, i32) {
    %c0_i32 = arith.constant 0 : i32
    %c0_i32_0 = arith.constant 0 : i32
    %c0_i32_1 = arith.constant 0 : i32
    return %arg0, %arg1, %c0_i32, %c0_i32_0 : i32, i32, i32, i32
  }
}

module attributes {stable_mosaic.version = 11 : i64} {
  func.func @_conv3x3_1x1_kernel(%arg0: i32, %arg1: memref<1x18x32x4xbf16, #tpu.memory_space<vmem>>, %arg2: memref<3x3x4x8xbf16, #tpu.memory_space<vmem>>, %arg3: memref<1x1x8xf32, #tpu.memory_space<vmem>>, %arg4: memref<8x4xbf16, #tpu.memory_space<vmem>>, %arg5: memref<1x1x4xf32, #tpu.memory_space<vmem>>, %arg6: memref<1x16x16x4xf32, #tpu.memory_space<vmem>>) attributes {dimension_semantics = [#tpu.dimension_semantics<parallel>], iteration_bounds = array<i64: 2>, scalar_prefetch = 0 : i64, scratch_operands = 0 : i64, tpu.core_type = #tpu.core_type<tc>, window_params = [{transform_indices = @transform_0, window_bounds = array<i64: 1, 18, 32, 4>}, {pipeline_mode = #tpu.pipeline_mode<synchronous>, transform_indices = @transform_1, window_bounds = array<i64: 3, 3, 4, 8>}, {pipeline_mode = #tpu.pipeline_mode<synchronous>, transform_indices = @transform_2, window_bounds = array<i64: 1, 1, 8>}, {pipeline_mode = #tpu.pipeline_mode<synchronous>, transform_indices = @transform_3, window_bounds = array<i64: 8, 4>}, {pipeline_mode = #tpu.pipeline_mode<synchronous>, transform_indices = @transform_4, window_bounds = array<i64: 1, 1, 4>}, {transform_indices = @transform_5, window_bounds = array<i64: 1, 16, 16, 4>}]} {
    %c0 = arith.constant 0 : index
    %c0_0 = arith.constant 0 : index
    %c0_1 = arith.constant 0 : index
    %c0_2 = arith.constant 0 : index
    %0 = vector.load %arg1[%c0, %c0_0, %c0_1, %c0_2] : memref<1x18x32x4xbf16, #tpu.memory_space<vmem>>, vector<1x18x32x4xbf16>
    %1 = vector.shape_cast %0 : vector<1x18x32x4xbf16> to vector<18x32x4xbf16>
    %2 = arith.extf %1 : vector<18x32x4xbf16> to vector<18x32x4xf32>
    %cst = arith.constant 0.000000e+00 : f32
    %3 = vector.broadcast %cst : f32 to vector<16x16x8xf32>
    %4 = vector.extract_strided_slice %2 {offsets = [0, 0, 0], sizes = [18, 16, 4], strides = [1, 1, 1]} : vector<18x32x4xf32> to vector<18x16x4xf32>
    %5 = arith.truncf %4 : vector<18x16x4xf32> to vector<18x16x4xbf16>
    %6 = vector.extract_strided_slice %5 {offsets = [0, 0, 0], sizes = [16, 16, 4], strides = [1, 1, 1]} : vector<18x16x4xbf16> to vector<16x16x4xbf16>
    %c0_3 = arith.constant 0 : index
    %c0_4 = arith.constant 0 : index
    %c0_5 = arith.constant 0 : index
    %c0_6 = arith.constant 0 : index
    %7 = vector.load %arg2[%c0_3, %c0_4, %c0_5, %c0_6] : memref<3x3x4x8xbf16, #tpu.memory_space<vmem>>, vector<1x1x4x8xbf16>
    %8 = vector.shape_cast %7 : vector<1x1x4x8xbf16> to vector<4x8xbf16>
    %cst_7 = arith.constant dense<0.000000e+00> : vector<16x16x8xf32>
    %9 = tpu.matmul %6, %8, %cst_7 {dimension_numbers = #tpu.dot_dimension_numbers<[2], [0], [0, 1], [1], [0, 0, 0, 1, 1, 1], [], []>} : vector<16x16x4xbf16>, vector<4x8xbf16>, vector<16x16x8xf32> -> vector<16x16x8xf32>
    %10 = arith.addf %3, %9 : vector<16x16x8xf32>
    %11 = vector.extract_strided_slice %5 {offsets = [1, 0, 0], sizes = [16, 16, 4], strides = [1, 1, 1]} : vector<18x16x4xbf16> to vector<16x16x4xbf16>
    %c1 = arith.constant 1 : index
    %c0_8 = arith.constant 0 : index
    %c0_9 = arith.constant 0 : index
    %c0_10 = arith.constant 0 : index
    %12 = vector.load %arg2[%c1, %c0_8, %c0_9, %c0_10] : memref<3x3x4x8xbf16, #tpu.memory_space<vmem>>, vector<1x1x4x8xbf16>
    %13 = vector.shape_cast %12 : vector<1x1x4x8xbf16> to vector<4x8xbf16>
    %cst_11 = arith.constant dense<0.000000e+00> : vector<16x16x8xf32>
    %14 = tpu.matmul %11, %13, %cst_11 {dimension_numbers = #tpu.dot_dimension_numbers<[2], [0], [0, 1], [1], [0, 0, 0, 1, 1, 1], [], []>} : vector<16x16x4xbf16>, vector<4x8xbf16>, vector<16x16x8xf32> -> vector<16x16x8xf32>
    %15 = arith.addf %10, %14 : vector<16x16x8xf32>
    %16 = vector.extract_strided_slice %5 {offsets = [2, 0, 0], sizes = [16, 16, 4], strides = [1, 1, 1]} : vector<18x16x4xbf16> to vector<16x16x4xbf16>
    %c2 = arith.constant 2 : index
    %c0_12 = arith.constant 0 : index
    %c0_13 = arith.constant 0 : index
    %c0_14 = arith.constant 0 : index
    %17 = vector.load %arg2[%c2, %c0_12, %c0_13, %c0_14] : memref<3x3x4x8xbf16, #tpu.memory_space<vmem>>, vector<1x1x4x8xbf16>
    %18 = vector.shape_cast %17 : vector<1x1x4x8xbf16> to vector<4x8xbf16>
    %cst_15 = arith.constant dense<0.000000e+00> : vector<16x16x8xf32>
    %19 = tpu.matmul %16, %18, %cst_15 {dimension_numbers = #tpu.dot_dimension_numbers<[2], [0], [0, 1], [1], [0, 0, 0, 1, 1, 1], [], []>} : vector<16x16x4xbf16>, vector<4x8xbf16>, vector<16x16x8xf32> -> vector<16x16x8xf32>
    %20 = arith.addf %15, %19 : vector<16x16x8xf32>
    %c31_i32 = arith.constant 31 : i32
    %21 = tpu.dynamic_rotate %2 by %c31_i32 dim 1 : vector<18x32x4xf32>, i32 -> vector<18x32x4xf32>
    %22 = vector.extract_strided_slice %21 {offsets = [0, 0, 0], sizes = [18, 16, 4], strides = [1, 1, 1]} : vector<18x32x4xf32> to vector<18x16x4xf32>
    %23 = arith.truncf %22 : vector<18x16x4xf32> to vector<18x16x4xbf16>
    %24 = vector.extract_strided_slice %23 {offsets = [0, 0, 0], sizes = [16, 16, 4], strides = [1, 1, 1]} : vector<18x16x4xbf16> to vector<16x16x4xbf16>
    %c0_16 = arith.constant 0 : index
    %c1_17 = arith.constant 1 : index
    %c0_18 = arith.constant 0 : index
    %c0_19 = arith.constant 0 : index
    %25 = vector.load %arg2[%c0_16, %c1_17, %c0_18, %c0_19] : memref<3x3x4x8xbf16, #tpu.memory_space<vmem>>, vector<1x1x4x8xbf16>
    %26 = vector.shape_cast %25 : vector<1x1x4x8xbf16> to vector<4x8xbf16>
    %cst_20 = arith.constant dense<0.000000e+00> : vector<16x16x8xf32>
    %27 = tpu.matmul %24, %26, %cst_20 {dimension_numbers = #tpu.dot_dimension_numbers<[2], [0], [0, 1], [1], [0, 0, 0, 1, 1, 1], [], []>} : vector<16x16x4xbf16>, vector<4x8xbf16>, vector<16x16x8xf32> -> vector<16x16x8xf32>
    %28 = arith.addf %20, %27 : vector<16x16x8xf32>
    %29 = vector.extract_strided_slice %23 {offsets = [1, 0, 0], sizes = [16, 16, 4], strides = [1, 1, 1]} : vector<18x16x4xbf16> to vector<16x16x4xbf16>
    %c1_21 = arith.constant 1 : index
    %c1_22 = arith.constant 1 : index
    %c0_23 = arith.constant 0 : index
    %c0_24 = arith.constant 0 : index
    %30 = vector.load %arg2[%c1_21, %c1_22, %c0_23, %c0_24] : memref<3x3x4x8xbf16, #tpu.memory_space<vmem>>, vector<1x1x4x8xbf16>
    %31 = vector.shape_cast %30 : vector<1x1x4x8xbf16> to vector<4x8xbf16>
    %cst_25 = arith.constant dense<0.000000e+00> : vector<16x16x8xf32>
    %32 = tpu.matmul %29, %31, %cst_25 {dimension_numbers = #tpu.dot_dimension_numbers<[2], [0], [0, 1], [1], [0, 0, 0, 1, 1, 1], [], []>} : vector<16x16x4xbf16>, vector<4x8xbf16>, vector<16x16x8xf32> -> vector<16x16x8xf32>
    %33 = arith.addf %28, %32 : vector<16x16x8xf32>
    %34 = vector.extract_strided_slice %23 {offsets = [2, 0, 0], sizes = [16, 16, 4], strides = [1, 1, 1]} : vector<18x16x4xbf16> to vector<16x16x4xbf16>
    %c2_26 = arith.constant 2 : index
    %c1_27 = arith.constant 1 : index
    %c0_28 = arith.constant 0 : index
    %c0_29 = arith.constant 0 : index
    %35 = vector.load %arg2[%c2_26, %c1_27, %c0_28, %c0_29] : memref<3x3x4x8xbf16, #tpu.memory_space<vmem>>, vector<1x1x4x8xbf16>
    %36 = vector.shape_cast %35 : vector<1x1x4x8xbf16> to vector<4x8xbf16>
    %cst_30 = arith.constant dense<0.000000e+00> : vector<16x16x8xf32>
    %37 = tpu.matmul %34, %36, %cst_30 {dimension_numbers = #tpu.dot_dimension_numbers<[2], [0], [0, 1], [1], [0, 0, 0, 1, 1, 1], [], []>} : vector<16x16x4xbf16>, vector<4x8xbf16>, vector<16x16x8xf32> -> vector<16x16x8xf32>
    %38 = arith.addf %33, %37 : vector<16x16x8xf32>
    %c30_i32 = arith.constant 30 : i32
    %39 = tpu.dynamic_rotate %2 by %c30_i32 dim 1 : vector<18x32x4xf32>, i32 -> vector<18x32x4xf32>
    %40 = vector.extract_strided_slice %39 {offsets = [0, 0, 0], sizes = [18, 16, 4], strides = [1, 1, 1]} : vector<18x32x4xf32> to vector<18x16x4xf32>
    %41 = arith.truncf %40 : vector<18x16x4xf32> to vector<18x16x4xbf16>
    %42 = vector.extract_strided_slice %41 {offsets = [0, 0, 0], sizes = [16, 16, 4], strides = [1, 1, 1]} : vector<18x16x4xbf16> to vector<16x16x4xbf16>
    %c0_31 = arith.constant 0 : index
    %c2_32 = arith.constant 2 : index
    %c0_33 = arith.constant 0 : index
    %c0_34 = arith.constant 0 : index
    %43 = vector.load %arg2[%c0_31, %c2_32, %c0_33, %c0_34] : memref<3x3x4x8xbf16, #tpu.memory_space<vmem>>, vector<1x1x4x8xbf16>
    %44 = vector.shape_cast %43 : vector<1x1x4x8xbf16> to vector<4x8xbf16>
    %cst_35 = arith.constant dense<0.000000e+00> : vector<16x16x8xf32>
    %45 = tpu.matmul %42, %44, %cst_35 {dimension_numbers = #tpu.dot_dimension_numbers<[2], [0], [0, 1], [1], [0, 0, 0, 1, 1, 1], [], []>} : vector<16x16x4xbf16>, vector<4x8xbf16>, vector<16x16x8xf32> -> vector<16x16x8xf32>
    %46 = arith.addf %38, %45 : vector<16x16x8xf32>
    %47 = vector.extract_strided_slice %41 {offsets = [1, 0, 0], sizes = [16, 16, 4], strides = [1, 1, 1]} : vector<18x16x4xbf16> to vector<16x16x4xbf16>
    %c1_36 = arith.constant 1 : index
    %c2_37 = arith.constant 2 : index
    %c0_38 = arith.constant 0 : index
    %c0_39 = arith.constant 0 : index
    %48 = vector.load %arg2[%c1_36, %c2_37, %c0_38, %c0_39] : memref<3x3x4x8xbf16, #tpu.memory_space<vmem>>, vector<1x1x4x8xbf16>
    %49 = vector.shape_cast %48 : vector<1x1x4x8xbf16> to vector<4x8xbf16>
    %cst_40 = arith.constant dense<0.000000e+00> : vector<16x16x8xf32>
    %50 = tpu.matmul %47, %49, %cst_40 {dimension_numbers = #tpu.dot_dimension_numbers<[2], [0], [0, 1], [1], [0, 0, 0, 1, 1, 1], [], []>} : vector<16x16x4xbf16>, vector<4x8xbf16>, vector<16x16x8xf32> -> vector<16x16x8xf32>
    %51 = arith.addf %46, %50 : vector<16x16x8xf32>
    %52 = vector.extract_strided_slice %41 {offsets = [2, 0, 0], sizes = [16, 16, 4], strides = [1, 1, 1]} : vector<18x16x4xbf16> to vector<16x16x4xbf16>
    %c2_41 = arith.constant 2 : index
    %c2_42 = arith.constant 2 : index
    %c0_43 = arith.constant 0 : index
    %c0_44 = arith.constant 0 : index
    %53 = vector.load %arg2[%c2_41, %c2_42, %c0_43, %c0_44] : memref<3x3x4x8xbf16, #tpu.memory_space<vmem>>, vector<1x1x4x8xbf16>
    %54 = vector.shape_cast %53 : vector<1x1x4x8xbf16> to vector<4x8xbf16>
    %cst_45 = arith.constant dense<0.000000e+00> : vector<16x16x8xf32>
    %55 = tpu.matmul %52, %54, %cst_45 {dimension_numbers = #tpu.dot_dimension_numbers<[2], [0], [0, 1], [1], [0, 0, 0, 1, 1, 1], [], []>} : vector<16x16x4xbf16>, vector<4x8xbf16>, vector<16x16x8xf32> -> vector<16x16x8xf32>
    %56 = arith.addf %51, %55 : vector<16x16x8xf32>
    %c0_46 = arith.constant 0 : index
    %c0_47 = arith.constant 0 : index
    %c0_48 = arith.constant 0 : index
    %57 = vector.load %arg3[%c0_46, %c0_47, %c0_48] : memref<1x1x8xf32, #tpu.memory_space<vmem>>, vector<1x1x8xf32>
    %58 = vector.broadcast %57 : vector<1x1x8xf32> to vector<16x16x8xf32>
    %59 = arith.addf %56, %58 : vector<16x16x8xf32>
    %cst_49 = arith.constant 0.000000e+00 : f32
    %60 = vector.broadcast %cst_49 : f32 to vector<16x16x8xf32>
    %61 = arith.cmpf ogt, %59, %60 : vector<16x16x8xf32>
    %cst_50 = arith.constant 1.000000e-01 : f32
    %62 = vector.broadcast %cst_50 : f32 to vector<16x16x8xf32>
    %63 = arith.mulf %62, %59 : vector<16x16x8xf32>
    %64 = arith.select %61, %59, %63 : vector<16x16x8xi1>, vector<16x16x8xf32>
    %65 = arith.truncf %64 : vector<16x16x8xf32> to vector<16x16x8xbf16>
    %c0_51 = arith.constant 0 : index
    %c0_52 = arith.constant 0 : index
    %66 = vector.load %arg4[%c0_51, %c0_52] : memref<8x4xbf16, #tpu.memory_space<vmem>>, vector<8x4xbf16>
    %cst_53 = arith.constant dense<0.000000e+00> : vector<16x16x4xf32>
    %67 = tpu.matmul %65, %66, %cst_53 {dimension_numbers = #tpu.dot_dimension_numbers<[2], [0], [0, 1], [1], [0, 0, 0, 1, 1, 1], [], []>} : vector<16x16x8xbf16>, vector<8x4xbf16>, vector<16x16x4xf32> -> vector<16x16x4xf32>
    %c0_54 = arith.constant 0 : index
    %c0_55 = arith.constant 0 : index
    %c0_56 = arith.constant 0 : index
    %68 = vector.load %arg5[%c0_54, %c0_55, %c0_56] : memref<1x1x4xf32, #tpu.memory_space<vmem>>, vector<1x1x4xf32>
    %69 = vector.broadcast %68 : vector<1x1x4xf32> to vector<16x16x4xf32>
    %70 = arith.addf %67, %69 : vector<16x16x4xf32>
    %cst_57 = arith.constant 0.000000e+00 : f32
    %71 = vector.broadcast %cst_57 : f32 to vector<16x16x4xf32>
    %72 = arith.cmpf ogt, %70, %71 : vector<16x16x4xf32>
    %cst_58 = arith.constant 1.000000e-01 : f32
    %73 = vector.broadcast %cst_58 : f32 to vector<16x16x4xf32>
    %74 = arith.mulf %73, %70 : vector<16x16x4xf32>
    %75 = arith.select %72, %70, %74 : vector<16x16x4xi1>, vector<16x16x4xf32>
    %c0_59 = arith.constant 0 : index
    %c0_60 = arith.constant 0 : index
    %c0_61 = arith.constant 0 : index
    %c0_62 = arith.constant 0 : index
    %76 = vector.load %arg6[%c0_59, %c0_60, %c0_61, %c0_62] : memref<1x16x16x4xf32, #tpu.memory_space<vmem>>, vector<1x16x16x4xf32>
    %77 = vector.shape_cast %76 : vector<1x16x16x4xf32> to vector<16x16x4xf32>
    %78 = vector.shape_cast %75 : vector<16x16x4xf32> to vector<1x16x16x4xf32>
    tpu.vector_store %arg6[%c0_59, %c0_60, %c0_61, %c0_62], %78 {strides = array<i32>} : memref<1x16x16x4xf32, #tpu.memory_space<vmem>>, vector<1x16x16x4xf32>,
    return
  }
  func.func @transform_0(%arg0: i32) -> (i32, i32, i32, i32) {
    %c0_i32 = arith.constant 0 : i32
    %c0_i32_0 = arith.constant 0 : i32
    %c0_i32_1 = arith.constant 0 : i32
    %c0_i32_2 = arith.constant 0 : i32
    return %arg0, %c0_i32, %c0_i32_0, %c0_i32_1 : i32, i32, i32, i32
  }
  func.func @transform_1(%arg0: i32) -> (i32, i32, i32, i32) {
    %c0_i32 = arith.constant 0 : i32
    %c0_i32_0 = arith.constant 0 : i32
    %c0_i32_1 = arith.constant 0 : i32
    %c0_i32_2 = arith.constant 0 : i32
    %c0_i32_3 = arith.constant 0 : i32
    return %c0_i32, %c0_i32_0, %c0_i32_1, %c0_i32_2 : i32, i32, i32, i32
  }
  func.func @transform_2(%arg0: i32) -> (i32, i32, i32) {
    %c0_i32 = arith.constant 0 : i32
    %c0_i32_0 = arith.constant 0 : i32
    %c0_i32_1 = arith.constant 0 : i32
    %c0_i32_2 = arith.constant 0 : i32
    return %c0_i32, %c0_i32_0, %c0_i32_1 : i32, i32, i32
  }
  func.func @transform_3(%arg0: i32) -> (i32, i32) {
    %c0_i32 = arith.constant 0 : i32
    %c0_i32_0 = arith.constant 0 : i32
    %c0_i32_1 = arith.constant 0 : i32
    return %c0_i32, %c0_i32_0 : i32, i32
  }
  func.func @transform_4(%arg0: i32) -> (i32, i32, i32) {
    %c0_i32 = arith.constant 0 : i32
    %c0_i32_0 = arith.constant 0 : i32
    %c0_i32_1 = arith.constant 0 : i32
    %c0_i32_2 = arith.constant 0 : i32
    return %c0_i32, %c0_i32_0, %c0_i32_1 : i32, i32, i32
  }
  func.func @transform_5(%arg0: i32) -> (i32, i32, i32, i32) {
    %c0_i32 = arith.constant 0 : i32
    %c0_i32_0 = arith.constant 0 : i32
    %c0_i32_1 = arith.constant 0 : i32
    %c0_i32_2 = arith.constant 0 : i32
    return %arg0, %c0_i32, %c0_i32_0, %c0_i32_1 : i32, i32, i32, i32
  }
}

module attributes {stable_mosaic.version = 11 : i64} {
  func.func @_conv3x3_1x1_kernel(%arg0: i32, %arg1: memref<1x18x32x4xbf16, #tpu.memory_space<vmem>>, %arg2: memref<3x3x4x8xbf16, #tpu.memory_space<vmem>>, %arg3: memref<1x1x8xf32, #tpu.memory_space<vmem>>, %arg4: memref<8x4xbf16, #tpu.memory_space<vmem>>, %arg5: memref<1x1x4xf32, #tpu.memory_space<vmem>>, %arg6: memref<1x16x16x4xbf16, #tpu.memory_space<vmem>>) attributes {dimension_semantics = [#tpu.dimension_semantics<parallel>], iteration_bounds = array<i64: 2>, scalar_prefetch = 0 : i64, scratch_operands = 0 : i64, tpu.core_type = #tpu.core_type<tc>, window_params = [{transform_indices = @transform_0, window_bounds = array<i64: 1, 18, 32, 4>}, {pipeline_mode = #tpu.pipeline_mode<synchronous>, transform_indices = @transform_1, window_bounds = array<i64: 3, 3, 4, 8>}, {pipeline_mode = #tpu.pipeline_mode<synchronous>, transform_indices = @transform_2, window_bounds = array<i64: 1, 1, 8>}, {pipeline_mode = #tpu.pipeline_mode<synchronous>, transform_indices = @transform_3, window_bounds = array<i64: 8, 4>}, {pipeline_mode = #tpu.pipeline_mode<synchronous>, transform_indices = @transform_4, window_bounds = array<i64: 1, 1, 4>}, {transform_indices = @transform_5, window_bounds = array<i64: 1, 16, 16, 4>}]} {
    %c0 = arith.constant 0 : index
    %c0_0 = arith.constant 0 : index
    %c0_1 = arith.constant 0 : index
    %c0_2 = arith.constant 0 : index
    %0 = vector.load %arg1[%c0, %c0_0, %c0_1, %c0_2] : memref<1x18x32x4xbf16, #tpu.memory_space<vmem>>, vector<1x18x32x4xbf16>
    %1 = vector.shape_cast %0 : vector<1x18x32x4xbf16> to vector<18x32x4xbf16>
    %2 = arith.extf %1 : vector<18x32x4xbf16> to vector<18x32x4xf32>
    %cst = arith.constant 0.000000e+00 : f32
    %3 = vector.broadcast %cst : f32 to vector<16x16x8xf32>
    %4 = vector.extract_strided_slice %2 {offsets = [0, 0, 0], sizes = [18, 16, 4], strides = [1, 1, 1]} : vector<18x32x4xf32> to vector<18x16x4xf32>
    %5 = arith.truncf %4 : vector<18x16x4xf32> to vector<18x16x4xbf16>
    %6 = vector.extract_strided_slice %5 {offsets = [0, 0, 0], sizes = [16, 16, 4], strides = [1, 1, 1]} : vector<18x16x4xbf16> to vector<16x16x4xbf16>
    %c0_3 = arith.constant 0 : index
    %c0_4 = arith.constant 0 : index
    %c0_5 = arith.constant 0 : index
    %c0_6 = arith.constant 0 : index
    %7 = vector.load %arg2[%c0_3, %c0_4, %c0_5, %c0_6] : memref<3x3x4x8xbf16, #tpu.memory_space<vmem>>, vector<1x1x4x8xbf16>
    %8 = vector.shape_cast %7 : vector<1x1x4x8xbf16> to vector<4x8xbf16>
    %cst_7 = arith.constant dense<0.000000e+00> : vector<16x16x8xf32>
    %9 = tpu.matmul %6, %8, %cst_7 {dimension_numbers = #tpu.dot_dimension_numbers<[2], [0], [0, 1], [1], [0, 0, 0, 1, 1, 1], [], []>} : vector<16x16x4xbf16>, vector<4x8xbf16>, vector<16x16x8xf32> -> vector<16x16x8xf32>
    %10 = arith.addf %3, %9 : vector<16x16x8xf32>
    %11 = vector.extract_strided_slice %5 {offsets = [1, 0, 0], sizes = [16, 16, 4], strides = [1, 1, 1]} : vector<18x16x4xbf16> to vector<16x16x4xbf16>
    %c1 = arith.constant 1 : index
    %c0_8 = arith.constant 0 : index
    %c0_9 = arith.constant 0 : index
    %c0_10 = arith.constant 0 : index
    %12 = vector.load %arg2[%c1, %c0_8, %c0_9, %c0_10] : memref<3x3x4x8xbf16, #tpu.memory_space<vmem>>, vector<1x1x4x8xbf16>
    %13 = vector.shape_cast %12 : vector<1x1x4x8xbf16> to vector<4x8xbf16>
    %cst_11 = arith.constant dense<0.000000e+00> : vector<16x16x8xf32>
    %14 = tpu.matmul %11, %13, %cst_11 {dimension_numbers = #tpu.dot_dimension_numbers<[2], [0], [0, 1], [1], [0, 0, 0, 1, 1, 1], [], []>} : vector<16x16x4xbf16>, vector<4x8xbf16>, vector<16x16x8xf32> -> vector<16x16x8xf32>
    %15 = arith.addf %10, %14 : vector<16x16x8xf32>
    %16 = vector.extract_strided_slice %5 {offsets = [2, 0, 0], sizes = [16, 16, 4], strides = [1, 1, 1]} : vector<18x16x4xbf16> to vector<16x16x4xbf16>
    %c2 = arith.constant 2 : index
    %c0_12 = arith.constant 0 : index
    %c0_13 = arith.constant 0 : index
    %c0_14 = arith.constant 0 : index
    %17 = vector.load %arg2[%c2, %c0_12, %c0_13, %c0_14] : memref<3x3x4x8xbf16, #tpu.memory_space<vmem>>, vector<1x1x4x8xbf16>
    %18 = vector.shape_cast %17 : vector<1x1x4x8xbf16> to vector<4x8xbf16>
    %cst_15 = arith.constant dense<0.000000e+00> : vector<16x16x8xf32>
    %19 = tpu.matmul %16, %18, %cst_15 {dimension_numbers = #tpu.dot_dimension_numbers<[2], [0], [0, 1], [1], [0, 0, 0, 1, 1, 1], [], []>} : vector<16x16x4xbf16>, vector<4x8xbf16>, vector<16x16x8xf32> -> vector<16x16x8xf32>
    %20 = arith.addf %15, %19 : vector<16x16x8xf32>
    %c31_i32 = arith.constant 31 : i32
    %21 = tpu.dynamic_rotate %2 by %c31_i32 dim 1 : vector<18x32x4xf32>, i32 -> vector<18x32x4xf32>
    %22 = vector.extract_strided_slice %21 {offsets = [0, 0, 0], sizes = [18, 16, 4], strides = [1, 1, 1]} : vector<18x32x4xf32> to vector<18x16x4xf32>
    %23 = arith.truncf %22 : vector<18x16x4xf32> to vector<18x16x4xbf16>
    %24 = vector.extract_strided_slice %23 {offsets = [0, 0, 0], sizes = [16, 16, 4], strides = [1, 1, 1]} : vector<18x16x4xbf16> to vector<16x16x4xbf16>
    %c0_16 = arith.constant 0 : index
    %c1_17 = arith.constant 1 : index
    %c0_18 = arith.constant 0 : index
    %c0_19 = arith.constant 0 : index
    %25 = vector.load %arg2[%c0_16, %c1_17, %c0_18, %c0_19] : memref<3x3x4x8xbf16, #tpu.memory_space<vmem>>, vector<1x1x4x8xbf16>
    %26 = vector.shape_cast %25 : vector<1x1x4x8xbf16> to vector<4x8xbf16>
    %cst_20 = arith.constant dense<0.000000e+00> : vector<16x16x8xf32>
    %27 = tpu.matmul %24, %26, %cst_20 {dimension_numbers = #tpu.dot_dimension_numbers<[2], [0], [0, 1], [1], [0, 0, 0, 1, 1, 1], [], []>} : vector<16x16x4xbf16>, vector<4x8xbf16>, vector<16x16x8xf32> -> vector<16x16x8xf32>
    %28 = arith.addf %20, %27 : vector<16x16x8xf32>
    %29 = vector.extract_strided_slice %23 {offsets = [1, 0, 0], sizes = [16, 16, 4], strides = [1, 1, 1]} : vector<18x16x4xbf16> to vector<16x16x4xbf16>
    %c1_21 = arith.constant 1 : index
    %c1_22 = arith.constant 1 : index
    %c0_23 = arith.constant 0 : index
    %c0_24 = arith.constant 0 : index
    %30 = vector.load %arg2[%c1_21, %c1_22, %c0_23, %c0_24] : memref<3x3x4x8xbf16, #tpu.memory_space<vmem>>, vector<1x1x4x8xbf16>
    %31 = vector.shape_cast %30 : vector<1x1x4x8xbf16> to vector<4x8xbf16>
    %cst_25 = arith.constant dense<0.000000e+00> : vector<16x16x8xf32>
    %32 = tpu.matmul %29, %31, %cst_25 {dimension_numbers = #tpu.dot_dimension_numbers<[2], [0], [0, 1], [1], [0, 0, 0, 1, 1, 1], [], []>} : vector<16x16x4xbf16>, vector<4x8xbf16>, vector<16x16x8xf32> -> vector<16x16x8xf32>
    %33 = arith.addf %28, %32 : vector<16x16x8xf32>
    %34 = vector.extract_strided_slice %23 {offsets = [2, 0, 0], sizes = [16, 16, 4], strides = [1, 1, 1]} : vector<18x16x4xbf16> to vector<16x16x4xbf16>
    %c2_26 = arith.constant 2 : index
    %c1_27 = arith.constant 1 : index
    %c0_28 = arith.constant 0 : index
    %c0_29 = arith.constant 0 : index
    %35 = vector.load %arg2[%c2_26, %c1_27, %c0_28, %c0_29] : memref<3x3x4x8xbf16, #tpu.memory_space<vmem>>, vector<1x1x4x8xbf16>
    %36 = vector.shape_cast %35 : vector<1x1x4x8xbf16> to vector<4x8xbf16>
    %cst_30 = arith.constant dense<0.000000e+00> : vector<16x16x8xf32>
    %37 = tpu.matmul %34, %36, %cst_30 {dimension_numbers = #tpu.dot_dimension_numbers<[2], [0], [0, 1], [1], [0, 0, 0, 1, 1, 1], [], []>} : vector<16x16x4xbf16>, vector<4x8xbf16>, vector<16x16x8xf32> -> vector<16x16x8xf32>
    %38 = arith.addf %33, %37 : vector<16x16x8xf32>
    %c30_i32 = arith.constant 30 : i32
    %39 = tpu.dynamic_rotate %2 by %c30_i32 dim 1 : vector<18x32x4xf32>, i32 -> vector<18x32x4xf32>
    %40 = vector.extract_strided_slice %39 {offsets = [0, 0, 0], sizes = [18, 16, 4], strides = [1, 1, 1]} : vector<18x32x4xf32> to vector<18x16x4xf32>
    %41 = arith.truncf %40 : vector<18x16x4xf32> to vector<18x16x4xbf16>
    %42 = vector.extract_strided_slice %41 {offsets = [0, 0, 0], sizes = [16, 16, 4], strides = [1, 1, 1]} : vector<18x16x4xbf16> to vector<16x16x4xbf16>
    %c0_31 = arith.constant 0 : index
    %c2_32 = arith.constant 2 : index
    %c0_33 = arith.constant 0 : index
    %c0_34 = arith.constant 0 : index
    %43 = vector.load %arg2[%c0_31, %c2_32, %c0_33, %c0_34] : memref<3x3x4x8xbf16, #tpu.memory_space<vmem>>, vector<1x1x4x8xbf16>
    %44 = vector.shape_cast %43 : vector<1x1x4x8xbf16> to vector<4x8xbf16>
    %cst_35 = arith.constant dense<0.000000e+00> : vector<16x16x8xf32>
    %45 = tpu.matmul %42, %44, %cst_35 {dimension_numbers = #tpu.dot_dimension_numbers<[2], [0], [0, 1], [1], [0, 0, 0, 1, 1, 1], [], []>} : vector<16x16x4xbf16>, vector<4x8xbf16>, vector<16x16x8xf32> -> vector<16x16x8xf32>
    %46 = arith.addf %38, %45 : vector<16x16x8xf32>
    %47 = vector.extract_strided_slice %41 {offsets = [1, 0, 0], sizes = [16, 16, 4], strides = [1, 1, 1]} : vector<18x16x4xbf16> to vector<16x16x4xbf16>
    %c1_36 = arith.constant 1 : index
    %c2_37 = arith.constant 2 : index
    %c0_38 = arith.constant 0 : index
    %c0_39 = arith.constant 0 : index
    %48 = vector.load %arg2[%c1_36, %c2_37, %c0_38, %c0_39] : memref<3x3x4x8xbf16, #tpu.memory_space<vmem>>, vector<1x1x4x8xbf16>
    %49 = vector.shape_cast %48 : vector<1x1x4x8xbf16> to vector<4x8xbf16>
    %cst_40 = arith.constant dense<0.000000e+00> : vector<16x16x8xf32>
    %50 = tpu.matmul %47, %49, %cst_40 {dimension_numbers = #tpu.dot_dimension_numbers<[2], [0], [0, 1], [1], [0, 0, 0, 1, 1, 1], [], []>} : vector<16x16x4xbf16>, vector<4x8xbf16>, vector<16x16x8xf32> -> vector<16x16x8xf32>
    %51 = arith.addf %46, %50 : vector<16x16x8xf32>
    %52 = vector.extract_strided_slice %41 {offsets = [2, 0, 0], sizes = [16, 16, 4], strides = [1, 1, 1]} : vector<18x16x4xbf16> to vector<16x16x4xbf16>
    %c2_41 = arith.constant 2 : index
    %c2_42 = arith.constant 2 : index
    %c0_43 = arith.constant 0 : index
    %c0_44 = arith.constant 0 : index
    %53 = vector.load %arg2[%c2_41, %c2_42, %c0_43, %c0_44] : memref<3x3x4x8xbf16, #tpu.memory_space<vmem>>, vector<1x1x4x8xbf16>
    %54 = vector.shape_cast %53 : vector<1x1x4x8xbf16> to vector<4x8xbf16>
    %cst_45 = arith.constant dense<0.000000e+00> : vector<16x16x8xf32>
    %55 = tpu.matmul %52, %54, %cst_45 {dimension_numbers = #tpu.dot_dimension_numbers<[2], [0], [0, 1], [1], [0, 0, 0, 1, 1, 1], [], []>} : vector<16x16x4xbf16>, vector<4x8xbf16>, vector<16x16x8xf32> -> vector<16x16x8xf32>
    %56 = arith.addf %51, %55 : vector<16x16x8xf32>
    %c0_46 = arith.constant 0 : index
    %c0_47 = arith.constant 0 : index
    %c0_48 = arith.constant 0 : index
    %57 = vector.load %arg3[%c0_46, %c0_47, %c0_48] : memref<1x1x8xf32, #tpu.memory_space<vmem>>, vector<1x1x8xf32>
    %58 = vector.broadcast %57 : vector<1x1x8xf32> to vector<16x16x8xf32>
    %59 = arith.addf %56, %58 : vector<16x16x8xf32>
    %cst_49 = arith.constant 0.000000e+00 : f32
    %60 = vector.broadcast %cst_49 : f32 to vector<16x16x8xf32>
    %61 = arith.cmpf ogt, %59, %60 : vector<16x16x8xf32>
    %cst_50 = arith.constant 1.000000e-01 : f32
    %62 = vector.broadcast %cst_50 : f32 to vector<16x16x8xf32>
    %63 = arith.mulf %62, %59 : vector<16x16x8xf32>
    %64 = arith.select %61, %59, %63 : vector<16x16x8xi1>, vector<16x16x8xf32>
    %65 = arith.truncf %64 : vector<16x16x8xf32> to vector<16x16x8xbf16>
    %c0_51 = arith.constant 0 : index
    %c0_52 = arith.constant 0 : index
    %66 = vector.load %arg4[%c0_51, %c0_52] : memref<8x4xbf16, #tpu.memory_space<vmem>>, vector<8x4xbf16>
    %cst_53 = arith.constant dense<0.000000e+00> : vector<16x16x4xf32>
    %67 = tpu.matmul %65, %66, %cst_53 {dimension_numbers = #tpu.dot_dimension_numbers<[2], [0], [0, 1], [1], [0, 0, 0, 1, 1, 1], [], []>} : vector<16x16x8xbf16>, vector<8x4xbf16>, vector<16x16x4xf32> -> vector<16x16x4xf32>
    %c0_54 = arith.constant 0 : index
    %c0_55 = arith.constant 0 : index
    %c0_56 = arith.constant 0 : index
    %68 = vector.load %arg5[%c0_54, %c0_55, %c0_56] : memref<1x1x4xf32, #tpu.memory_space<vmem>>, vector<1x1x4xf32>
    %69 = vector.broadcast %68 : vector<1x1x4xf32> to vector<16x16x4xf32>
    %70 = arith.addf %67, %69 : vector<16x16x4xf32>
    %cst_57 = arith.constant 0.000000e+00 : f32
    %71 = vector.broadcast %cst_57 : f32 to vector<16x16x4xf32>
    %72 = arith.cmpf ogt, %70, %71 : vector<16x16x4xf32>
    %cst_58 = arith.constant 1.000000e-01 : f32
    %73 = vector.broadcast %cst_58 : f32 to vector<16x16x4xf32>
    %74 = arith.mulf %73, %70 : vector<16x16x4xf32>
    %75 = arith.select %72, %70, %74 : vector<16x16x4xi1>, vector<16x16x4xf32>
    %76 = arith.truncf %75 : vector<16x16x4xf32> to vector<16x16x4xbf16>
    %c0_59 = arith.constant 0 : index
    %c0_60 = arith.constant 0 : index
    %c0_61 = arith.constant 0 : index
    %c0_62 = arith.constant 0 : index
    %77 = vector.load %arg6[%c0_59, %c0_60, %c0_61, %c0_62] : memref<1x16x16x4xbf16, #tpu.memory_space<vmem>>, vector<1x16x16x4xbf16>
    %78 = vector.shape_cast %77 : vector<1x16x16x4xbf16> to vector<16x16x4xbf16>
    %79 = vector.shape_cast %76 : vector<16x16x4xbf16> to vector<1x16x16x4xbf16>
    tpu.vector_store %arg6[%c0_59, %c0_60, %c0_61, %c0_62], %79 {strides = array<i32>} : memref<1x16x16x4xbf16, #tpu.memory_space<vmem>>, vector<1x16x16x4xbf16>,
    return
  }
  func.func @transform_0(%arg0: i32) -> (i32, i32, i32, i32) {
    %c0_i32 = arith.constant 0 : i32
    %c0_i32_0 = arith.constant 0 : i32
    %c0_i32_1 = arith.constant 0 : i32
    %c0_i32_2 = arith.constant 0 : i32
    return %arg0, %c0_i32, %c0_i32_0, %c0_i32_1 : i32, i32, i32, i32
  }
  func.func @transform_1(%arg0: i32) -> (i32, i32, i32, i32) {
    %c0_i32 = arith.constant 0 : i32
    %c0_i32_0 = arith.constant 0 : i32
    %c0_i32_1 = arith.constant 0 : i32
    %c0_i32_2 = arith.constant 0 : i32
    %c0_i32_3 = arith.constant 0 : i32
    return %c0_i32, %c0_i32_0, %c0_i32_1, %c0_i32_2 : i32, i32, i32, i32
  }
  func.func @transform_2(%arg0: i32) -> (i32, i32, i32) {
    %c0_i32 = arith.constant 0 : i32
    %c0_i32_0 = arith.constant 0 : i32
    %c0_i32_1 = arith.constant 0 : i32
    %c0_i32_2 = arith.constant 0 : i32
    return %c0_i32, %c0_i32_0, %c0_i32_1 : i32, i32, i32
  }
  func.func @transform_3(%arg0: i32) -> (i32, i32) {
    %c0_i32 = arith.constant 0 : i32
    %c0_i32_0 = arith.constant 0 : i32
    %c0_i32_1 = arith.constant 0 : i32
    return %c0_i32, %c0_i32_0 : i32, i32
  }
  func.func @transform_4(%arg0: i32) -> (i32, i32, i32) {
    %c0_i32 = arith.constant 0 : i32
    %c0_i32_0 = arith.constant 0 : i32
    %c0_i32_1 = arith.constant 0 : i32
    %c0_i32_2 = arith.constant 0 : i32
    return %c0_i32, %c0_i32_0, %c0_i32_1 : i32, i32, i32
  }
  func.func @transform_5(%arg0: i32) -> (i32, i32, i32, i32) {
    %c0_i32 = arith.constant 0 : i32
    %c0_i32_0 = arith.constant 0 : i32
    %c0_i32_1 = arith.constant 0 : i32
    %c0_i32_2 = arith.constant 0 : i32
    return %arg0, %c0_i32, %c0_i32_0, %c0_i32_1 : i32, i32, i32, i32
  }
}

</mosaic_0001>

<bundles_post_ra>
// kernel: upsample_block_forward.4
= control target key start
LH: loop header
LB: loop body
LE: loop exit
PB: predicated region body
PF: predicated region fallthrough
CT: control target
= control target key end

     0   :  { %s525_s15 = smov 0   ;;  %s558_s0 = inlined_call_operand.vmem [shape: bf16[128,8], index: 0, kind: input, shape index: {}]   ;;  %s559_s1 = inlined_call_operand.vmem [shape: bf16[8,4], index: 1, kind: input, shape index: {}]   ;;  %s560_s2 = inlined_call_operand.vmem [shape: f32[1,4], index: 2, kind: input, shape index: {}]   ;;  %s561_s3 = inlined_call_operand.vmem [shape: bf16[4,4], index: 3, kind: input, shape index: {}]   ;;  %s562_s4 = inlined_call_operand.vmem [shape: bf16[128,4], index: 4, kind: output, shape index: {}]  }
   0x1 LB: > { %s436_s16 = sadd.s32 4294967295, %s498_s15   ;;  %p440_p0 = scmp.ge.s32.totalorder %s498_s15, 1  ;;  %s498_s15 = sphi %s525_s15, %s14_s15  }
   0x2   : > { %p163_p1 = scmp.lt.s32.totalorder %s498_s15, 5 }
   0x4   : > { %p164_p2 = pnand %p440_p0, %p163_p1 }
   0x5   : > { %v206_v0 = vld [vmem:[%s559_s1] sm:$0xf] (!%p164_p2)  ;;  %vm231_vm0 = vcmask (!%p164_p2), 1043456   ;;  %s441_s19 = sshll.u32 (!%p164_p2), %s436_s16, 2  ;;  %vm224_vm1 = vcmask (!%p164_p2), 64512   ;;  %vm306_vm2 = vcmask (!%p164_p2), 1041408  }
   0x6   : > { %167 = sbr.rel (%p164_p2) target bundleno = 459 (0x1cb), region = 36  ;;  %480 = vmatprep.subr.msk.bf16.mxu0 (!%p164_p2), %vm231_vm0, %v206_v0  ;;  %v233_v1 = vsel (!%p164_p2), %vm231_vm0, %v206_v0, 0  ;;  %p190_p3 = scmp.lt.s32.totalorder (!%p164_p2), %s441_s19, 15  ;;  %v298_v4 = vld [vmem:[%s561_s3] sm:$0x3] (!%p164_p2)  ;;  %vm299_vm7 = vcmask (!%p164_p2), 31744  }
   0x7   : > { %469 = vmatpush3.bf16.msra.mxu0 (!%p164_p2), %v233_v1  ;;  %481 = vmatprep.subr.msk.bf16.mxu1 (!%p164_p2), %vm306_vm2, %v298_v4  ;;  %v308_v5 = vsel (!%p164_p2), %vm306_vm2, %v298_v4, 0  ;;  %v445_v6 = vld [vmem:[%s560_s2] ss:$0 sm:$0xff] (!%p164_p2)  ;;  %vm375_vm8 = vcmask (!%p164_p2), 27648  }
   0x8   : > { %475 = vmatpush3.bf16.msra.mxu1 (!%p164_p2), %v308_v5 }
   0xd   : > { %s564_s19 = smov (!%p190_p3, %s441_s19), 15 }
   0xe   : > { %s442_s20 = sshll.u32 %s564_s19, 2 }
   0xf   : > { %s193_s23 = scalar_lea.vmem %s558_s0, %s442_s20  ;;  %s199_s30 = scalar_lea.vmem %s562_s4, %s442_s20 }
  0x10   : > { %v490_v2 = vld [vmem:[%s193_s23] sm:$0xff]   ;;  %v491_v3 = vld [vmem:[%s193_s23 + $0x8] sm:$0xff]  }
  0x11   : > { %470 = vmatprep.mubr.msk.bf16.mxu0 %vm224_vm1, %v490_v2 }
  0x12   : > { %471 = vmatmul.mubr.msk.bf16.vlgmr.msra.gmra.mrb[0].mxu0 %vm224_vm1, %v491_v3 }
  0xe5   : > { %v472_v7 = vpop.f32.mrb[0].mxu0 }
  0xe6   : > { %v278_v8 = vadd.f32 %v472_v7, %v445_v6  ;;  %v269_v9 = vpop.f32.mrb[1].mxu0 }
  0xe7   : > { %v270_v10 = vadd.f32 %v445_v6, %v269_v9  ;;  %v473_v11 = vpop.f32.mrb[2].mxu0 }
  0xe8   : > { %v290_v12 = vmul.f32 0.1, %v278_v8  ;;  %v281_v13 = vadd.f32 %v473_v11, %v445_v6  ;;  %v272_v14 = vpop.f32.mrb[3].mxu0  ;;  %vm286_vm3 = vcmp.gt.f32.partialorder %v278_v8, 0.0 }
  0xe9   : > { %v288_v15 = vmul.f32 0.1, %v270_v10  ;;  %v273_v16 = vadd.f32 %v445_v6, %v272_v14  ;;  %vm284_vm5 = vcmp.gt.f32.partialorder %v270_v10, 0.0 }
  0xea   : > { %vm287_vm4 = vcmp.gt.f32.partialorder %v281_v13, 0.0  ;;  %v291_v17 = vmul.f32 0.1, %v281_v13  ;;  %v294_v19 = vsel %vm286_vm3, %v278_v8, %v290_v12 }
  0xeb   : > { %v289_v18 = vmul.f32 0.1, %v273_v16  ;;  %vm285_vm6 = vcmp.gt.f32.partialorder %v273_v16, 0.0  ;;  %v292_v22 = vsel %vm284_vm5, %v270_v10, %v288_v15 }
  0xec   : > { %v295_v20 = vsel %vm287_vm4, %v281_v13, %v291_v17 }
  0xed   : > { %v297_v21 = vpack.c.bf16 %v295_v20, %v294_v19  ;;  %v293_v23 = vsel %vm285_vm6, %v273_v16, %v289_v18 }
  0xee   : > { %v296_v24 = vpack.c.bf16 %v293_v23, %v292_v22 }
  0xf0   : > { %476 = vmatprep.mubr.msk.bf16.mxu1 %vm299_vm7, %v296_v24 }
  0xf1   : > { %477 = vmatmul.mubr.msk.bf16.vlgmr.msra.gmra.mrb[0].mxu1 %vm299_vm7, %v297_v21 }
 0x1c4   : > { %v478_v25 = vpop.f32.mrb[0].mxu1 }
 0x1c5   : > { %v460_v26 = vpack.c.bf16 %v478_v25, %v478_v25  ;;  %v344_v27 = vpop.f32.mrb[1].mxu1 }
 0x1c6   : > { %v458_v28 = vpack.c.bf16 %v344_v27, %v344_v27  ;;  %v479_v29 = vpop.f32.mrb[2].mxu1 }
 0x1c7   : > { %378 = vst.msk [vmem:[%s199_s30 + $0x8] sm:$0xf] %vm375_vm8, %v460_v26  ;;  %v461_v30 = vpack.c.bf16 %v479_v29, %v479_v29  ;;  %v347_v31 = vpop.f32.mrb[3].mxu1 }
 0x1c8   : > { %376 = vst.msk [vmem:[%s199_s30] sm:$0xf] %vm375_vm8, %v458_v28  ;;  %v459_v32 = vpack.c.bf16 %v347_v31, %v347_v31 }
 0x1c9   : > { %379 = vst.msk [vmem:[%s199_s30 + $0xc] sm:$0xf] %vm375_vm8, %v461_v30 }
 0x1ca   : > { %377 = vst.msk [vmem:[%s199_s30 + $0x4] sm:$0xf] %vm375_vm8, %v459_v32 }
 0x1cb PF: > { %s14_s15 = sadd.s32 1, %s498_s15  }
 0x1cc   : > { %p11_p4 = scmp.ge.s32.totalorder %s14_s15, 6  }
 0x1ce   :  { %13 = sbr.rel (!%p11_p4) target bundleno = 1 (0x1), region = 66 }

// kernel: upsample_block_forward.5
= control target key start
LH: loop header
LB: loop body
LE: loop exit
PB: predicated region body
PF: predicated region fallthrough
CT: control target
= control target key end

     0   :  { %s1272_s21 = smov 0   ;;  %s1274_s22 = smov 0   ;;  %s1445_s0 = inlined_call_operand.vmem [shape: bf16[2,16,16,8], index: 0, kind: input, shape index: {}]   ;;  %s1446_s1 = inlined_call_operand.vmem [shape: bf16[2,8,16,4], index: 1, kind: input, shape index: {}]   ;;  %s1447_s2 = inlined_call_operand.vmem [shape: bf16[8,4], index: 2, kind: input, shape index: {}]   ;;  %s1448_s3 = inlined_call_operand.vmem [shape: f32[1,4], index: 3, kind: input, shape index: {}]   ;;  %s1449_s4 = inlined_call_operand.vmem [shape: bf16[4,4], index: 4, kind: input, shape index: {}]   ;;  %s1450_s5 = inlined_call_operand.vmem [shape: f32[1,4], index: 5, kind: input, shape index: {}]   ;;  %s1451_s6 = inlined_call_operand.vmem [shape: bf16[2,16,16,4], index: 6, kind: output, shape index: {}]  }
   0x1   :  { %s1276_s23 = smov 0   ;;  %s1278_s24 = smov 0  }
   0x2   :  { %s1280_s25 = smov 0  }
   0x3 LB: > { %s25_s26 = sadd.s32 1, %s1227_s23  ;;  %s28_s27 = sadd.s32 1, %s1231_s24  ;;  %s1235_s25 = sphi %s1280_s25, %s16_s25   ;;  %s1231_s24 = sphi %s1278_s24, %s1455_s24   ;;  %s1227_s23 = sphi %s1276_s23, %s1454_s23   ;;  %s1223_s22 = sphi %s1274_s22, %s1453_s22   ;;  %s1219_s21 = sphi %s1272_s21, %s1452_s21  }
   0x4   : > { %p26_p0 = scmp.ge.s32.totalorder %s25_s26, 2  ;;  %p1001_p1 = scmp.ge.s32.totalorder %s1235_s25, 1 }
   0x5   : > { %p252_p2 = scmp.lt.s32.totalorder %s1235_s25, 5 }
   0x6   : > { %s1457_s26 = smov (%p26_p0, %s25_s26), 0  ;;  %s1459_s27 = smov (!%p26_p0, %s28_s27), %s1231_s24 }
   0x7   : > { %p253_p3 = pnand %p1001_p1, %p252_p2  ;;  %p30_p4 = scmp.ge.s32.totalorder %s1459_s27, 2 }
   0x8   : > { %v352_v0 = vld [vmem:[%s1447_s2] sm:$0xf] (!%p253_p3)  ;;  %vm425_vm0 = vcmask (!%p253_p3), 1043456   ;;  %s1002_s30 = sshll.u32 (!%p253_p3), %s1219_s21, 3  ;;  %p303_p5 = scmp.lt.s32.totalorder (!%p253_p3), %s1223_s22, 1  ;;  %vm400_vm1 = vcmask (!%p253_p3), 64512  }
   0x9   : > { %s1461_s27 = smov (%p30_p4, %s1459_s27), 0  ;;  %256 = sbr.rel (%p253_p3) target bundleno = 495 (0x1ef), region = 44 }
   0xa   : > { %1147 = vmatprep.subr.msk.bf16.mxu0 (!%p253_p3), %vm425_vm0, %v352_v0  ;;  %v427_v1 = vsel (!%p253_p3), %vm425_vm0, %v352_v0, 0  ;;  %p305_p6 = scmp.lt.s32.totalorder (!%p253_p3), %s1002_s30, 15  ;;  %v582_v10 = vld [vmem:[%s1449_s4] sm:$0x3] (!%p253_p3)  ;;  %vm624_vm2 = vcmask (!%p253_p3), 1041408   ;;  %vm599_vm7 = vcmask (!%p253_p3), 31744  }
   0xb   : > { %1112 = vmatpush3.bf16.msra.mxu0 (!%p253_p3), %v427_v1  ;;  %1148 = vmatprep.subr.msk.bf16.mxu1 (!%p253_p3), %vm624_vm2, %v582_v10  ;;  %v626_v11 = vsel (!%p253_p3), %vm624_vm2, %v582_v10, 0  ;;  %v1333_v12 = vld [vmem:[%s1448_s3] ss:$0 sm:$0xff] (!%p253_p3)  ;;  %s1006_s18 = sshll.u32 (!%p253_p3), %s1219_s21, 2 }
   0xc   : > { %1130 = vmatpush3.bf16.msra.mxu1 (!%p253_p3), %v626_v11  ;;  %p316_p7 = scmp.lt.s32.totalorder (!%p253_p3), %s1006_s18, 7 }
  0x10   : > { %s1463_s22 = smov (!%p303_p5, %s1223_s22), 1  ;;  %s1465_s30 = smov (!%p305_p6, %s1002_s30), 15 }
  0x11   : > { %s1004_s7 = sshll.u32 %s1463_s22, 5  ;;  %s1003_s8 = sshll.u32 %s1465_s30, 1 }
  0x12   : > { %s1311_s9 = sadd.s32 %s1004_s7, %s1003_s8  ;;  %s1467_s18 = smov (!%p316_p7, %s1006_s18), 7 }
  0x13   : > { %s1005_s10 = sshll.u32 %s1311_s9, 2  ;;  %s1007_s19 = sshll.u32 %s1467_s18, 1 }
  0x14   : > { %s311_s13 = scalar_lea.vmem %s1445_s0, %s1005_s10  ;;  %s1008_s20 = sshll.u32 %s1463_s22, 4 }
  0x15   : > { %v1189_v2 = vld [vmem:[%s311_s13] sm:$0xff]   ;;  %v1190_v3 = vld [vmem:[%s311_s13 + $0x8] sm:$0xff]   ;;  %v1191_v4 = vld [vmem:[%s311_s13 + $0x10] sm:$0xff]   ;;  %s320_s28 = sadd.s32 %s1008_s20, %s1007_s19 }
  0x16   : > { %1113 = vmatprep.mubr.msk.bf16.mxu0 %vm400_vm1, %v1189_v2  ;;  %v1192_v5 = vld [vmem:[%s311_s13 + $0x18] sm:$0xff]   ;;  %v1193_v6 = vld [vmem:[%s311_s13 + $0x20] sm:$0xff]   ;;  %v1194_v7 = vld [vmem:[%s311_s13 + $0x28] sm:$0xff]   ;;  %s1009_s29 = sshll.u32 %s320_s28, 2 }
  0x17   : > { %1114 = vmatmul.mubr.msk.bf16.vlgmr.msra.gmra.mrb[0].mxu0 %vm400_vm1, %v1190_v3  ;;  %v1195_v8 = vld [vmem:[%s311_s13 + $0x30] sm:$0xff]   ;;  %v1196_v9 = vld [vmem:[%s311_s13 + $0x38] sm:$0xff]   ;;  %s1364_s8 = scalar_lea.vmem %s1446_s1, %s1009_s29  ;;  %s1382_s13 = scalar_lea.vmem %s1451_s6, %s1005_s10 }
  0x18   : > { %1117 = vmatprep.mubr.msk.bf16.mxu0 %vm400_vm1, %v1191_v4 }
  0x1f   : > { %1118 = vmatmul.mubr.msk.bf16.gmra.mrb[4].mxu0 %vm400_vm1, %v1192_v5 }
  0x20   : > { %1121 = vmatprep.mubr.msk.bf16.mxu0 %vm400_vm1, %v1193_v6 }
  0x27   : > { %1122 = vmatmul.mubr.msk.bf16.gmra.mrb[8].mxu0 %vm400_vm1, %v1194_v7 }
  0x28   : > { %1125 = vmatprep.mubr.msk.bf16.mxu0 %vm400_vm1, %v1195_v8 }
  0x2f   : > { %1126 = vmatmul.mubr.msk.bf16.gmra.mrb[12].mxu0 %vm400_vm1, %v1196_v9 }
  0xea   : > { %v1115_v13 = vpop.f32.mrb[0].mxu0 }
  0xeb   : > { %v472_v14 = vadd.f32 %v1115_v13, %v1333_v12  ;;  %v463_v15 = vpop.f32.mrb[1].mxu0 }
  0xec   : > { %v464_v16 = vadd.f32 %v1333_v12, %v463_v15  ;;  %v1116_v17 = vpop.f32.mrb[2].mxu0 }
  0xed   : > { %v544_v18 = vmul.f32 0.1, %v472_v14  ;;  %v475_v19 = vadd.f32 %v1116_v17, %v1333_v12  ;;  %v466_v20 = vpop.f32.mrb[3].mxu0  ;;  %vm528_vm3 = vcmp.gt.f32.partialorder %v472_v14, 0.0 }
  0xee   : > { %v542_v21 = vmul.f32 0.1, %v464_v16  ;;  %v467_v22 = vadd.f32 %v1333_v12, %v466_v20  ;;  %vm526_vm5 = vcmp.gt.f32.partialorder %v464_v16, 0.0 }
  0xef   : > { %vm529_vm4 = vcmp.gt.f32.partialorder %v475_v19, 0.0  ;;  %v545_v23 = vmul.f32 0.1, %v475_v19  ;;  %v560_v25 = vsel %vm528_vm3, %v472_v14, %v544_v18 }
  0xf0   : > { %v543_v24 = vmul.f32 0.1, %v467_v22  ;;  %vm527_vm6 = vcmp.gt.f32.partialorder %v467_v22, 0.0  ;;  %v558_v29 = vsel %vm526_vm5, %v464_v16, %v542_v21  ;;  %vm860_vm5 = vcmask 27648  }
  0xf1   : > { %v561_v26 = vsel %vm529_vm4, %v475_v19, %v545_v23 }
  0xf2   : > { %v575_v27 = vpack.c.bf16 %v561_v26, %v560_v25  ;;  %v1119_v28 = vpop.f32.mrb[4].mxu0  ;;  %v559_v30 = vsel %vm527_vm6, %v467_v22, %v543_v24  ;;  %v1370_v25 = vld [vmem:[%s1450_s5] ss:$0 sm:$0xff] }
  0xf3   : > { %v488_v31 = vadd.f32 %v1119_v28, %v1333_v12  ;;  %v479_v32 = vpop.f32.mrb[5].mxu0  ;;  %v574_v33 = vpack.c.bf16 %v559_v30, %v558_v29  ;;  %v1090_v30 = vld [vmem:[%s1364_s8 + $0x8] sm:$0xff]  }
  0xf4   : > { %v480_v34 = vadd.f32 %v1333_v12, %v479_v32  ;;  %v1120_v35 = vpop.f32.mrb[6].mxu0 }
  0xf5   : > { %v548_v36 = vmul.f32 0.1, %v488_v31  ;;  %v491_v37 = vadd.f32 %v1120_v35, %v1333_v12  ;;  %v482_v38 = vpop.f32.mrb[7].mxu0  ;;  %1131 = vmatprep.mubr.msk.bf16.mxu1 %vm599_vm7, %v574_v33  ;;  %vm532_vm8 = vcmp.gt.f32.partialorder %v488_v31, 0.0 }
  0xf6   : > { %v546_v39 = vmul.f32 0.1, %v480_v34  ;;  %v483_v40 = vadd.f32 %v1333_v12, %v482_v38  ;;  %1132 = vmatmul.mubr.msk.bf16.vlgmr.msra.gmra.mrb[0].mxu1 %vm599_vm7, %v575_v27  ;;  %vm530_vm9 = vcmp.gt.f32.partialorder %v480_v34, 0.0  ;;  %v1080_v38 = vunpack.c.l.bf16 %v1090_v30 }
  0xf7   : > { %vm533_vm10 = vcmp.gt.f32.partialorder %v491_v37, 0.0  ;;  %v549_v41 = vmul.f32 0.1, %v491_v37  ;;  %v564_v43 = vsel %vm532_vm8, %v488_v31, %v548_v36 }
  0xf8   : > { %vm531_vm11 = vcmp.gt.f32.partialorder %v483_v40, 0.0  ;;  %v547_v42 = vmul.f32 0.1, %v483_v40  ;;  %v562_v45 = vsel %vm530_vm9, %v480_v34, %v546_v39 }
  0xf9   : > { %v565_v44 = vsel %vm533_vm10, %v491_v37, %v549_v41 }
  0xfa   : > { %v577_v46 = vpack.c.bf16 %v565_v44, %v564_v43  ;;  %v563_v47 = vsel %vm531_vm11, %v483_v40, %v547_v42  ;;  %v1123_v48 = vpop.f32.mrb[8].mxu0  ;;  %v1081_v43 = vunpack.c.h.bf16 %v1090_v30 }
  0xfb   : > { %v576_v49 = vpack.c.bf16 %v563_v47, %v562_v45  ;;  %v504_v50 = vadd.f32 %v1123_v48, %v1333_v12  ;;  %v495_v51 = vpop.f32.mrb[9].mxu0 }
  0xfc   : > { %v496_v52 = vadd.f32 %v1333_v12, %v495_v51  ;;  %v1124_v53 = vpop.f32.mrb[10].mxu0 }
  0xfd   : > { %v552_v54 = vmul.f32 0.1, %v504_v50  ;;  %v507_v55 = vadd.f32 %v1124_v53, %v1333_v12  ;;  %v498_v56 = vpop.f32.mrb[11].mxu0  ;;  %1135 = vmatprep.mubr.msk.bf16.mxu1 %vm599_vm7, %v576_v49  ;;  %vm536_vm12 = vcmp.gt.f32.partialorder %v504_v50, 0.0 }
  0xfe   : > { %v550_v57 = vmul.f32 0.1, %v496_v52  ;;  %v499_v58 = vadd.f32 %v1333_v12, %v498_v56  ;;  %1136 = vmatmul.mubr.msk.bf16.gmra.mrb[4].mxu1 %vm599_vm7, %v577_v46  ;;  %vm534_vm13 = vcmp.gt.f32.partialorder %v496_v52, 0.0  ;;  %v1091_v56 = vld [vmem:[%s1364_s8 + $0x10] sm:$0xff]  }
  0xff   : > { %vm537_vm14 = vcmp.gt.f32.partialorder %v507_v55, 0.0  ;;  %v553_v59 = vmul.f32 0.1, %v507_v55  ;;  %v568_v61 = vsel %vm536_vm12, %v504_v50, %v552_v54 }
 0x100   : > { %vm535_vm15 = vcmp.gt.f32.partialorder %v499_v58, 0.0  ;;  %v551_v60 = vmul.f32 0.1, %v499_v58  ;;  %v566_v63 = vsel %vm534_vm13, %v496_v52, %v550_v57 }
 0x101   : > { %v569_v62 = vsel %vm537_vm14, %v507_v55, %v553_v59 }
 0x102   : > { %v579_v0 = vpack.c.bf16 %v569_v62, %v568_v61  ;;  %v567_v1 = vsel %vm535_vm15, %v499_v58, %v551_v60  ;;  %v1127_v2 = vpop.f32.mrb[12].mxu0 }
 0x103   : > { %v578_v3 = vpack.c.bf16 %v567_v1, %v566_v63  ;;  %v520_v4 = vadd.f32 %v1127_v2, %v1333_v12  ;;  %v511_v5 = vpop.f32.mrb[13].mxu0  ;;  %v1084_v1 = vunpack.c.l.bf16 %v1091_v56 }
 0x104   : > { %v512_v6 = vadd.f32 %v1333_v12, %v511_v5  ;;  %v1128_v7 = vpop.f32.mrb[14].mxu0 }
 0x105   : > { %v556_v8 = vmul.f32 0.1, %v520_v4  ;;  %v523_v9 = vadd.f32 %v1128_v7, %v1333_v12  ;;  %v514_v10 = vpop.f32.mrb[15].mxu0  ;;  %1139 = vmatprep.mubr.msk.bf16.mxu1 %vm599_vm7, %v578_v3  ;;  %vm540_vm0 = vcmp.gt.f32.partialorder %v520_v4, 0.0 }
 0x106   : > { %v554_v11 = vmul.f32 0.1, %v512_v6  ;;  %v515_v13 = vadd.f32 %v1333_v12, %v514_v10  ;;  %1140 = vmatmul.mubr.msk.bf16.gmra.mrb[8].mxu1 %vm599_vm7, %v579_v0  ;;  %vm538_vm1 = vcmp.gt.f32.partialorder %v512_v6, 0.0  ;;  %v1075_v12 = vld [vmem:[%s1364_s8] sm:$0xff]  }
 0x107   : > { %vm541_vm2 = vcmp.gt.f32.partialorder %v523_v9, 0.0  ;;  %v557_v14 = vmul.f32 0.1, %v523_v9  ;;  %v572_v16 = vsel %vm540_vm0, %v520_v4, %v556_v8  ;;  %v1076_v22 = vunpack.c.l.bf16 %v1075_v12 }
 0x108   : > { %vm539_vm3 = vcmp.gt.f32.partialorder %v515_v13, 0.0  ;;  %v555_v15 = vmul.f32 0.1, %v515_v13  ;;  %v570_v18 = vsel %vm538_vm1, %v512_v6, %v554_v11  ;;  %v1077_v23 = vunpack.c.h.bf16 %v1075_v12 }
 0x109   : > { %v573_v17 = vsel %vm541_vm2, %v523_v9, %v557_v14  ;;  %v1085_v6 = vunpack.c.h.bf16 %v1091_v56 }
 0x10a   : > { %v581_v19 = vpack.c.bf16 %v573_v17, %v572_v16  ;;  %v571_v20 = vsel %vm539_vm3, %v515_v13, %v555_v15 }
 0x10b   : > { %v580_v21 = vpack.c.bf16 %v571_v20, %v570_v18  ;;  %v1092_v20 = vld [vmem:[%s1364_s8 + $0x18] sm:$0xff]  }
 0x10d   : > { %1143 = vmatprep.mubr.msk.bf16.mxu1 %vm599_vm7, %v580_v21 }
 0x10e   : > { %1144 = vmatmul.mubr.msk.bf16.gmra.mrb[12].mxu1 %vm599_vm7, %v581_v19 }
 0x1c9   : > { %v1133_v24 = vpop.f32.mrb[0].mxu1 }
 0x1ca   : > { %v671_v26 = vadd.f32 %v1133_v24, %v1076_v22  ;;  %v662_v27 = vpop.f32.mrb[1].mxu1 }
 0x1cb   : > { %v663_v28 = vadd.f32 %v1076_v22, %v662_v27  ;;  %v1134_v29 = vpop.f32.mrb[2].mxu1 }
 0x1cc   : > { %v734_v31 = vadd.f32 %v1370_v25, %v671_v26  ;;  %v674_v32 = vadd.f32 %v1134_v29, %v1077_v23  ;;  %v665_v33 = vpop.f32.mrb[3].mxu1  ;;  %v1088_v29 = vunpack.c.l.bf16 %v1092_v20 }
 0x1cd   : > { %v732_v34 = vadd.f32 %v1370_v25, %v663_v28  ;;  %v666_v35 = vadd.f32 %v1077_v23, %v665_v33 }
 0x1ce   : > { %vm750_vm4 = vcmp.gt.f32.partialorder %v734_v31, 0.0  ;;  %v766_v36 = vmul.f32 0.1, %v734_v31  ;;  %v735_v37 = vadd.f32 %v1370_v25, %v674_v32 }
 0x1cf   : > { %vm748_vm6 = vcmp.gt.f32.partialorder %v732_v34, 0.0  ;;  %v764_v39 = vmul.f32 0.1, %v732_v34  ;;  %v733_v40 = vadd.f32 %v1370_v25, %v666_v35 }
 0x1d0   : > { %v782_v41 = vsel %vm750_vm4, %v734_v31, %v766_v36  ;;  %vm751_vm7 = vcmp.gt.f32.partialorder %v735_v37, 0.0  ;;  %v767_v42 = vmul.f32 0.1, %v735_v37 }
 0x1d1   : > { %v1060_v44 = vpack.c.bf16 %v782_v41, %v782_v41  ;;  %v780_v45 = vsel %vm748_vm6, %v732_v34, %v764_v39  ;;  %vm749_vm8 = vcmp.gt.f32.partialorder %v733_v40, 0.0  ;;  %v765_v46 = vmul.f32 0.1, %v733_v40  ;;  %v1137_v47 = vpop.f32.mrb[4].mxu1 }
 0x1d2   : > { %v1058_v48 = vpack.c.bf16 %v780_v45, %v780_v45  ;;  %v783_v49 = vsel %vm751_vm7, %v735_v37, %v767_v42  ;;  %v687_v50 = vadd.f32 %v1137_v47, %v1080_v38  ;;  %v678_v51 = vpop.f32.mrb[5].mxu1  ;;  %v1089_v34 = vunpack.c.h.bf16 %v1092_v20 }
 0x1d3   : > { %863 = vst.msk [vmem:[%s1382_s13 + $0x8] sm:$0xf] %vm860_vm5, %v1060_v44  ;;  %v1061_v52 = vpack.c.bf16 %v783_v49, %v783_v49  ;;  %v781_v53 = vsel %vm749_vm8, %v733_v40, %v765_v46  ;;  %v679_v54 = vadd.f32 %v1080_v38, %v678_v51  ;;  %v1138_v55 = vpop.f32.mrb[6].mxu1 }
 0x1d4   : > { %861 = vst.msk [vmem:[%s1382_s13] sm:$0xf] %vm860_vm5, %v1058_v48  ;;  %v1059_v57 = vpack.c.bf16 %v781_v53, %v781_v53  ;;  %v738_v58 = vadd.f32 %v1370_v25, %v687_v50  ;;  %v690_v59 = vadd.f32 %v1138_v55, %v1081_v43  ;;  %v681_v60 = vpop.f32.mrb[7].mxu1 }
 0x1d5   : > { %864 = vst.msk [vmem:[%s1382_s13 + $0xc] sm:$0xf] %vm860_vm5, %v1061_v52  ;;  %v736_v61 = vadd.f32 %v1370_v25, %v679_v54  ;;  %v682_v62 = vadd.f32 %v1081_v43, %v681_v60 }
 0x1d6   : > { %862 = vst.msk [vmem:[%s1382_s13 + $0x4] sm:$0xf] %vm860_vm5, %v1059_v57  ;;  %vm754_vm9 = vcmp.gt.f32.partialorder %v738_v58, 0.0  ;;  %v770_v63 = vmul.f32 0.1, %v738_v58  ;;  %v739_v0 = vadd.f32 %v1370_v25, %v690_v59 }
 0x1d7   : > { %vm752_vm10 = vcmp.gt.f32.partialorder %v736_v61, 0.0  ;;  %v768_v2 = vmul.f32 0.1, %v736_v61  ;;  %v737_v3 = vadd.f32 %v1370_v25, %v682_v62 }
 0x1d8   : > { %v786_v4 = vsel %vm754_vm9, %v738_v58, %v770_v63  ;;  %vm755_vm11 = vcmp.gt.f32.partialorder %v739_v0, 0.0  ;;  %v771_v5 = vmul.f32 0.1, %v739_v0 }
 0x1d9   : > { %v1064_v7 = vpack.c.bf16 %v786_v4, %v786_v4  ;;  %v784_v8 = vsel %vm752_vm10, %v736_v61, %v768_v2  ;;  %vm753_vm12 = vcmp.gt.f32.partialorder %v737_v3, 0.0  ;;  %v769_v9 = vmul.f32 0.1, %v737_v3  ;;  %v1141_v10 = vpop.f32.mrb[8].mxu1 }
 0x1da   : > { %v1062_v11 = vpack.c.bf16 %v784_v8, %v784_v8  ;;  %v787_v13 = vsel %vm755_vm11, %v739_v0, %v771_v5  ;;  %v703_v14 = vadd.f32 %v1141_v10, %v1084_v1  ;;  %v694_v15 = vpop.f32.mrb[9].mxu1 }
 0x1db   : > { %867 = vst.msk [vmem:[%s1382_s13 + $0x18] sm:$0xf] %vm860_vm5, %v1064_v7  ;;  %v1065_v16 = vpack.c.bf16 %v787_v13, %v787_v13  ;;  %v785_v17 = vsel %vm753_vm12, %v737_v3, %v769_v9  ;;  %v695_v18 = vadd.f32 %v1084_v1, %v694_v15  ;;  %v1142_v19 = vpop.f32.mrb[10].mxu1 }
 0x1dc   : > { %865 = vst.msk [vmem:[%s1382_s13 + $0x10] sm:$0xf] %vm860_vm5, %v1062_v11  ;;  %v1063_v21 = vpack.c.bf16 %v785_v17, %v785_v17  ;;  %v742_v12 = vadd.f32 %v1370_v25, %v703_v14  ;;  %v706_v22 = vadd.f32 %v1142_v19, %v1085_v6  ;;  %v697_v23 = vpop.f32.mrb[11].mxu1 }
 0x1dd   : > { %868 = vst.msk [vmem:[%s1382_s13 + $0x1c] sm:$0xf] %vm860_vm5, %v1065_v16  ;;  %v740_v24 = vadd.f32 %v1370_v25, %v695_v18  ;;  %v698_v26 = vadd.f32 %v1085_v6, %v697_v23 }
 0x1de   : > { %866 = vst.msk [vmem:[%s1382_s13 + $0x14] sm:$0xf] %vm860_vm5, %v1063_v21  ;;  %vm758_vm13 = vcmp.gt.f32.partialorder %v742_v12, 0.0  ;;  %v774_v27 = vmul.f32 0.1, %v742_v12  ;;  %v743_v28 = vadd.f32 %v1370_v25, %v706_v22 }
 0x1df   : > { %vm756_vm14 = vcmp.gt.f32.partialorder %v740_v24, 0.0  ;;  %v772_v30 = vmul.f32 0.1, %v740_v24  ;;  %v741_v31 = vadd.f32 %v1370_v25, %v698_v26 }
 0x1e0   : > { %v790_v32 = vsel %vm758_vm13, %v742_v12, %v774_v27  ;;  %vm759_vm15 = vcmp.gt.f32.partialorder %v743_v28, 0.0  ;;  %v775_v33 = vmul.f32 0.1, %v743_v28 }
 0x1e1   : > { %v1068_v35 = vpack.c.bf16 %v790_v32, %v790_v32  ;;  %v788_v36 = vsel %vm756_vm14, %v740_v24, %v772_v30  ;;  %vm757_vm0 = vcmp.gt.f32.partialorder %v741_v31, 0.0  ;;  %v773_v37 = vmul.f32 0.1, %v741_v31  ;;  %v1145_v38 = vpop.f32.mrb[12].mxu1 }
 0x1e2   : > { %v1066_v39 = vpack.c.bf16 %v788_v36, %v788_v36  ;;  %v791_v40 = vsel %vm759_vm15, %v743_v28, %v775_v33  ;;  %v719_v41 = vadd.f32 %v1145_v38, %v1088_v29  ;;  %v710_v42 = vpop.f32.mrb[13].mxu1 }
 0x1e3   : > { %871 = vst.msk [vmem:[%s1382_s13 + $0x28] sm:$0xf] %vm860_vm5, %v1068_v35  ;;  %v1069_v43 = vpack.c.bf16 %v791_v40, %v791_v40  ;;  %v789_v44 = vsel %vm757_vm0, %v741_v31, %v773_v37  ;;  %v711_v45 = vadd.f32 %v1088_v29, %v710_v42  ;;  %v1146_v46 = vpop.f32.mrb[14].mxu1 }
 0x1e4   : > { %869 = vst.msk [vmem:[%s1382_s13 + $0x20] sm:$0xf] %vm860_vm5, %v1066_v39  ;;  %v1067_v47 = vpack.c.bf16 %v789_v44, %v789_v44  ;;  %v746_v48 = vadd.f32 %v1370_v25, %v719_v41  ;;  %v722_v49 = vadd.f32 %v1146_v46, %v1089_v34  ;;  %v713_v50 = vpop.f32.mrb[15].mxu1 }
 0x1e5   : > { %872 = vst.msk [vmem:[%s1382_s13 + $0x2c] sm:$0xf] %vm860_vm5, %v1069_v43  ;;  %v744_v51 = vadd.f32 %v1370_v25, %v711_v45  ;;  %v714_v52 = vadd.f32 %v1089_v34, %v713_v50 }
 0x1e6   : > { %870 = vst.msk [vmem:[%s1382_s13 + $0x24] sm:$0xf] %vm860_vm5, %v1067_v47  ;;  %vm762_vm1 = vcmp.gt.f32.partialorder %v746_v48, 0.0  ;;  %v778_v53 = vmul.f32 0.1, %v746_v48  ;;  %v747_v54 = vadd.f32 %v1370_v25, %v722_v49 }
 0x1e7   : > { %vm760_vm2 = vcmp.gt.f32.partialorder %v744_v51, 0.0  ;;  %v776_v55 = vmul.f32 0.1, %v744_v51  ;;  %v745_v56 = vadd.f32 %v1370_v25, %v714_v52 }
 0x1e8   : > { %v794_v57 = vsel %vm762_vm1, %v746_v48, %v778_v53  ;;  %vm763_vm3 = vcmp.gt.f32.partialorder %v747_v54, 0.0  ;;  %v779_v58 = vmul.f32 0.1, %v747_v54 }
 0x1e9   : > { %v1072_v59 = vpack.c.bf16 %v794_v57, %v794_v57  ;;  %v792_v60 = vsel %vm760_vm2, %v744_v51, %v776_v55  ;;  %vm761_vm4 = vcmp.gt.f32.partialorder %v745_v56, 0.0  ;;  %v777_v61 = vmul.f32 0.1, %v745_v56 }
 0x1ea   : > { %v1070_v62 = vpack.c.bf16 %v792_v60, %v792_v60  ;;  %v795_v63 = vsel %vm763_vm3, %v747_v54, %v779_v58 }
 0x1eb   : > { %875 = vst.msk [vmem:[%s1382_s13 + $0x38] sm:$0xf] %vm860_vm5, %v1072_v59  ;;  %v1073_v0 = vpack.c.bf16 %v795_v63, %v795_v63  ;;  %v793_v1 = vsel %vm761_vm4, %v745_v56, %v777_v61 }
 0x1ec   : > { %873 = vst.msk [vmem:[%s1382_s13 + $0x30] sm:$0xf] %vm860_vm5, %v1070_v62  ;;  %v1071_v2 = vpack.c.bf16 %v793_v1, %v793_v1 }
 0x1ed   : > { %876 = vst.msk [vmem:[%s1382_s13 + $0x3c] sm:$0xf] %vm860_vm5, %v1073_v0 }
 0x1ee   : > { %874 = vst.msk [vmem:[%s1382_s13 + $0x34] sm:$0xf] %vm860_vm5, %v1071_v2 }
 0x1ef PF: > { %s16_s25 = sadd.s32 1, %s1235_s25   ;;  %s1452_s21 = smov %s1227_s23 }
 0x1f0   : > { %p13_p8 = scmp.ge.s32.totalorder %s16_s25, 6   ;;  %s1453_s22 = smov %s1231_s24 }
 0x1f1   : > { %s1454_s23 = smov %s1457_s26  ;;  %s1455_s24 = smov %s1461_s27 }
 0x1f2   :  { %15 = sbr.rel (!%p13_p8) target bundleno = 3 (0x3), region = 77 }

// kernel: upsample_block_forward.7
= control target key start
LH: loop header
LB: loop body
LE: loop exit
PB: predicated region body
PF: predicated region fallthrough
CT: control target
= control target key end

     0   :  { %s4067_s18 = smov 0   ;;  %s5271_s0 = inlined_call_operand.vmem [shape: bf16[2,18,32,4], index: 0, kind: input, shape index: {}]   ;;  %s5272_s1 = inlined_call_operand.vmem [shape: bf16[3,3,4,8], index: 1, kind: input, shape index: {}]   ;;  %s5273_s2 = inlined_call_operand.vmem [shape: f32[1,1,8], index: 2, kind: input, shape index: {}]   ;;  %s5274_s3 = inlined_call_operand.vmem [shape: bf16[8,4], index: 3, kind: input, shape index: {}]   ;;  %s5275_s4 = inlined_call_operand.vmem [shape: f32[1,1,4], index: 4, kind: input, shape index: {}]   ;;  %s5276_s5 = inlined_call_operand.vmem [shape: f32[2,16,16,4], index: 5, kind: output, shape index: {}]  }
   0x1 LB: > { %s3009_s19 = sadd.s32 4294967295, %s4035_s18   ;;  %p3013_p0 = scmp.ge.s32.totalorder %s4035_s18, 1  ;;  %s4035_s18 = sphi %s4067_s18, %s15_s18  }
   0x2   : > { %p187_p1 = scmp.lt.s32.totalorder %s4035_s18, 3 }
   0x4   : > { %p188_p2 = pnand %p3013_p0, %p187_p1 }
   0x6   : > { %191 = sbr.rel (%p188_p2) target bundleno = 787 (0x313), region = 40 }
   0xd   : > { %v3035_v0 = vld [vmem:[%s5272_s1 + $0x6] sm:$0x3]  ;;  %vm404_vm0 = vcmask 1041408   ;;  %p215_p3 = scmp.lt.s32.totalorder %s3009_s19, 1  ;;  %v991_v1 = vlaneseq  ;;  %v3102_v3 = vld [vmem:[%s5272_s1 + $0x8] sm:$0x3] }
   0xe   : > { %3974 = vmatprep.subr.msk.bf16.mxu1 %vm404_vm0, %v3035_v0  ;;  %v406_v2 = vsel %vm404_vm0, %v3035_v0, 0  ;;  %v3119_v4 = vld [vmem:[%s5272_s1 + $0xe] sm:$0x3]  ;;  %3978 = vmatprep.subr.msk.bf16.mxu0 %vm404_vm0, %v3102_v3  ;;  %v1300_v5 = vsel %vm404_vm0, %v3102_v3, 0  ;;  %v352_v6 = vld [vmem:[%s5272_s1] sm:$0x3] }
   0xf   : > { %3379 = vmatpush3.bf16.msra.mxu1 %v406_v2  ;;  %s5427_s19 = smov (!%p215_p3, %s3009_s19), 1  ;;  %v4093_v7 = vshrl.u32 %v991_v1, 7  ;;  %3515 = vmatpush3.bf16.msra.mxu0 %v1300_v5  ;;  %vm355_vm1 = vcmask 31744   ;;  %v573_v8 = vsel %vm404_vm0, %v352_v6, 0  ;;  %v4124_v18 = vld [vmem:[%s5272_s1 + $0xc] sm:$0x3] }
  0x10   : > { %3975 = vmatprep.subr.msk.bf16.mxu1 %vm404_vm0, %v352_v6  ;;  %s3984_s28 = smul.u32 288, %s5427_s19  ;;  %3979 = vmatprep.subr.msk.bf16.mxu0 %vm404_vm0, %v3119_v4  ;;  %v1501_v44 = vsel %vm404_vm0, %v3119_v4, 0  ;;  %v4186_v49 = vld [vmem:[%s5272_s1 + $0x4] sm:$0x3]  ;;  %vm2661_vm4 = vcmask 1043456   ;;  %vm2612_vm9 = vcmask 64512  }
  0x11   : > { %vm1750_vm2 = vcmp.lt.s32.totalorder %v4093_v7, 6  ;;  %vm993_vm3 = vcmp.lt.s32.totalorder %v4093_v7, 7  ;;  %5349 = vst [vmem:[#allocation8_spill] sm:$0xff] %v4186_v49  ;;  %s3207_s25 = sshll.u32 %s5427_s19, 8 }
  0x12   : > { %s4101_s6 = scalar_lea.vmem %s5271_s0, %s3984_s28  ;;  %s5172_s28 = scalar_lea.vmem %s5276_s5, %s3207_s25 }
  0x13   : > { %v4105_v9 = vld [vmem:[%s4101_s6 + $0x10] sm:$0xff]   ;;  %v4109_v10 = vld [vmem:[%s4101_s6 + $0x20] sm:$0xff]   ;;  %v4112_v11 = vld [vmem:[%s4101_s6 + $0x18] ss:$16 sps:$4 sm:$0xff]  }
  0x14   : > { %5343 = vst [vmem:[#allocation2_spill] sm:$0xff] %v4109_v10  ;;  %v283_v12 = vunpack.c.l.bf16 %v4105_v9  ;;  %v284_v13 = vunpack.c.h.bf16 %v4105_v9  ;;  %v286_v14 = vunpack.c.l.bf16 %v4109_v10  ;;  %v287_v15 = vunpack.c.h.bf16 %v4109_v10  ;;  %3380 = vmatprep.mubr.msk.bf16.mxu1 %vm355_vm1, %v4105_v9  ;;  %v4129_v23 = vld [vmem:[%s4101_s6 + $0x30] sm:$0xff]   ;;  %v4138_v26 = vld [vmem:[%s4101_s6 + $0x40] sm:$0xff]   ;;  %v4164_v41 = vld [vmem:[%s4101_s6 + $0x38] ss:$16 sps:$4 sm:$0xff]  }
  0x15   : > { %v285_v16 = vunpack.c.l.bf16 %v4112_v11  ;;  %v5284_v17 = vunpack.c.h.bf16 %v4112_v11  ;;  %5344 = vst [vmem:[#allocation3_spill] sm:$0xff] %v4129_v23  ;;  %3381 = vmatmul.mubr.msk.bf16.vlgmr.msra.gmra.mrb[0].mxu1 %vm355_vm1, %v4109_v10  ;;  %5345 = vst [vmem:[#allocation4_spill] sm:$0xff] %v4138_v26  ;;  %v289_v33 = vunpack.c.l.bf16 %v4129_v23  ;;  %v290_v34 = vunpack.c.h.bf16 %v4129_v23  ;;  %v4167_v42 = vld [vmem:[%s4101_s6 + $0x50] sm:$0xff]   ;;  %v4194_v53 = vld [vmem:[%s4101_s6 + $0x60] sm:$0xff]  }
  0x16   : > { %v938_v19 = vrot.slane %v283_v12, 1  ;;  %v956_v20 = vrot.slane %v284_v13, 1  ;;  %v1697_v21 = vrot.slane %v283_v12, 2  ;;  %v1715_v22 = vrot.slane %v284_v13, 2  ;;  %3413 = vmatpush3.bf16.msra.mxu1 %v573_v8  ;;  %5348 = vst [vmem:[#allocation7_spill] sm:$0xff] %v4167_v42  ;;  %3384 = vmatprep.mubr.msk.bf16.mxu1 %vm355_vm1, %v4129_v23  ;;  %5350 = vst [vmem:[#allocation9_spill] sm:$0xff] %v4194_v53 }
  0x17   : > { %v939_v24 = vrot.slane %v286_v14, 1  ;;  %v957_v25 = vrot.slane %v287_v15, 1  ;;  %v974_v28 = vrot.slane %v285_v16, 1  ;;  %v1733_v30 = vrot.slane %v285_v16, 2  ;;  %3976 = vmatprep.subr.msk.bf16.mxu1 %vm404_vm0, %v4124_v18  ;;  %v4217_v62 = vld [vmem:[%s4101_s6 + $0x58] ss:$16 sps:$4 sm:$0xff]  }
  0x18   : > { %v1770_v27 = vsel %vm1750_vm2, %v1697_v21, %v1715_v22  ;;  %v1013_v29 = vsel %vm993_vm3, %v938_v19, %v956_v20  ;;  %v975_v31 = vrot.slane %v5284_v17, 1  ;;  %v292_v37 = vunpack.c.l.bf16 %v4138_v26  ;;  %v4227_v3 = vld [vmem:[%s4101_s6 + $0x70] sm:$0xff]   ;;  %v4236_v8 = vld [vmem:[%s4101_s6 + $0x80] sm:$0xff]   ;;  %v4533_v10 = vld [vmem:[%s4101_s6 + $0x8] ss:$272 sps:$4 sm:$0xff]  }
  0x19   : > { %v1014_v32 = vsel %vm993_vm3, %v939_v24, %v957_v25  ;;  %v995_v35 = vsel %vm993_vm3, %v956_v20, %v974_v28  ;;  %v1752_v36 = vsel %vm1750_vm2, %v1715_v22, %v1733_v30  ;;  %v940_v45 = vrot.slane %v289_v33, 1  ;;  %5351 = vst [vmem:[#allocation10_spill] sm:$0xff] %v4227_v3  ;;  %5354 = vst [vmem:[#allocation13_spill] sm:$0xff] %v4236_v8 }
  0x1a   : > { %v4157_v38 = vpack.c.bf16 %v995_v35, %v1013_v29  ;;  %v4159_v39 = vpack.c.bf16 %v1752_v36, %v1770_v27  ;;  %v996_v40 = vsel %vm993_vm3, %v957_v25, %v975_v31  ;;  %v958_v46 = vrot.slane %v290_v34, 1  ;;  %v4259_v29 = vld [vmem:[%s4101_s6 + $0x78] ss:$16 sps:$4 sm:$0xff]   ;;  %5373 = vst [vmem:[#allocation27_spill] sm:$0xff] %v4533_v10 }
  0x1b   : > { %v4169_v43 = vpack.c.bf16 %v996_v40, %v1014_v32  ;;  %v293_v47 = vunpack.c.h.bf16 %v4138_v26  ;;  %v941_v48 = vrot.slane %v292_v37, 1  ;;  %v5283_v50 = vunpack.c.l.bf16 %v4164_v41  ;;  %v4278_v40 = vld [vmem:[%s4101_s6 + $0x90] sm:$0xff]  }
  0x1c   : > { %5346 = vst [vmem:[#allocation5_spill] sm:$0xff] %v4157_v38  ;;  %5347 = vst [vmem:[#allocation6_spill] sm:$0xff] %v4159_v39  ;;  %3516 = vmatprep.mubr.msk.bf16.mxu0 %vm355_vm1, %v4157_v38  ;;  %v5282_v51 = vunpack.c.h.bf16 %v4164_v41  ;;  %v295_v52 = vunpack.c.l.bf16 %v4167_v42  ;;  %v296_v55 = vunpack.c.h.bf16 %v4167_v42  ;;  %v1015_v57 = vsel %vm993_vm3, %v940_v45, %v958_v46 }
  0x1d   : > { %3517 = vmatmul.mubr.msk.bf16.vlgmr.msra.gmra.mrb[0].mxu0 %vm355_vm1, %v4169_v43  ;;  %3385 = vmatmul.mubr.msk.bf16.gmra.mrb[4].mxu1 %vm355_vm1, %v4138_v26  ;;  %v959_v54 = vrot.slane %v293_v47, 1  ;;  %v976_v56 = vrot.slane %v5283_v50, 1  ;;  %v298_v61 = vunpack.c.l.bf16 %v4194_v53  ;;  %v299_v2 = vunpack.c.h.bf16 %v4194_v53  ;;  %5356 = vst [vmem:[#allocation15_spill] sm:$0xff] %v4278_v40  ;;  %v4392_v50 = vld [vmem:[%s4101_s6 + $0xd0] sm:$0xff]  }
  0x1e   : > { %3549 = vmatpush3.bf16.msra.mxu0 %v1501_v44  ;;  %v977_v58 = vrot.slane %v5282_v51, 1  ;;  %3388 = vmatprep.mubr.msk.bf16.mxu1 %vm355_vm1, %v4167_v42  ;;  %v942_v60 = vrot.slane %v295_v52, 1  ;;  %v960_v1 = vrot.slane %v296_v55, 1  ;;  %v5280_v13 = vunpack.c.l.bf16 %v4217_v62  ;;  %5364 = vst [vmem:[#allocation23_spill] sm:$0xff] %v4392_v50 }
  0x1f   : > { %3980 = vmatprep.subr.msk.bf16.mxu0 %vm404_vm0, %v4186_v49  ;;  %v1016_v59 = vsel %vm993_vm3, %v941_v48, %v959_v54  ;;  %v997_v63 = vsel %vm993_vm3, %v958_v46, %v976_v56  ;;  %v943_v6 = vrot.slane %v298_v61, 1  ;;  %v961_v12 = vrot.slane %v299_v2, 1  ;;  %v4298_v56 = vld [vmem:[%s4101_s6 + $0xa0] sm:$0xff]  }
  0x20   : > { %v998_v0 = vsel %vm993_vm3, %v959_v54, %v977_v58  ;;  %v4229_v4 = vpack.c.bf16 %v997_v63, %v1015_v57  ;;  %v5279_v16 = vunpack.c.h.bf16 %v4217_v62  ;;  %v301_v19 = vunpack.c.l.bf16 %v4227_v3  ;;  %5359 = vst [vmem:[#allocation18_spill] sm:$0xff] %v4298_v56 }
  0x21   : > { %v4231_v5 = vpack.c.bf16 %v998_v0, %v1016_v59  ;;  %v302_v20 = vunpack.c.h.bf16 %v4227_v3  ;;  %v978_v21 = vrot.slane %v5280_v13, 1  ;;  %v1017_v22 = vsel %vm993_vm3, %v942_v60, %v960_v1 }
  0x22   : > { %5352 = vst [vmem:[#allocation11_spill] sm:$0xff] %v4229_v4  ;;  %3520 = vmatprep.mubr.msk.bf16.mxu0 %vm355_vm1, %v4229_v4  ;;  %v304_v24 = vunpack.c.l.bf16 %v4236_v8  ;;  %v979_v25 = vrot.slane %v5279_v16, 1  ;;  %v1018_v27 = vsel %vm993_vm3, %v943_v6, %v961_v12  ;;  %v5285_v28 = vunpack.c.h.bf16 %v4236_v8  ;;  %v4503_v4 = vld [vmem:[%s4101_s6] sm:$0xff]  }
  0x23   : > { %5353 = vst [vmem:[#allocation12_spill] sm:$0xff] %v4231_v5  ;;  %v4263_v30 = vsel %vm404_vm0, %v4124_v18, 0  ;;  %v4267_v31 = vrot.slane %v286_v14, 2  ;;  %v999_v32 = vsel %vm993_vm3, %v960_v1, %v978_v21  ;;  %v944_v35 = vrot.slane %v301_v19, 1 }
  0x24   : > { %5355 = vst [vmem:[#allocation14_spill] sm:$0xff] %v4263_v30  ;;  %v962_v36 = vrot.slane %v302_v20, 1  ;;  %v4282_v18 = vrot.slane %v287_v15, 2  ;;  %v4286_v14 = vrot.slane %v289_v33, 2  ;;  %v4288_v44 = vpack.c.bf16 %v999_v32, %v1017_v22 }
  0x25   : > { %3521 = vmatmul.mubr.msk.bf16.gmra.mrb[4].mxu0 %vm355_vm1, %v4231_v5  ;;  %3389 = vmatmul.mubr.msk.bf16.gmra.mrb[8].mxu1 %vm355_vm1, %v4194_v53  ;;  %v1000_v45 = vsel %vm993_vm3, %v961_v12, %v979_v25  ;;  %v945_v48 = vrot.slane %v304_v24, 1  ;;  %v5278_v54 = vunpack.c.l.bf16 %v4259_v29  ;;  %v963_v15 = vrot.slane %v5285_v28, 1  ;;  %v4327_v12 = vld [vmem:[%s4101_s6 + $0x98] ss:$16 sps:$4 sm:$0xff]  }
  0x26   : > { %3392 = vmatprep.mubr.msk.bf16.mxu1 %vm355_vm1, %v4227_v3  ;;  %5357 = vst [vmem:[#allocation16_spill] sm:$0xff] %v4288_v44  ;;  %v4292_v46 = vpack.c.bf16 %v1000_v45, %v1018_v27  ;;  %3524 = vmatprep.mubr.msk.bf16.mxu0 %vm355_vm1, %v4288_v44  ;;  %v5277_v33 = vunpack.c.h.bf16 %v4259_v29  ;;  %v307_v57 = vunpack.c.l.bf16 %v4278_v40  ;;  %v308_v58 = vunpack.c.h.bf16 %v4278_v40  ;;  %v4335_v27 = vld [vmem:[%s4101_s6 + $0xb0] sm:$0xff]  }
  0x27   : > { %v4309_v59 = vrot.slane %v290_v34, 2  ;;  %v980_v60 = vrot.slane %v5278_v54, 1  ;;  %v1019_v63 = vsel %vm993_vm3, %v944_v35, %v962_v36  ;;  %v4317_v0 = vrot.slane %v292_v37, 2  ;;  %5360 = vst [vmem:[#allocation19_spill] sm:$0xff] %v4335_v27  ;;  %v4374_v54 = vld [vmem:[%s4101_s6 + $0xc0] sm:$0xff]  }
  0x28   : > { %5358 = vst [vmem:[#allocation17_spill] sm:$0xff] %v4292_v46  ;;  %v4321_v1 = vrot.slane %v293_v47, 2  ;;  %v981_v6 = vrot.slane %v5277_v33, 1  ;;  %v310_v34 = vunpack.c.l.bf16 %v4298_v56  ;;  %v946_v22 = vrot.slane %v307_v57, 1  ;;  %5363 = vst [vmem:[#allocation22_spill] sm:$0xff] %v4374_v54 }
  0x29   : > { %v1001_v21 = vsel %vm993_vm3, %v962_v36, %v980_v60  ;;  %v964_v37 = vrot.slane %v308_v58, 1  ;;  %v311_v25 = vunpack.c.h.bf16 %v4298_v56  ;;  %v4339_v47 = vrot.slane %v295_v52, 2 }
  0x2a   : > { %v4343_v32 = vpack.c.bf16 %v1001_v21, %v1019_v63  ;;  %v1002_v35 = vsel %vm993_vm3, %v963_v15, %v981_v6  ;;  %v1020_v36 = vsel %vm993_vm3, %v945_v48, %v963_v15  ;;  %v4351_v45 = vrot.slane %v296_v55, 2 }
  0x2b   : > { %v4355_v52 = vrot.slane %v298_v61, 2  ;;  %v4357_v60 = vrot.slane %v299_v2, 2  ;;  %v5281_v63 = vunpack.c.l.bf16 %v4327_v12  ;;  %v947_v48 = vrot.slane %v310_v34, 1 }
  0x2c   : > { %5361 = vst [vmem:[#allocation20_spill] sm:$0xff] %v4343_v32  ;;  %v5286_v55 = vunpack.c.h.bf16 %v4327_v12  ;;  %v313_v15 = vunpack.c.l.bf16 %v4335_v27  ;;  %v314_v61 = vunpack.c.h.bf16 %v4335_v27  ;;  %v4367_v6 = vpack.c.bf16 %v1002_v35, %v1020_v36  ;;  %v4387_v36 = vld [vmem:[%s4101_s6 + $0xb8] ss:$16 sps:$4 sm:$0xff]  }
  0x2d   : > { %3525 = vmatmul.mubr.msk.bf16.gmra.mrb[8].mxu0 %vm355_vm1, %v4292_v46  ;;  %3393 = vmatmul.mubr.msk.bf16.gmra.mrb[12].mxu1 %vm355_vm1, %v4236_v8  ;;  %v965_v2 = vrot.slane %v311_v25, 1  ;;  %v982_v21 = vrot.slane %v5281_v63, 1  ;;  %v1021_v33 = vsel %vm993_vm3, %v946_v22, %v964_v37  ;;  %v4378_v16 = vrot.slane %v301_v19, 2  ;;  %v4451_v46 = vld [vmem:[%s4101_s6 + $0xf0] sm:$0xff]  }
  0x2e   : > { %3396 = vmatprep.mubr.msk.bf16.mxu1 %vm355_vm1, %v4278_v40  ;;  %3528 = vmatprep.mubr.msk.bf16.mxu0 %vm355_vm1, %v4343_v32  ;;  %5362 = vst [vmem:[#allocation21_spill] sm:$0xff] %v4367_v6  ;;  %v4382_v13 = vrot.slane %v302_v20, 2  ;;  %v983_v35 = vrot.slane %v5286_v55, 1  ;;  %v948_v22 = vrot.slane %v313_v15, 1  ;;  %v966_v51 = vrot.slane %v314_v61, 1 }
  0x2f   : > { %v1003_v63 = vsel %vm993_vm3, %v964_v37, %v982_v21  ;;  %v4396_v19 = vrot.slane %v304_v24, 2  ;;  %v316_v20 = vunpack.c.l.bf16 %v4374_v54  ;;  %v317_v28 = vunpack.c.h.bf16 %v4374_v54 }
  0x30   : > { %v4398_v17 = vpack.c.bf16 %v1003_v63, %v1021_v33  ;;  %v5366_v55 = vunpack.c.h.bf16 %v4236_v8  ;;  %v4408_v37 = vrot.slane %v307_v57, 2  ;;  %v1022_v21 = vsel %vm993_vm3, %v947_v48, %v965_v2  ;;  %v4414_v33 = vld [vmem:[%s4101_s6 + $0xe0] sm:$0xff]  }
  0x31   : > { %v1004_v63 = vsel %vm993_vm3, %v965_v2, %v983_v35  ;;  %v320_v48 = vunpack.c.h.bf16 %v4392_v50  ;;  %v4425_v39 = vrot.slane %v308_v58, 2  ;;  %v4427_v24 = vrot.slane %v310_v34, 2  ;;  %v4438_v58 = vld [vmem:[%s4101_s6 + $0xd8] ss:$16 sps:$4 sm:$0xff]  }
  0x32   : > { %5365 = vst [vmem:[#allocation24_spill] sm:$0xff] %v4398_v17  ;;  %v4404_v38 = vrot.slane %v5366_v55, 2  ;;  %v319_v55 = vunpack.c.l.bf16 %v4392_v50  ;;  %v1023_v2 = vsel %vm993_vm3, %v948_v22, %v966_v51  ;;  %v949_v35 = vrot.slane %v316_v20, 1 }
  0x33   : > { %v967_v57 = vrot.slane %v317_v28, 1  ;;  %v323_v8 = vunpack.c.h.bf16 %v4414_v33  ;;  %v4440_v34 = vrot.slane %v311_v25, 2  ;;  %v968_v53 = vrot.slane %v320_v48, 1 }
  0x34   : > { %v950_v32 = vrot.slane %v319_v55, 1  ;;  %v4453_v42 = vrot.slane %v313_v15, 2  ;;  %v4455_v44 = vrot.slane %v314_v61, 2  ;;  %v5315_v25 = vunpack.c.l.bf16 %v4438_v58 }
  0x35   : > { %3529 = vmatmul.mubr.msk.bf16.gmra.mrb[12].mxu0 %vm355_vm1, %v4367_v6  ;;  %3397 = vmatmul.mubr.msk.bf16.gmra.mrb[16].mxu1 %vm355_vm1, %v4298_v56  ;;  %v5367_v56 = vunpack.c.l.bf16 %v4387_v36  ;;  %v4442_v6 = vpack.c.bf16 %v1004_v63, %v1022_v21  ;;  %v1024_v21 = vsel %vm993_vm3, %v949_v35, %v967_v57  ;;  %v326_v35 = vunpack.c.h.bf16 %v4451_v46 }
  0x36   : > { %3532 = vmatprep.mubr.msk.bf16.mxu0 %vm355_vm1, %v4398_v17  ;;  %3400 = vmatprep.mubr.msk.bf16.mxu1 %vm355_vm1, %v4335_v27  ;;  %v322_v17 = vunpack.c.l.bf16 %v4414_v33  ;;  %v986_v61 = vrot.slane %v5315_v25, 1  ;;  %v4476_v63 = vrot.slane %v317_v28, 2  ;;  %v5371_v28 = vunpack.c.h.bf16 %v4438_v58 }
  0x37   : > { %v984_v40 = vrot.slane %v5367_v56, 1  ;;  %5368 = vst [vmem:[#allocation25_spill] sm:$0xff] %v4442_v6  ;;  %v5369_v56 = vunpack.c.h.bf16 %v4387_v36  ;;  %v4497_v26 = vrot.slane %v320_v48, 2  ;;  %v970_v23 = vrot.slane %v326_v35, 1 }
  0x38   : > { %v987_v25 = vrot.slane %v5371_v28, 1  ;;  %v280_v28 = vunpack.c.l.bf16 %v4503_v4  ;;  %v4520_v49 = vrot.slane %v323_v8, 2 }
  0x39   : > { %v1005_v27 = vsel %vm993_vm3, %v966_v51, %v984_v40  ;;  %v985_v3 = vrot.slane %v5369_v56, 1  ;;  %v951_v51 = vrot.slane %v322_v17, 1  ;;  %v969_v40 = vrot.slane %v323_v8, 1 }
  0x3a   : > { %v4448_v22 = vpack.c.bf16 %v1005_v27, %v1023_v2  ;;  %v4462_v27 = vld [vmem:[%s4101_s6 + $0x100] sm:$0xff]   ;;  %v325_v2 = vunpack.c.l.bf16 %v4451_v46  ;;  %v4474_v56 = vrot.slane %v316_v20, 2  ;;  %v1007_v20 = vsel %vm993_vm3, %v968_v53, %v986_v61 }
  0x3b   : > { %v1006_v15 = vsel %vm993_vm3, %v967_v57, %v985_v3  ;;  %v1025_v3 = vsel %vm993_vm3, %v950_v32, %v968_v53  ;;  %v4485_v57 = vld [vmem:[%s4101_s6 + $0xf8] ss:$16 sps:$4 sm:$0xff]   ;;  %v1026_v32 = vsel %vm993_vm3, %v951_v51, %v969_v40  ;;  %v1008_v48 = vsel %vm993_vm3, %v969_v40, %v987_v25 }
  0x3c   : > { %5370 = vst [vmem:[#allocation26_spill] sm:$0xff] %v4448_v22  ;;  %v952_v5 = vrot.slane %v325_v2, 1  ;;  %v4505_v53 = vpack.c.bf16 %v1007_v20, %v1025_v3  ;;  %v5335_v61 = vunpack.c.h.bf16 %v4485_v57  ;;  %v4518_v20 = vrot.slane %v322_v17, 2 }
  0x3d   : > { %3533 = vmatmul.mubr.msk.bf16.gmra.mrb[16].mxu0 %vm355_vm1, %v4442_v6  ;;  %3401 = vmatmul.mubr.msk.bf16.gmra.mrb[20].mxu1 %vm355_vm1, %v4374_v54  ;;  %v4480_v6 = vrot.slane %v319_v55, 2  ;;  %v5332_v54 = vunpack.c.l.bf16 %v4462_v27  ;;  %v4495_v55 = vpack.c.bf16 %v1006_v15, %v1024_v21  ;;  %v1696_v21 = vrot.slane %v280_v28, 2 }
  0x3e   : > { %3536 = vmatprep.mubr.msk.bf16.mxu0 %vm355_vm1, %v4448_v22  ;;  %3404 = vmatprep.mubr.msk.bf16.mxu1 %vm355_vm1, %v4392_v50  ;;  %v5331_v22 = vunpack.c.h.bf16 %v4462_v27  ;;  %v5336_v50 = vunpack.c.l.bf16 %v4485_v57  ;;  %v989_v30 = vrot.slane %v5335_v61, 1  ;;  %v4526_v25 = vrot.slane %v325_v2, 2 }
  0x3f   : > { %v953_v51 = vrot.slane %v5332_v54, 1  ;;  %v4528_v40 = vrot.slane %v326_v35, 2  ;;  %v4539_v17 = vpack.c.bf16 %v1008_v48, %v1026_v32  ;;  %v1027_v2 = vsel %vm993_vm3, %v952_v5, %v970_v23 }
  0x40   : > { %v971_v15 = vrot.slane %v5331_v22, 1  ;;  %v988_v3 = vrot.slane %v5336_v50, 1  ;;  %v5372_v22 = vunpack.c.h.bf16 %v4503_v4  ;;  %v5337_v35 = vunpack.c.l.bf16 %v4533_v10 }
  0x41   : > { %v4552_v50 = vrot.slane %v280_v28, 1  ;;  %v5376_v28 = vunpack.c.l.bf16 %v4164_v41 }
  0x42   : > { %v1714_v54 = vrot.slane %v5372_v22, 2  ;;  %v1009_v8 = vsel %vm993_vm3, %v970_v23, %v988_v3  ;;  %v1010_v22 = vsel %vm993_vm3, %v971_v15, %v989_v30  ;;  %v1028_v61 = vsel %vm993_vm3, %v953_v51, %v971_v15 }
  0x43   : > { %v1732_v32 = vrot.slane %v5337_v35, 2  ;;  %v5374_v23 = vunpack.c.h.bf16 %v4112_v11  ;;  %v1771_v30 = vsel %vm1750_vm2, %v4267_v31, %v4282_v18  ;;  %v4566_v3 = vpack.c.bf16 %v1009_v8, %v1027_v2 }
  0x44   : > { %v4558_v48 = vsel %vm1750_vm2, %v1696_v21, %v1714_v54  ;;  %v1735_v51 = vrot.slane %v5376_v28, 2  ;;  %v1772_v15 = vsel %vm1750_vm2, %v4286_v14, %v4309_v59  ;;  %v5377_v21 = vunpack.c.h.bf16 %v4164_v41 }
  0x45   : > { %3537 = vmatmul.mubr.msk.bf16.gmra.mrb[20].mxu0 %vm355_vm1, %v4495_v55  ;;  %3405 = vmatmul.mubr.msk.bf16.gmra.mrb[24].mxu1 %vm355_vm1, %v4414_v33  ;;  %v1734_v5 = vrot.slane %v5374_v23, 2  ;;  %5375 = vst [vmem:[#allocation28_spill] sm:$0xff] %v4566_v3  ;;  %v4576_v11 = vpack.c.bf16 %v1010_v22, %v1028_v61  ;;  %v4580_v23 = vsel %vm1750_vm2, %v1714_v54, %v1732_v32  ;;  %v5378_v22 = vunpack.c.l.bf16 %v4217_v62 }
  0x46   : > { %3540 = vmatprep.mubr.msk.bf16.mxu0 %vm355_vm1, %v4505_v53  ;;  %3408 = vmatprep.mubr.msk.bf16.mxu1 %vm355_vm1, %v4451_v46  ;;  %v1736_v35 = vrot.slane %v5377_v21, 2  ;;  %v1773_v8 = vsel %vm1750_vm2, %v4317_v0, %v4321_v1  ;;  %v1754_v61 = vsel %vm1750_vm2, %v4309_v59, %v1735_v51  ;;  %v1774_v32 = vsel %vm1750_vm2, %v4339_v47, %v4351_v45 }
  0x47   : > { %v1753_v31 = vsel %vm1750_vm2, %v4282_v18, %v1734_v5  ;;  %v4599_v2 = vpack.c.bf16 %v1754_v61, %v1772_v15  ;;  %v1737_v0 = vrot.slane %v5378_v22, 2  ;;  %v5379_v59 = vunpack.c.h.bf16 %v4217_v62 }
  0x48   : > { %v4591_v41 = vpack.c.bf16 %v1753_v31, %v1771_v30  ;;  %v1755_v54 = vsel %vm1750_vm2, %v4321_v1, %v1736_v35  ;;  %v1775_v1 = vsel %vm1750_vm2, %v4355_v52, %v4357_v60  ;;  %v5380_v35 = vunpack.c.l.bf16 %v4259_v29 }
  0x49   : > { %v4601_v18 = vpack.c.bf16 %v1755_v54, %v1773_v8  ;;  %v1738_v5 = vrot.slane %v5379_v59, 2  ;;  %v1776_v28 = vsel %vm1750_vm2, %v4378_v16, %v4382_v13  ;;  %v1756_v62 = vsel %vm1750_vm2, %v4351_v45, %v1737_v0 }
  0x4a   : > { %v1739_v30 = vrot.slane %v5380_v35, 2  ;;  %v5381_v47 = vunpack.c.h.bf16 %v4259_v29  ;;  %v1777_v51 = vsel %vm1750_vm2, %v4396_v19, %v4404_v38  ;;  %v5382_v16 = vunpack.c.l.bf16 %v4327_v12 }
  0x4b   : > { %v4640_v21 = vpack.c.bf16 %v1756_v62, %v1774_v32  ;;  %v1757_v45 = vsel %vm1750_vm2, %v4357_v60, %v1738_v5  ;;  %v1778_v19 = vsel %vm1750_vm2, %v4408_v37, %v4425_v39  ;;  %v5383_v22 = vunpack.c.h.bf16 %v4327_v12 }
  0x4c   : > { %v1740_v52 = vrot.slane %v5381_v47, 2  ;;  %v1741_v15 = vrot.slane %v5382_v16, 2  ;;  %v1758_v29 = vsel %vm1750_vm2, %v4382_v13, %v1739_v30  ;;  %v4652_v31 = vpack.c.bf16 %v1757_v45, %v1775_v1  ;;  %v5391_v45 = vld [vmem:[#allocation14_spill] sm:$0xff] }
  0x4d   : > { %3541 = vmatmul.mubr.msk.bf16.gmra.mrb[24].mxu0 %vm355_vm1, %v4539_v17  ;;  %3409 = vmatmul.mubr.msk.bf16.gmra.mrb[28].mxu1 %vm355_vm1, %v4462_v27  ;;  %v4654_v8 = vpack.c.bf16 %v1758_v29, %v1776_v28  ;;  %v1742_v0 = vrot.slane %v5383_v22, 2  ;;  %v1779_v37 = vsel %vm1750_vm2, %v4427_v24, %v4440_v34  ;;  %v5384_v32 = vunpack.c.l.bf16 %v4387_v36 }
  0x4e   : > { %3544 = vmatprep.mubr.msk.bf16.mxu0 %vm355_vm1, %v4566_v3  ;;  %3414 = vmatprep.mubr.msk.bf16.mxu1 %vm355_vm1, %v4503_v4  ;;  %v1759_v61 = vsel %vm1750_vm2, %v4404_v38, %v1740_v52  ;;  %v1760_v60 = vsel %vm1750_vm2, %v4425_v39, %v1741_v15  ;;  %v1780_v38 = vsel %vm1750_vm2, %v4453_v42, %v4455_v44  ;;  %v5385_v39 = vunpack.c.h.bf16 %v4387_v36  ;;  %v5390_v15 = vld [vmem:[#allocation2_spill] sm:$0xff] }
  0x4f   : > { %v4662_v54 = vpack.c.bf16 %v1759_v61, %v1777_v51  ;;  %v4664_v13 = vpack.c.bf16 %v1760_v60, %v1778_v19  ;;  %v1743_v59 = vrot.slane %v5384_v32, 2  ;;  %v1781_v12 = vsel %vm1750_vm2, %v4474_v56, %v4476_v63  ;;  %v3153_v32 = vld [vmem:[%s5272_s1 + $0xa] sm:$0x3] }
  0x50   : > { %v1744_v5 = vrot.slane %v5385_v39, 2  ;;  %v5386_v1 = vunpack.c.h.bf16 %v4503_v4  ;;  %v1761_v24 = vsel %vm1750_vm2, %v4440_v34, %v1742_v0  ;;  %v5387_v30 = vunpack.c.l.bf16 %v4438_v58  ;;  %v5393_v0 = vld [vmem:[#allocation8_spill] sm:$0xff] }
  0x51   : > { %v1782_v42 = vsel %vm1750_vm2, %v4480_v6, %v4497_v26  ;;  %v4695_v36 = vpack.c.bf16 %v1761_v24, %v1779_v37  ;;  %v1762_v56 = vsel %vm1750_vm2, %v4455_v44, %v1743_v59  ;;  %v5388_v34 = vunpack.c.h.bf16 %v4438_v58  ;;  %v4717_v44 = vld [vmem:[%s5272_s1 + $0x2] sm:$0x3]  ;;  %v5394_v37 = vld [vmem:[#allocation11_spill] sm:$0xff]  ;;  %v5396_v59 = vld [vmem:[#allocation12_spill] sm:$0xff] }
  0x52   : > { %v955_v35 = vrot.slane %v5386_v1, 1  ;;  %v1745_v28 = vrot.slane %v5387_v30, 2  ;;  %v1763_v4 = vsel %vm1750_vm2, %v4476_v63, %v1744_v5  ;;  %v4707_v47 = vpack.c.bf16 %v1762_v56, %v1780_v38  ;;  %v5397_v38 = vld [vmem:[#allocation4_spill] sm:$0xff]  ;;  %v5399_v5 = vld [vmem:[#allocation7_spill] sm:$0xff]  ;;  %v5401_v1 = vld [vmem:[#allocation9_spill] sm:$0xff] }
  0x53   : > { %v1746_v62 = vrot.slane %v5388_v34, 2  ;;  %v4709_v52 = vpack.c.bf16 %v1763_v4, %v1781_v12  ;;  %v1783_v58 = vsel %vm1750_vm2, %v4518_v20, %v4520_v49  ;;  %v5389_v51 = vunpack.c.l.bf16 %v4485_v57  ;;  %v5398_v39 = vld [vmem:[#allocation16_spill] sm:$0xff]  ;;  %v5400_v12 = vld [vmem:[#allocation17_spill] sm:$0xff]  ;;  %v5403_v24 = vld [vmem:[#allocation10_spill] sm:$0xff] }
  0x54   : > { %v1764_v6 = vsel %vm1750_vm2, %v4497_v26, %v1745_v28  ;;  %v5392_v29 = vunpack.c.l.bf16 %v4533_v10  ;;  %v5404_v30 = vld [vmem:[#allocation21_spill] sm:$0xff]  ;;  %v5407_v56 = vld [vmem:[#allocation15_spill] sm:$0xff]  ;;  %v5409_v34 = vld [vmem:[#allocation18_spill] sm:$0xff] }
  0x55   : > { %3545 = vmatmul.mubr.msk.bf16.gmra.mrb[28].mxu0 %vm355_vm1, %v4576_v11  ;;  %3415 = vmatmul.mubr.msk.bf16.vlgmr.msra.gmra.mrb[0].mxu1 %vm355_vm1, %v4105_v9  ;;  %v4727_v63 = vpack.c.bf16 %v1764_v6, %v1782_v42  ;;  %v1765_v26 = vsel %vm1750_vm2, %v4520_v49, %v1746_v62  ;;  %v1747_v16 = vrot.slane %v5389_v51, 2  ;;  %v1784_v9 = vsel %vm1750_vm2, %v4526_v25, %v4528_v40  ;;  %v5405_v28 = vld [vmem:[#allocation13_spill] sm:$0xff]  ;;  %v5406_v42 = vld [vmem:[#allocation24_spill] sm:$0xff]  ;;  %v5410_v62 = vld [vmem:[#allocation26_spill] sm:$0xff] }
  0x56   : > { %3550 = vmatprep.mubr.msk.bf16.mxu0 %vm355_vm1, %v4169_v43  ;;  %3418 = vmatprep.mubr.msk.bf16.mxu1 %vm355_vm1, %v5390_v15  ;;  %v4737_v20 = vpack.c.bf16 %v1765_v26, %v1783_v58  ;;  %v973_v19 = vrot.slane %v5392_v29, 1  ;;  %v4748_v49 = vsel %vm993_vm3, %v4552_v50, %v955_v35  ;;  %v1856_v50 = vsel %vm404_vm0, %v5393_v0, 0  ;;  %v5408_v4 = vld [vmem:[#allocation25_spill] sm:$0xff]  ;;  %v5411_v6 = vld [vmem:[#allocation19_spill] sm:$0xff]  ;;  %v5412_v58 = vld [vmem:[#allocation22_spill] sm:$0xff] }
  0x57   : > { %3447 = vmatpush3.bf16.msra.mxu1 %v5391_v45  ;;  %v1766_v61 = vsel %vm1750_vm2, %v4528_v40, %v1747_v16  ;;  %v5395_v40 = vld [vmem:[#allocation3_spill] sm:$0xff]  ;;  %v4810_v26 = vld [vmem:[%s4101_s6 + $0x110] sm:$0xff]   ;;  %v5414_v29 = vunpack.c.l.bf16 %v4462_v27 }
  0x58   : > { %3977 = vmatprep.subr.msk.bf16.mxu1 %vm404_vm0, %v4717_v44  ;;  %v4755_v60 = vpack.c.bf16 %v1766_v61, %v1784_v9  ;;  %v4759_v25 = vsel %vm993_vm3, %v955_v35, %v973_v19  ;;  %v5402_v35 = vld [vmem:[#allocation20_spill] sm:$0xff]  ;;  %v5413_v51 = vld [vmem:[#allocation23_spill] sm:$0xff]  ;;  %v5339_v16 = vunpack.c.l.bf16 %v4810_v26  ;;  %v5338_v45 = vunpack.c.h.bf16 %v4810_v26 }
  0x59   : > { %v5340_v9 = vunpack.c.h.bf16 %v4533_v10  ;;  %v1712_v19 = vrot.slane %v5414_v29, 2  ;;  %v5415_v61 = vunpack.c.h.bf16 %v4462_v27 }
  0x5a   : > { %v972_v22 = vrot.slane %v5338_v45, 1  ;;  %v5416_v45 = vunpack.c.h.bf16 %v4485_v57  ;;  %v5417_v57 = vpack.c.bf16 %v4580_v23, %v4558_v48  ;;  %v5423_v23 = vunpack.c.h.bf16 %v4810_v26 }
  0x5b   : > { %v1730_v0 = vrot.slane %v5415_v61, 2  ;;  %v990_v14 = vrot.slane %v5340_v9, 1 }
  0x5d   : > { %3551 = vmatmul.mubr.msk.bf16.vlgmr.msra.gmra.mrb[0].mxu0 %vm355_vm1, %v5394_v37  ;;  %3419 = vmatmul.mubr.msk.bf16.gmra.mrb[4].mxu1 %vm355_vm1, %v5395_v40  ;;  %v1011_v29 = vsel %vm993_vm3, %v972_v22, %v990_v14  ;;  %v1785_v9 = vsel %vm1750_vm2, %v1712_v19, %v1730_v0  ;;  %v1099_v14 = vsel %vm404_vm0, %v4717_v44, 0 }
  0x5e   : > { %3583 = vmatpush3.bf16.msra.mxu0 %v1856_v50  ;;  %3554 = vmatprep.mubr.msk.bf16.mxu0 %vm355_vm1, %v5396_v59  ;;  %v954_v50 = vrot.slane %v5339_v16, 1  ;;  %v1748_v16 = vrot.slane %v5416_v45, 2 }
  0x5f   : > { %3422 = vmatprep.mubr.msk.bf16.mxu1 %vm355_vm1, %v5397_v38  ;;  %3981 = vmatprep.subr.msk.bf16.mxu0 %vm404_vm0, %v3153_v32 }
  0x60   : > { %v1029_v61 = vsel %vm993_vm3, %v954_v50, %v972_v22  ;;  %v1767_v10 = vsel %vm1750_vm2, %v1730_v0, %v1748_v16 }
  0x65   : > { %3555 = vmatmul.mubr.msk.bf16.gmra.mrb[4].mxu0 %vm355_vm1, %v5398_v39  ;;  %3423 = vmatmul.mubr.msk.bf16.gmra.mrb[8].mxu1 %vm355_vm1, %v5399_v5 }
  0x66   : > { %3558 = vmatprep.mubr.msk.bf16.mxu0 %vm355_vm1, %v5400_v12  ;;  %3426 = vmatprep.mubr.msk.bf16.mxu1 %vm355_vm1, %v5401_v1 }
  0x6d   : > { %3559 = vmatmul.mubr.msk.bf16.gmra.mrb[8].mxu0 %vm355_vm1, %v5402_v35  ;;  %3427 = vmatmul.mubr.msk.bf16.gmra.mrb[12].mxu1 %vm355_vm1, %v5403_v24 }
  0x6e   : > { %3562 = vmatprep.mubr.msk.bf16.mxu0 %vm355_vm1, %v5404_v30  ;;  %3430 = vmatprep.mubr.msk.bf16.mxu1 %vm355_vm1, %v5405_v28 }
  0x75   : > { %3563 = vmatmul.mubr.msk.bf16.gmra.mrb[12].mxu0 %vm355_vm1, %v5406_v42  ;;  %3431 = vmatmul.mubr.msk.bf16.gmra.mrb[16].mxu1 %vm355_vm1, %v5407_v56 }
  0x76   : > { %3566 = vmatprep.mubr.msk.bf16.mxu0 %vm355_vm1, %v5408_v4  ;;  %3434 = vmatprep.mubr.msk.bf16.mxu1 %vm355_vm1, %v5409_v34 }
  0x7d   : > { %3567 = vmatmul.mubr.msk.bf16.gmra.mrb[16].mxu0 %vm355_vm1, %v5410_v62  ;;  %3435 = vmatmul.mubr.msk.bf16.gmra.mrb[20].mxu1 %vm355_vm1, %v5411_v6 }
  0x7e   : > { %3570 = vmatprep.mubr.msk.bf16.mxu0 %vm355_vm1, %v4495_v55  ;;  %3438 = vmatprep.mubr.msk.bf16.mxu1 %vm355_vm1, %v5412_v58 }
  0x85   : > { %3571 = vmatmul.mubr.msk.bf16.gmra.mrb[20].mxu0 %vm355_vm1, %v4505_v53  ;;  %3439 = vmatmul.mubr.msk.bf16.gmra.mrb[24].mxu1 %vm355_vm1, %v5413_v51 }
  0x86   : > { %3574 = vmatprep.mubr.msk.bf16.mxu0 %vm355_vm1, %v4539_v17  ;;  %3442 = vmatprep.mubr.msk.bf16.mxu1 %vm355_vm1, %v4414_v33 }
  0x8d   : > { %3575 = vmatmul.mubr.msk.bf16.gmra.mrb[24].mxu0 %vm355_vm1, %v4566_v3  ;;  %3443 = vmatmul.mubr.msk.bf16.gmra.mrb[28].mxu1 %vm355_vm1, %v4451_v46  ;;  %v1047_v3 = vpack.c.bf16 %v1011_v29, %v1029_v61 }
  0x8e   : > { %3578 = vmatprep.mubr.msk.bf16.mxu0 %vm355_vm1, %v4576_v11  ;;  %3448 = vmatprep.mubr.msk.bf16.mxu1 %vm355_vm1, %v5390_v15  ;;  %v4851_v11 = vpack.c.bf16 %v1767_v10, %v1785_v9  ;;  %v2057_v10 = vsel %vm404_vm0, %v3153_v32, 0  ;;  %v5418_v15 = vld [vmem:[#allocation6_spill] sm:$0xff] }
  0x95   : > { %3579 = vmatmul.mubr.msk.bf16.gmra.mrb[28].mxu0 %vm355_vm1, %v1047_v3  ;;  %3449 = vmatmul.mubr.msk.bf16.vlgmr.msra.gmra.mrb[0].mxu1 %vm355_vm1, %v5395_v40  ;;  %v3170_v3 = vld [vmem:[%s5272_s1 + $0x10] sm:$0x3] }
  0x96   : > { %3584 = vmatprep.mubr.msk.bf16.mxu0 %vm355_vm1, %v5417_v57  ;;  %3452 = vmatprep.mubr.msk.bf16.mxu1 %vm355_vm1, %v5397_v38 }
  0x97   : > { %3481 = vmatpush3.bf16.msra.mxu1 %v1099_v14 }
  0x9d   : > { %3585 = vmatmul.mubr.msk.bf16.vlgmr.msra.gmra.mrb[0].mxu0 %vm355_vm1, %v5418_v15  ;;  %3453 = vmatmul.mubr.msk.bf16.gmra.mrb[4].mxu1 %vm355_vm1, %v5399_v5 }
  0x9e   : > { %3617 = vmatpush3.bf16.msra.mxu0 %v2057_v10  ;;  %3588 = vmatprep.mubr.msk.bf16.mxu0 %vm355_vm1, %v4591_v41 }
  0x9f   : > { %3456 = vmatprep.mubr.msk.bf16.mxu1 %vm355_vm1, %v5401_v1  ;;  %3982 = vmatprep.subr.msk.bf16.mxu0 %vm404_vm0, %v3170_v3 }
  0xa5   : > { %3589 = vmatmul.mubr.msk.bf16.gmra.mrb[4].mxu0 %vm355_vm1, %v4599_v2  ;;  %3457 = vmatmul.mubr.msk.bf16.gmra.mrb[8].mxu1 %vm355_vm1, %v5403_v24 }
  0xa6   : > { %3592 = vmatprep.mubr.msk.bf16.mxu0 %vm355_vm1, %v4601_v18  ;;  %3460 = vmatprep.mubr.msk.bf16.mxu1 %vm355_vm1, %v5405_v28 }
  0xad   : > { %3593 = vmatmul.mubr.msk.bf16.gmra.mrb[8].mxu0 %vm355_vm1, %v4640_v21  ;;  %3461 = vmatmul.mubr.msk.bf16.gmra.mrb[12].mxu1 %vm355_vm1, %v5407_v56 }
  0xae   : > { %3596 = vmatprep.mubr.msk.bf16.mxu0 %vm355_vm1, %v4652_v31  ;;  %3464 = vmatprep.mubr.msk.bf16.mxu1 %vm355_vm1, %v5409_v34 }
  0xb5   : > { %3597 = vmatmul.mubr.msk.bf16.gmra.mrb[12].mxu0 %vm355_vm1, %v4654_v8  ;;  %3465 = vmatmul.mubr.msk.bf16.gmra.mrb[16].mxu1 %vm355_vm1, %v5411_v6 }
  0xb6   : > { %3600 = vmatprep.mubr.msk.bf16.mxu0 %vm355_vm1, %v4662_v54  ;;  %3468 = vmatprep.mubr.msk.bf16.mxu1 %vm355_vm1, %v5412_v58 }
  0xbd   : > { %3601 = vmatmul.mubr.msk.bf16.gmra.mrb[16].mxu0 %vm355_vm1, %v4664_v13  ;;  %3469 = vmatmul.mubr.msk.bf16.gmra.mrb[20].mxu1 %vm355_vm1, %v5413_v51  ;;  %v5087_v51 = vld [vmem:[%s5273_s2] ss:$0 sm:$0xff] }
  0xbe   : > { %3604 = vmatprep.mubr.msk.bf16.mxu0 %vm355_vm1, %v4695_v36  ;;  %3472 = vmatprep.mubr.msk.bf16.mxu1 %vm355_vm1, %v4414_v33  ;;  %v5419_v33 = vpack.c.bf16 %v4759_v25, %v4748_v49 }
  0xc5   : > { %3605 = vmatmul.mubr.msk.bf16.gmra.mrb[20].mxu0 %vm355_vm1, %v4707_v47  ;;  %3473 = vmatmul.mubr.msk.bf16.gmra.mrb[24].mxu1 %vm355_vm1, %v4451_v46  ;;  %v5420_v46 = vld [vmem:[#allocation5_spill] sm:$0xff] }
  0xc6   : > { %3608 = vmatprep.mubr.msk.bf16.mxu0 %vm355_vm1, %v4709_v52  ;;  %3476 = vmatprep.mubr.msk.bf16.mxu1 %vm355_vm1, %v4462_v27  ;;  %v2258_v27 = vsel %vm404_vm0, %v3170_v3, 0 }
  0xcd   : > { %3609 = vmatmul.mubr.msk.bf16.gmra.mrb[24].mxu0 %vm355_vm1, %v4727_v63  ;;  %3477 = vmatmul.mubr.msk.bf16.gmra.mrb[28].mxu1 %vm355_vm1, %v4810_v26 }
  0xce   : > { %3612 = vmatprep.mubr.msk.bf16.mxu0 %vm355_vm1, %v4737_v20  ;;  %3482 = vmatprep.mubr.msk.bf16.mxu1 %vm355_vm1, %v5419_v33 }
  0xd5   : > { %3613 = vmatmul.mubr.msk.bf16.gmra.mrb[28].mxu0 %vm355_vm1, %v4755_v60  ;;  %3483 = vmatmul.mubr.msk.bf16.vlgmr.msra.gmra.mrb[0].mxu1 %vm355_vm1, %v5420_v46 }
  0xd6   : > { %3618 = vmatprep.mubr.msk.bf16.mxu0 %vm355_vm1, %v5418_v15  ;;  %3486 = vmatprep.mubr.msk.bf16.mxu1 %vm355_vm1, %v4169_v43  ;;  %v5421_v43 = vld [vmem:[#allocation28_spill] sm:$0xff] }
  0xdd   : > { %3619 = vmatmul.mubr.msk.bf16.vlgmr.msra.gmra.mrb[0].mxu0 %vm355_vm1, %v4591_v41  ;;  %3487 = vmatmul.mubr.msk.bf16.gmra.mrb[4].mxu1 %vm355_vm1, %v5394_v37 }
  0xde   : > { %3651 = vmatpush3.bf16.msra.mxu0 %v2258_v27  ;;  %3622 = vmatprep.mubr.msk.bf16.mxu0 %vm355_vm1, %v4599_v2 }
  0xdf   : > { %3490 = vmatprep.mubr.msk.bf16.mxu1 %vm355_vm1, %v5396_v59 }
  0xe5   : > { %3623 = vmatmul.mubr.msk.bf16.gmra.mrb[4].mxu0 %vm355_vm1, %v4601_v18  ;;  %3491 = vmatmul.mubr.msk.bf16.gmra.mrb[8].mxu1 %vm355_vm1, %v5398_v39 }
  0xe6   : > { %3626 = vmatprep.mubr.msk.bf16.mxu0 %vm355_vm1, %v4640_v21  ;;  %3494 = vmatprep.mubr.msk.bf16.mxu1 %vm355_vm1, %v5400_v12 }
  0xed   : > { %3627 = vmatmul.mubr.msk.bf16.gmra.mrb[8].mxu0 %vm355_vm1, %v4652_v31  ;;  %3495 = vmatmul.mubr.msk.bf16.gmra.mrb[12].mxu1 %vm355_vm1, %v5402_v35 }
  0xee   : > { %3630 = vmatprep.mubr.msk.bf16.mxu0 %vm355_vm1, %v4654_v8  ;;  %3498 = vmatprep.mubr.msk.bf16.mxu1 %vm355_vm1, %v5404_v30 }
  0xf5   : > { %3631 = vmatmul.mubr.msk.bf16.gmra.mrb[12].mxu0 %vm355_vm1, %v4662_v54  ;;  %3499 = vmatmul.mubr.msk.bf16.gmra.mrb[16].mxu1 %vm355_vm1, %v5406_v42 }
  0xf6   : > { %3634 = vmatprep.mubr.msk.bf16.mxu0 %vm355_vm1, %v4664_v13  ;;  %3502 = vmatprep.mubr.msk.bf16.mxu1 %vm355_vm1, %v5408_v4 }
  0xfd   : > { %3635 = vmatmul.mubr.msk.bf16.gmra.mrb[16].mxu0 %vm355_vm1, %v4695_v36  ;;  %3503 = vmatmul.mubr.msk.bf16.gmra.mrb[20].mxu1 %vm355_vm1, %v5410_v62 }
  0xfe   : > { %3638 = vmatprep.mubr.msk.bf16.mxu0 %vm355_vm1, %v4707_v47  ;;  %3506 = vmatprep.mubr.msk.bf16.mxu1 %vm355_vm1, %v4495_v55  ;;  %v2604_v55 = vld [vmem:[%s5274_s3] sm:$0xf] }
  0xff   : > { %3983 = vmatprep.subr.msk.bf16.mxu1 %vm2661_vm4, %v2604_v55 }
 0x105   : > { %3639 = vmatmul.mubr.msk.bf16.gmra.mrb[20].mxu0 %vm355_vm1, %v4709_v52  ;;  %3507 = vmatmul.mubr.msk.bf16.gmra.mrb[24].mxu1 %vm355_vm1, %v4505_v53  ;;  %v2663_v53 = vsel %vm2661_vm4, %v2604_v55, 0 }
 0x106   : > { %3642 = vmatprep.mubr.msk.bf16.mxu0 %vm355_vm1, %v4727_v63  ;;  %3510 = vmatprep.mubr.msk.bf16.mxu1 %vm355_vm1, %v4539_v17  ;;  %v5422_v17 = vunpack.c.l.bf16 %v4810_v26 }
 0x107   : > { %3685 = vmatpush3.bf16.msra.mxu1 %v2663_v53 }
 0x108   : > { %v1713_v48 = vrot.slane %v5422_v17, 2 }
 0x10d   : > { %3643 = vmatmul.mubr.msk.bf16.gmra.mrb[24].mxu0 %vm355_vm1, %v4737_v20  ;;  %3511 = vmatmul.mubr.msk.bf16.gmra.mrb[28].mxu1 %vm355_vm1, %v5421_v43 }
 0x10e   : > { %3646 = vmatprep.mubr.msk.bf16.mxu0 %vm355_vm1, %v4755_v60 }
 0x115   : > { %3647 = vmatmul.mubr.msk.bf16.gmra.mrb[28].mxu0 %vm355_vm1, %v4851_v11 }
 0x116   : > { %3652 = vmatprep.mubr.msk.bf16.mxu0 %vm355_vm1, %v4591_v41  ;;  %v1731_v41 = vrot.slane %v5423_v23, 2 }
 0x11d   : > { %3653 = vmatmul.mubr.msk.bf16.vlgmr.msra.gmra.mrb[0].mxu0 %vm355_vm1, %v4599_v2  ;;  %v5424_v2 = vld [vmem:[#allocation27_spill] sm:$0xff] }
 0x11e   : > { %3656 = vmatprep.mubr.msk.bf16.mxu0 %vm355_vm1, %v4601_v18  ;;  %v5425_v18 = vunpack.c.h.bf16 %v5424_v2 }
 0x125   : > { %3657 = vmatmul.mubr.msk.bf16.gmra.mrb[4].mxu0 %vm355_vm1, %v4640_v21  ;;  %v1749_v21 = vrot.slane %v5425_v18, 2 }
 0x126   : > { %3660 = vmatprep.mubr.msk.bf16.mxu0 %vm355_vm1, %v4652_v31 }
 0x127   : > { %v1768_v31 = vsel %vm1750_vm2, %v1731_v41, %v1749_v21 }
 0x12d   : > { %3661 = vmatmul.mubr.msk.bf16.gmra.mrb[8].mxu0 %vm355_vm1, %v4654_v8  ;;  %v1786_v8 = vsel %vm1750_vm2, %v1713_v48, %v1731_v41 }
 0x12e   : > { %3664 = vmatprep.mubr.msk.bf16.mxu0 %vm355_vm1, %v4662_v54  ;;  %v1804_v54 = vpack.c.bf16 %v1768_v31, %v1786_v8 }
 0x135   : > { %3665 = vmatmul.mubr.msk.bf16.gmra.mrb[12].mxu0 %vm355_vm1, %v4664_v13 }
 0x136   : > { %3668 = vmatprep.mubr.msk.bf16.mxu0 %vm355_vm1, %v4695_v36 }
 0x13d   : > { %3669 = vmatmul.mubr.msk.bf16.gmra.mrb[16].mxu0 %vm355_vm1, %v4707_v47 }
 0x13e   : > { %3672 = vmatprep.mubr.msk.bf16.mxu0 %vm355_vm1, %v4709_v52 }
 0x145   : > { %3673 = vmatmul.mubr.msk.bf16.gmra.mrb[20].mxu0 %vm355_vm1, %v4727_v63 }
 0x146   : > { %3676 = vmatprep.mubr.msk.bf16.mxu0 %vm355_vm1, %v4737_v20 }
 0x14d   : > { %3677 = vmatmul.mubr.msk.bf16.gmra.mrb[24].mxu0 %vm355_vm1, %v4755_v60 }
 0x14e   : > { %3680 = vmatprep.mubr.msk.bf16.mxu0 %vm355_vm1, %v4851_v11 }
 0x155   : > { %3681 = vmatmul.mubr.msk.bf16.gmra.mrb[28].mxu0 %vm355_vm1, %v1804_v54 }
 0x1a8   : > { %v3484_v13 = vpop.f32.mrb[0].mxu1 }
 0x1a9   : > { %v1135_v36 = vpop.f32.mrb[1].mxu1 }
 0x1aa   : > { %v3485_v47 = vpop.f32.mrb[2].mxu1 }
 0x1ab   : > { %v1138_v52 = vpop.f32.mrb[3].mxu1 }
 0x1b0   : > { %v3488_v44 = vpop.f32.mrb[4].mxu1 }
 0x1b1   : > { %v1151_v63 = vpop.f32.mrb[5].mxu1 }
 0x1b2   : > { %v3489_v20 = vpop.f32.mrb[6].mxu1 }
 0x1b3   : > { %v1154_v49 = vpop.f32.mrb[7].mxu1 }
 0x1b8   : > { %v5036_v60 = vpop.f32.mrb[8].mxu1 }
 0x1b9   : > { %v5038_v25 = vpop.f32.mrb[9].mxu1 }
 0x1ba   : > { %v5040_v22 = vpop.f32.mrb[10].mxu1 }
 0x1bb   : > { %v5042_v37 = vpop.f32.mrb[11].mxu1 }
 0x1c0   : > { %v5044_v7 = vpop.f32.mrb[12].mxu1 }
 0x1c1   : > { %v5046_v32 = vpop.f32.mrb[13].mxu1 }
 0x1c2   : > { %v5048_v40 = vpop.f32.mrb[14].mxu1 }
 0x1c3   : > { %v5050_v59 = vpop.f32.mrb[15].mxu1 }
 0x1c8   : > { %v5052_v38 = vpop.f32.mrb[16].mxu1 }
 0x1c9   : > { %v5054_v39 = vpop.f32.mrb[17].mxu1 }
 0x1ca   : > { %v5056_v5 = vpop.f32.mrb[18].mxu1 }
 0x1cb   : > { %v5058_v12 = vpop.f32.mrb[19].mxu1 }
 0x1d0   : > { %v5060_v1 = vpop.f32.mrb[20].mxu1 }
 0x1d1   : > { %v5062_v35 = vpop.f32.mrb[21].mxu1 }
 0x1d2   : > { %v5064_v24 = vpop.f32.mrb[22].mxu1 }
 0x1d3   : > { %v5066_v30 = vpop.f32.mrb[23].mxu1 }
 0x1d8   : > { %v5068_v28 = vpop.f32.mrb[24].mxu1 }
 0x1d9   : > { %v5070_v42 = vpop.f32.mrb[25].mxu1 }
 0x1da   : > { %v5072_v56 = vpop.f32.mrb[26].mxu1 }
 0x1db   : > { %v5074_v4 = vpop.f32.mrb[27].mxu1 }
 0x1e0   : > { %v5076_v34 = vpop.f32.mrb[28].mxu1 }
 0x1e1   : > { %v5078_v62 = vpop.f32.mrb[29].mxu1 }
 0x1e2   : > { %v5080_v6 = vpop.f32.mrb[30].mxu1 }
 0x1e3   : > { %v5082_v58 = vpop.f32.mrb[31].mxu1 }
 0x1f0   : > { %v3654_v26 = vpop.f32.mrb[0].mxu0 }
 0x1f1   : > { %v3718_v16 = vadd.f32 %v3654_v26, %v3484_v13  ;;  %v2294_v45 = vpop.f32.mrb[1].mxu0 }
 0x1f2   : > { %v3719_v9 = vadd.f32 %v2294_v45, %v1135_v36  ;;  %v3655_v19 = vpop.f32.mrb[2].mxu0 }
 0x1f3   : > { %v2462_v0 = vadd.f32 %v3718_v16, %v5087_v51  ;;  %v3720_v50 = vadd.f32 %v3655_v19, %v3485_v47  ;;  %v2297_v29 = vpop.f32.mrb[3].mxu0 }
 0x1f4   : > { %v2460_v61 = vadd.f32 %v3719_v9, %v5087_v51  ;;  %v3721_v11 = vadd.f32 %v2297_v29, %v1138_v52 }
 0x1f5   : > { %v2526_v14 = vmul.f32 0.1, %v2462_v0  ;;  %v2463_v57 = vadd.f32 %v3720_v50, %v5087_v51  ;;  %vm2494_vm5 = vcmp.gt.f32.partialorder %v2462_v0, 0.0 }
 0x1f6   : > { %v2524_v10 = vmul.f32 0.1, %v2460_v61  ;;  %v2461_v15 = vadd.f32 %v3721_v11, %v5087_v51  ;;  %vm2492_vm6 = vcmp.gt.f32.partialorder %v2460_v61, 0.0 }
 0x1f7   : > { %vm2495_vm7 = vcmp.gt.f32.partialorder %v2463_v57, 0.0  ;;  %v2527_v3 = vmul.f32 0.1, %v2463_v57  ;;  %v2558_v27 = vsel %vm2494_vm5, %v2462_v0, %v2526_v14 }
 0x1f8   : > { %vm2493_vm8 = vcmp.gt.f32.partialorder %v2461_v15, 0.0  ;;  %v2525_v33 = vmul.f32 0.1, %v2461_v15  ;;  %v3658_v46 = vpop.f32.mrb[4].mxu0  ;;  %v2556_v17 = vsel %vm2492_vm6, %v2460_v61, %v2524_v10 }
 0x1f9   : > { %v2559_v43 = vsel %vm2495_vm7, %v2463_v57, %v2527_v3  ;;  %v3722_v55 = vadd.f32 %v3658_v46, %v3488_v44  ;;  %v2310_v53 = vpop.f32.mrb[5].mxu0 }
 0x1fa   : > { %v2589_v48 = vpack.c.bf16 %v2559_v43, %v2558_v27  ;;  %v2557_v23 = vsel %vm2493_vm8, %v2461_v15, %v2525_v33  ;;  %v3723_v41 = vadd.f32 %v2310_v53, %v1151_v63  ;;  %v3659_v2 = vpop.f32.mrb[6].mxu0 }
 0x1fb   : > { %v2466_v18 = vadd.f32 %v3722_v55, %v5087_v51  ;;  %v3724_v21 = vadd.f32 %v3659_v2, %v3489_v20  ;;  %v2313_v31 = vpop.f32.mrb[7].mxu0  ;;  %v2588_v8 = vpack.c.bf16 %v2557_v23, %v2556_v17 }
 0x1fc   : > { %v2464_v54 = vadd.f32 %v3723_v41, %v5087_v51  ;;  %v3725_v13 = vadd.f32 %v2313_v31, %v1154_v49 }
 0x1fd   : > { %v2530_v36 = vmul.f32 0.1, %v2466_v18  ;;  %v2467_v47 = vadd.f32 %v3724_v21, %v5087_v51  ;;  %3686 = vmatprep.mubr.msk.bf16.mxu1 %vm2612_vm9, %v2588_v8  ;;  %vm2498_vm10 = vcmp.gt.f32.partialorder %v2466_v18, 0.0 }
 0x1fe   : > { %v2528_v52 = vmul.f32 0.1, %v2464_v54  ;;  %v2465_v44 = vadd.f32 %v3725_v13, %v5087_v51  ;;  %3687 = vmatmul.mubr.msk.bf16.vlgmr.msra.gmra.mrb[32].mxu1 %vm2612_vm9, %v2589_v48  ;;  %vm2496_vm11 = vcmp.gt.f32.partialorder %v2464_v54, 0.0 }
 0x1ff   : > { %vm2499_vm12 = vcmp.gt.f32.partialorder %v2467_v47, 0.0  ;;  %v2531_v63 = vmul.f32 0.1, %v2467_v47  ;;  %v2562_v16 = vsel %vm2498_vm10, %v2466_v18, %v2530_v36 }
 0x200   : > { %vm2497_vm13 = vcmp.gt.f32.partialorder %v2465_v44, 0.0  ;;  %v2529_v20 = vmul.f32 0.1, %v2465_v44  ;;  %v3662_v26 = vpop.f32.mrb[8].mxu0  ;;  %v2560_v19 = vsel %vm2496_vm11, %v2464_v54, %v2528_v52 }
 0x201   : > { %v2563_v45 = vsel %vm2499_vm12, %v2467_v47, %v2531_v63  ;;  %v3726_v49 = vadd.f32 %v3662_v26, %v5036_v60  ;;  %v2326_v9 = vpop.f32.mrb[9].mxu0 }
 0x202   : > { %v2561_v0 = vsel %vm2497_vm13, %v2465_v44, %v2529_v20  ;;  %v3727_v50 = vadd.f32 %v2326_v9, %v5038_v25  ;;  %v3663_v29 = vpop.f32.mrb[10].mxu0  ;;  %v2591_v61 = vpack.c.bf16 %v2563_v45, %v2562_v16 }
 0x203   : > { %v2470_v11 = vadd.f32 %v3726_v49, %v5087_v51  ;;  %v3728_v14 = vadd.f32 %v3663_v29, %v5040_v22  ;;  %v2329_v57 = vpop.f32.mrb[11].mxu0  ;;  %v2590_v10 = vpack.c.bf16 %v2561_v0, %v2560_v19 }
 0x204   : > { %v2468_v15 = vadd.f32 %v3727_v50, %v5087_v51  ;;  %v3729_v3 = vadd.f32 %v2329_v57, %v5042_v37 }
 0x205   : > { %v2534_v33 = vmul.f32 0.1, %v2470_v11  ;;  %v2471_v60 = vadd.f32 %v3728_v14, %v5087_v51  ;;  %3690 = vmatprep.mubr.msk.bf16.mxu1 %vm2612_vm9, %v2590_v10  ;;  %vm2502_vm14 = vcmp.gt.f32.partialorder %v2470_v11, 0.0 }
 0x206   : > { %v2532_v46 = vmul.f32 0.1, %v2468_v15  ;;  %v2469_v25 = vadd.f32 %v3729_v3, %v5087_v51  ;;  %3691 = vmatmul.mubr.msk.bf16.gmra.mrb[36].mxu1 %vm2612_vm9, %v2591_v61  ;;  %vm2500_vm15 = vcmp.gt.f32.partialorder %v2468_v15, 0.0 }
 0x207   : > { %vm2503_vm0 = vcmp.gt.f32.partialorder %v2471_v60, 0.0  ;;  %v2535_v22 = vmul.f32 0.1, %v2471_v60  ;;  %v2566_v55 = vsel %vm2502_vm14, %v2470_v11, %v2534_v33 }
 0x208   : > { %vm2501_vm2 = vcmp.gt.f32.partialorder %v2469_v25, 0.0  ;;  %v2533_v27 = vmul.f32 0.1, %v2469_v25  ;;  %v3666_v43 = vpop.f32.mrb[12].mxu0  ;;  %v2564_v48 = vsel %vm2500_vm15, %v2468_v15, %v2532_v46 }
 0x209   : > { %v2567_v53 = vsel %vm2503_vm0, %v2471_v60, %v2535_v22  ;;  %v3730_v37 = vadd.f32 %v3666_v43, %v5044_v7  ;;  %v2342_v17 = vpop.f32.mrb[13].mxu0 }
 0x20a   : > { %v2565_v23 = vsel %vm2501_vm2, %v2469_v25, %v2533_v27  ;;  %v3731_v41 = vadd.f32 %v2342_v17, %v5046_v32  ;;  %v3667_v2 = vpop.f32.mrb[14].mxu0  ;;  %v2593_v18 = vpack.c.bf16 %v2567_v53, %v2566_v55 }
 0x20b   : > { %v2474_v21 = vadd.f32 %v3730_v37, %v5087_v51  ;;  %v3732_v31 = vadd.f32 %v3667_v2, %v5048_v40  ;;  %v2345_v8 = vpop.f32.mrb[15].mxu0  ;;  %v2592_v54 = vpack.c.bf16 %v2565_v23, %v2564_v48 }
 0x20c   : > { %v2472_v13 = vadd.f32 %v3731_v41, %v5087_v51  ;;  %v3733_v36 = vadd.f32 %v2345_v8, %v5050_v59 }
 0x20d   : > { %v2538_v47 = vmul.f32 0.1, %v2474_v21  ;;  %v2475_v7 = vadd.f32 %v3732_v31, %v5087_v51  ;;  %3694 = vmatprep.mubr.msk.bf16.mxu1 %vm2612_vm9, %v2592_v54  ;;  %vm2506_vm3 = vcmp.gt.f32.partialorder %v2474_v21, 0.0 }
 0x20e   : > { %v2536_v52 = vmul.f32 0.1, %v2472_v13  ;;  %v2473_v32 = vadd.f32 %v3733_v36, %v5087_v51  ;;  %3695 = vmatmul.mubr.msk.bf16.gmra.mrb[40].mxu1 %vm2612_vm9, %v2593_v18  ;;  %vm2504_vm4 = vcmp.gt.f32.partialorder %v2472_v13, 0.0 }
 0x20f   : > { %vm2507_vm5 = vcmp.gt.f32.partialorder %v2475_v7, 0.0  ;;  %v2539_v40 = vmul.f32 0.1, %v2475_v7  ;;  %v2570_v20 = vsel %vm2506_vm3, %v2474_v21, %v2538_v47 }
 0x210   : > { %vm2505_vm6 = vcmp.gt.f32.partialorder %v2473_v32, 0.0  ;;  %v2537_v44 = vmul.f32 0.1, %v2473_v32  ;;  %v3670_v63 = vpop.f32.mrb[16].mxu0  ;;  %v2568_v45 = vsel %vm2504_vm4, %v2472_v13, %v2536_v52 }
 0x211   : > { %v2571_v26 = vsel %vm2507_vm5, %v2475_v7, %v2539_v40  ;;  %v3734_v59 = vadd.f32 %v3670_v63, %v5052_v38  ;;  %v2358_v16 = vpop.f32.mrb[17].mxu0 }
 0x212   : > { %v2569_v49 = vsel %vm2505_vm6, %v2473_v32, %v2537_v44  ;;  %v3735_v9 = vadd.f32 %v2358_v16, %v5054_v39  ;;  %v3671_v19 = vpop.f32.mrb[18].mxu0  ;;  %v2595_v0 = vpack.c.bf16 %v2571_v26, %v2570_v20 }
 0x213   : > { %v2478_v50 = vadd.f32 %v3734_v59, %v5087_v51  ;;  %v3736_v29 = vadd.f32 %v3671_v19, %v5056_v5  ;;  %v2361_v61 = vpop.f32.mrb[19].mxu0  ;;  %v2594_v11 = vpack.c.bf16 %v2569_v49, %v2568_v45 }
 0x214   : > { %v2476_v14 = vadd.f32 %v3735_v9, %v5087_v51  ;;  %v3737_v57 = vadd.f32 %v2361_v61, %v5058_v12 }
 0x215   : > { %v2542_v10 = vmul.f32 0.1, %v2478_v50  ;;  %v2479_v38 = vadd.f32 %v3736_v29, %v5087_v51  ;;  %3698 = vmatprep.mubr.msk.bf16.mxu1 %vm2612_vm9, %v2594_v11  ;;  %vm2510_vm7 = vcmp.gt.f32.partialorder %v2478_v50, 0.0 }
 0x216   : > { %v2540_v15 = vmul.f32 0.1, %v2476_v14  ;;  %v2477_v39 = vadd.f32 %v3737_v57, %v5087_v51  ;;  %3699 = vmatmul.mubr.msk.bf16.gmra.mrb[44].mxu1 %vm2612_vm9, %v2595_v0  ;;  %vm2508_vm8 = vcmp.gt.f32.partialorder %v2476_v14, 0.0 }
 0x217   : > { %vm2511_vm10 = vcmp.gt.f32.partialorder %v2479_v38, 0.0  ;;  %v2543_v5 = vmul.f32 0.1, %v2479_v38  ;;  %v2574_v60 = vsel %vm2510_vm7, %v2478_v50, %v2542_v10 }
 0x218   : > { %vm2509_vm11 = vcmp.gt.f32.partialorder %v2477_v39, 0.0  ;;  %v2541_v3 = vmul.f32 0.1, %v2477_v39  ;;  %v3674_v33 = vpop.f32.mrb[20].mxu0  ;;  %v2572_v22 = vsel %vm2508_vm8, %v2476_v14, %v2540_v15 }
 0x219   : > { %v2575_v46 = vsel %vm2511_vm10, %v2479_v38, %v2543_v5  ;;  %v3738_v12 = vadd.f32 %v3674_v33, %v5060_v1  ;;  %v2374_v25 = vpop.f32.mrb[21].mxu0 }
 0x21a   : > { %v2573_v27 = vsel %vm2509_vm11, %v2477_v39, %v2541_v3  ;;  %v3739_v43 = vadd.f32 %v2374_v25, %v5062_v35  ;;  %v3675_v55 = vpop.f32.mrb[22].mxu0  ;;  %v2597_v53 = vpack.c.bf16 %v2575_v46, %v2574_v60 }
 0x21b   : > { %v2482_v37 = vadd.f32 %v3738_v12, %v5087_v51  ;;  %v3740_v17 = vadd.f32 %v3675_v55, %v5064_v24  ;;  %v2377_v48 = vpop.f32.mrb[23].mxu0  ;;  %v2596_v23 = vpack.c.bf16 %v2573_v27, %v2572_v22 }
 0x21c   : > { %v2480_v41 = vadd.f32 %v3739_v43, %v5087_v51  ;;  %v3741_v2 = vadd.f32 %v2377_v48, %v5066_v30 }
 0x21d   : > { %v2546_v18 = vmul.f32 0.1, %v2482_v37  ;;  %v2483_v1 = vadd.f32 %v3740_v17, %v5087_v51  ;;  %3702 = vmatprep.mubr.msk.bf16.mxu1 %vm2612_vm9, %v2596_v23  ;;  %vm2514_vm12 = vcmp.gt.f32.partialorder %v2482_v37, 0.0 }
 0x21e   : > { %v2544_v21 = vmul.f32 0.1, %v2480_v41  ;;  %v2481_v35 = vadd.f32 %v3741_v2, %v5087_v51  ;;  %3703 = vmatmul.mubr.msk.bf16.gmra.mrb[48].mxu1 %vm2612_vm9, %v2597_v53  ;;  %vm2512_vm13 = vcmp.gt.f32.partialorder %v2480_v41, 0.0 }
 0x21f   : > { %vm2515_vm14 = vcmp.gt.f32.partialorder %v2483_v1, 0.0  ;;  %v2547_v24 = vmul.f32 0.1, %v2483_v1  ;;  %v2578_v54 = vsel %vm2514_vm12, %v2482_v37, %v2546_v18 }
 0x220   : > { %vm2513_vm15 = vcmp.gt.f32.partialorder %v2481_v35, 0.0  ;;  %v2545_v31 = vmul.f32 0.1, %v2481_v35  ;;  %v3678_v8 = vpop.f32.mrb[24].mxu0  ;;  %v2576_v47 = vsel %vm2512_vm13, %v2480_v41, %v2544_v21 }
 0x221   : > { %v2579_v13 = vsel %vm2515_vm14, %v2483_v1, %v2547_v24  ;;  %v3742_v30 = vadd.f32 %v3678_v8, %v5068_v28  ;;  %v2390_v36 = vpop.f32.mrb[25].mxu0 }
 0x222   : > { %v2577_v7 = vsel %vm2513_vm15, %v2481_v35, %v2545_v31  ;;  %v3743_v52 = vadd.f32 %v2390_v36, %v5070_v42  ;;  %v3679_v32 = vpop.f32.mrb[26].mxu0  ;;  %v2599_v40 = vpack.c.bf16 %v2579_v13, %v2578_v54 }
 0x223   : > { %v2486_v44 = vadd.f32 %v3742_v30, %v5087_v51  ;;  %v3744_v63 = vadd.f32 %v3679_v32, %v5072_v56  ;;  %v2393_v20 = vpop.f32.mrb[27].mxu0  ;;  %v2598_v26 = vpack.c.bf16 %v2577_v7, %v2576_v47 }
 0x224   : > { %v2484_v59 = vadd.f32 %v3743_v52, %v5087_v51  ;;  %v3745_v16 = vadd.f32 %v2393_v20, %v5074_v4 }
 0x225   : > { %v2550_v45 = vmul.f32 0.1, %v2486_v44  ;;  %v2487_v28 = vadd.f32 %v3744_v63, %v5087_v51  ;;  %3706 = vmatprep.mubr.msk.bf16.mxu1 %vm2612_vm9, %v2598_v26  ;;  %vm2518_vm0 = vcmp.gt.f32.partialorder %v2486_v44, 0.0 }
 0x226   : > { %v2548_v49 = vmul.f32 0.1, %v2484_v59  ;;  %v2485_v42 = vadd.f32 %v3745_v16, %v5087_v51  ;;  %3707 = vmatmul.mubr.msk.bf16.gmra.mrb[52].mxu1 %vm2612_vm9, %v2599_v40  ;;  %vm2516_vm2 = vcmp.gt.f32.partialorder %v2484_v59, 0.0 }
 0x227   : > { %vm2519_vm3 = vcmp.gt.f32.partialorder %v2487_v28, 0.0  ;;  %v2551_v56 = vmul.f32 0.1, %v2487_v28  ;;  %v2582_v0 = vsel %vm2518_vm0, %v2486_v44, %v2550_v45 }
 0x228   : > { %vm2517_vm4 = vcmp.gt.f32.partialorder %v2485_v42, 0.0  ;;  %v2549_v9 = vmul.f32 0.1, %v2485_v42  ;;  %v3682_v19 = vpop.f32.mrb[28].mxu0  ;;  %v2580_v61 = vsel %vm2516_vm2, %v2484_v59, %v2548_v49 }
 0x229   : > { %v2583_v50 = vsel %vm2519_vm3, %v2487_v28, %v2551_v56  ;;  %v3746_v4 = vadd.f32 %v3682_v19, %v5076_v34  ;;  %v2406_v29 = vpop.f32.mrb[29].mxu0 }
 0x22a   : > { %v2581_v11 = vsel %vm2517_vm4, %v2485_v42, %v2549_v9  ;;  %v3747_v14 = vadd.f32 %v2406_v29, %v5078_v62  ;;  %v3683_v57 = vpop.f32.mrb[30].mxu0  ;;  %v2601_v10 = vpack.c.bf16 %v2583_v50, %v2582_v0 }
 0x22b   : > { %v2490_v38 = vadd.f32 %v3746_v4, %v5087_v51  ;;  %v3748_v15 = vadd.f32 %v3683_v57, %v5080_v6  ;;  %v2409_v39 = vpop.f32.mrb[31].mxu0  ;;  %v2600_v5 = vpack.c.bf16 %v2581_v11, %v2580_v61 }
 0x22c   : > { %v2488_v3 = vadd.f32 %v3747_v14, %v5087_v51  ;;  %v3749_v33 = vadd.f32 %v2409_v39, %v5082_v58 }
 0x22d   : > { %v2554_v60 = vmul.f32 0.1, %v2490_v38  ;;  %v2491_v34 = vadd.f32 %v3748_v15, %v5087_v51  ;;  %3710 = vmatprep.mubr.msk.bf16.mxu1 %vm2612_vm9, %v2600_v5  ;;  %vm2522_vm5 = vcmp.gt.f32.partialorder %v2490_v38, 0.0 }
 0x22e   : > { %v2552_v46 = vmul.f32 0.1, %v2488_v3  ;;  %v2489_v62 = vadd.f32 %v3749_v33, %v5087_v51  ;;  %3711 = vmatmul.mubr.msk.bf16.gmra.mrb[56].mxu1 %vm2612_vm9, %v2601_v10  ;;  %vm2520_vm6 = vcmp.gt.f32.partialorder %v2488_v3, 0.0  ;;  %v5164_v51 = vld [vmem:[%s5275_s4] ss:$0 sm:$0xff] }
 0x22f   : > { %vm2523_vm7 = vcmp.gt.f32.partialorder %v2491_v34, 0.0  ;;  %v2555_v6 = vmul.f32 0.1, %v2491_v34  ;;  %v2586_v25 = vsel %vm2522_vm5, %v2490_v38, %v2554_v60 }
 0x230   : > { %vm2521_vm8 = vcmp.gt.f32.partialorder %v2489_v62, 0.0  ;;  %v2553_v12 = vmul.f32 0.1, %v2489_v62  ;;  %v2584_v58 = vsel %vm2520_vm6, %v2488_v3, %v2552_v46 }
 0x231   : > { %v2587_v22 = vsel %vm2523_vm7, %v2491_v34, %v2555_v6 }
 0x232   : > { %v2585_v27 = vsel %vm2521_vm8, %v2489_v62, %v2553_v12  ;;  %v2603_v43 = vpack.c.bf16 %v2587_v22, %v2586_v25 }
 0x233   : > { %v2602_v55 = vpack.c.bf16 %v2585_v27, %v2584_v58 }
 0x235   : > { %3714 = vmatprep.mubr.msk.bf16.mxu1 %vm2612_vm9, %v2602_v55 }
 0x236   : > { %3715 = vmatmul.mubr.msk.bf16.gmra.mrb[60].mxu1 %vm2612_vm9, %v2603_v43 }
 0x2d1   : > { %v3688_v53 = vpop.f32.mrb[32].mxu1 }
 0x2d2   : > { %v2708_v37 = vadd.f32 %v3688_v53, %v5164_v51  ;;  %v2699_v17 = vpop.f32.mrb[33].mxu1 }
 0x2d3   : > { %v2700_v48 = vadd.f32 %v5164_v51, %v2699_v17  ;;  %v3689_v23 = vpop.f32.mrb[34].mxu1 }
 0x2d4   : > { %vm2828_vm9 = vcmp.gt.f32.partialorder %v2708_v37, 0.0  ;;  %v2860_v41 = vmul.f32 0.1, %v2708_v37  ;;  %v2711_v2 = vadd.f32 %v3689_v23, %v5164_v51  ;;  %v2702_v18 = vpop.f32.mrb[35].mxu1 }
 0x2d5   : > { %vm2826_vm10 = vcmp.gt.f32.partialorder %v2700_v48, 0.0  ;;  %v2858_v1 = vmul.f32 0.1, %v2700_v48  ;;  %v2703_v21 = vadd.f32 %v5164_v51, %v2702_v18 }
 0x2d6   : > { %v2892_v35 = vsel %vm2828_vm9, %v2708_v37, %v2860_v41  ;;  %vm2829_vm11 = vcmp.gt.f32.partialorder %v2711_v2, 0.0  ;;  %v2861_v24 = vmul.f32 0.1, %v2711_v2 }
 0x2d7   : > { %2924 = vst.msk [vmem:[%s5172_s28 + $0x10] sm:$0xff] %vm355_vm1, %v2892_v35  ;;  %v2890_v31 = vsel %vm2826_vm10, %v2700_v48, %v2858_v1  ;;  %vm2827_vm12 = vcmp.gt.f32.partialorder %v2703_v21, 0.0  ;;  %v2859_v8 = vmul.f32 0.1, %v2703_v21 }
 0x2d8   : > { %2922 = vst.msk [vmem:[%s5172_s28] sm:$0xff] %vm355_vm1, %v2890_v31  ;;  %v2893_v54 = vsel %vm2829_vm11, %v2711_v2, %v2861_v24 }
 0x2d9   : > { %2925 = vst.msk [vmem:[%s5172_s28 + $0x18] sm:$0xff] %vm355_vm1, %v2893_v54  ;;  %v2891_v13 = vsel %vm2827_vm12, %v2703_v21, %v2859_v8  ;;  %v3692_v30 = vpop.f32.mrb[36].mxu1 }
 0x2da   : > { %2923 = vst.msk [vmem:[%s5172_s28 + $0x8] sm:$0xff] %vm355_vm1, %v2891_v13  ;;  %v2724_v36 = vadd.f32 %v3692_v30, %v5164_v51  ;;  %v2715_v47 = vpop.f32.mrb[37].mxu1 }
 0x2db   : > { %v2716_v7 = vadd.f32 %v5164_v51, %v2715_v47  ;;  %v3693_v52 = vpop.f32.mrb[38].mxu1 }
 0x2dc   : > { %vm2832_vm13 = vcmp.gt.f32.partialorder %v2724_v36, 0.0  ;;  %v2864_v32 = vmul.f32 0.1, %v2724_v36  ;;  %v2727_v40 = vadd.f32 %v3693_v52, %v5164_v51  ;;  %v2718_v44 = vpop.f32.mrb[39].mxu1 }
 0x2dd   : > { %vm2830_vm14 = vcmp.gt.f32.partialorder %v2716_v7, 0.0  ;;  %v2862_v63 = vmul.f32 0.1, %v2716_v7  ;;  %v2719_v20 = vadd.f32 %v5164_v51, %v2718_v44 }
 0x2de   : > { %v2896_v26 = vsel %vm2832_vm13, %v2724_v36, %v2864_v32  ;;  %vm2833_vm15 = vcmp.gt.f32.partialorder %v2727_v40, 0.0  ;;  %v2865_v59 = vmul.f32 0.1, %v2727_v40 }
 0x2df   : > { %2928 = vst.msk [vmem:[%s5172_s28 + $0x30] sm:$0xff] %vm355_vm1, %v2896_v26  ;;  %v2894_v16 = vsel %vm2830_vm14, %v2716_v7, %v2862_v63  ;;  %vm2831_vm0 = vcmp.gt.f32.partialorder %v2719_v20, 0.0  ;;  %v2863_v45 = vmul.f32 0.1, %v2719_v20 }
 0x2e0   : > { %2926 = vst.msk [vmem:[%s5172_s28 + $0x20] sm:$0xff] %vm355_vm1, %v2894_v16  ;;  %v2897_v28 = vsel %vm2833_vm15, %v2727_v40, %v2865_v59 }
 0x2e1   : > { %2929 = vst.msk [vmem:[%s5172_s28 + $0x38] sm:$0xff] %vm355_vm1, %v2897_v28  ;;  %v2895_v49 = vsel %vm2831_vm0, %v2719_v20, %v2863_v45  ;;  %v3696_v42 = vpop.f32.mrb[40].mxu1 }
 0x2e2   : > { %2927 = vst.msk [vmem:[%s5172_s28 + $0x28] sm:$0xff] %vm355_vm1, %v2895_v49  ;;  %v2740_v56 = vadd.f32 %v3696_v42, %v5164_v51  ;;  %v2731_v9 = vpop.f32.mrb[41].mxu1 }
 0x2e3   : > { %v2732_v19 = vadd.f32 %v5164_v51, %v2731_v9  ;;  %v3697_v0 = vpop.f32.mrb[42].mxu1 }
 0x2e4   : > { %vm2836_vm2 = vcmp.gt.f32.partialorder %v2740_v56, 0.0  ;;  %v2868_v50 = vmul.f32 0.1, %v2740_v56  ;;  %v2743_v4 = vadd.f32 %v3697_v0, %v5164_v51  ;;  %v2734_v29 = vpop.f32.mrb[43].mxu1 }
 0x2e5   : > { %vm2834_vm3 = vcmp.gt.f32.partialorder %v2732_v19, 0.0  ;;  %v2866_v61 = vmul.f32 0.1, %v2732_v19  ;;  %v2735_v11 = vadd.f32 %v5164_v51, %v2734_v29 }
 0x2e6   : > { %v2900_v14 = vsel %vm2836_vm2, %v2740_v56, %v2868_v50  ;;  %vm2837_vm4 = vcmp.gt.f32.partialorder %v2743_v4, 0.0  ;;  %v2869_v57 = vmul.f32 0.1, %v2743_v4 }
 0x2e7   : > { %2932 = vst.msk [vmem:[%s5172_s28 + $0x50] sm:$0xff] %vm355_vm1, %v2900_v14  ;;  %v2898_v10 = vsel %vm2834_vm3, %v2732_v19, %v2866_v61  ;;  %vm2835_vm5 = vcmp.gt.f32.partialorder %v2735_v11, 0.0  ;;  %v2867_v38 = vmul.f32 0.1, %v2735_v11 }
 0x2e8   : > { %2930 = vst.msk [vmem:[%s5172_s28 + $0x40] sm:$0xff] %vm355_vm1, %v2898_v10  ;;  %v2901_v15 = vsel %vm2837_vm4, %v2743_v4, %v2869_v57 }
 0x2e9   : > { %2933 = vst.msk [vmem:[%s5172_s28 + $0x58] sm:$0xff] %vm355_vm1, %v2901_v15  ;;  %v2899_v39 = vsel %vm2835_vm5, %v2735_v11, %v2867_v38  ;;  %v3700_v5 = vpop.f32.mrb[44].mxu1 }
 0x2ea   : > { %2931 = vst.msk [vmem:[%s5172_s28 + $0x48] sm:$0xff] %vm355_vm1, %v2899_v39  ;;  %v2756_v3 = vadd.f32 %v3700_v5, %v5164_v51  ;;  %v2747_v33 = vpop.f32.mrb[45].mxu1 }
 0x2eb   : > { %v2748_v60 = vadd.f32 %v5164_v51, %v2747_v33  ;;  %v3701_v34 = vpop.f32.mrb[46].mxu1 }
 0x2ec   : > { %vm2840_vm6 = vcmp.gt.f32.partialorder %v2756_v3, 0.0  ;;  %v2872_v46 = vmul.f32 0.1, %v2756_v3  ;;  %v2759_v62 = vadd.f32 %v3701_v34, %v5164_v51  ;;  %v2750_v6 = vpop.f32.mrb[47].mxu1 }
 0x2ed   : > { %vm2838_vm7 = vcmp.gt.f32.partialorder %v2748_v60, 0.0  ;;  %v2870_v12 = vmul.f32 0.1, %v2748_v60  ;;  %v2751_v25 = vadd.f32 %v5164_v51, %v2750_v6 }
 0x2ee   : > { %v2904_v22 = vsel %vm2840_vm6, %v2756_v3, %v2872_v46  ;;  %vm2841_vm8 = vcmp.gt.f32.partialorder %v2759_v62, 0.0  ;;  %v2873_v58 = vmul.f32 0.1, %v2759_v62 }
 0x2ef   : > { %2936 = vst.msk [vmem:[%s5172_s28 + $0x70] sm:$0xff] %vm355_vm1, %v2904_v22  ;;  %v2902_v27 = vsel %vm2838_vm7, %v2748_v60, %v2870_v12  ;;  %vm2839_vm9 = vcmp.gt.f32.partialorder %v2751_v25, 0.0  ;;  %v2871_v43 = vmul.f32 0.1, %v2751_v25 }
 0x2f0   : > { %2934 = vst.msk [vmem:[%s5172_s28 + $0x60] sm:$0xff] %vm355_vm1, %v2902_v27  ;;  %v2905_v55 = vsel %vm2841_vm8, %v2759_v62, %v2873_v58 }
 0x2f1   : > { %2937 = vst.msk [vmem:[%s5172_s28 + $0x78] sm:$0xff] %vm355_vm1, %v2905_v55  ;;  %v2903_v53 = vsel %vm2839_vm9, %v2751_v25, %v2871_v43  ;;  %v3704_v37 = vpop.f32.mrb[48].mxu1 }
 0x2f2   : > { %2935 = vst.msk [vmem:[%s5172_s28 + $0x68] sm:$0xff] %vm355_vm1, %v2903_v53  ;;  %v2772_v17 = vadd.f32 %v3704_v37, %v5164_v51  ;;  %v2763_v48 = vpop.f32.mrb[49].mxu1 }
 0x2f3   : > { %v2764_v23 = vadd.f32 %v5164_v51, %v2763_v48  ;;  %v3705_v41 = vpop.f32.mrb[50].mxu1 }
 0x2f4   : > { %vm2844_vm10 = vcmp.gt.f32.partialorder %v2772_v17, 0.0  ;;  %v2876_v2 = vmul.f32 0.1, %v2772_v17  ;;  %v2775_v18 = vadd.f32 %v3705_v41, %v5164_v51  ;;  %v2766_v1 = vpop.f32.mrb[51].mxu1 }
 0x2f5   : > { %vm2842_vm11 = vcmp.gt.f32.partialorder %v2764_v23, 0.0  ;;  %v2874_v21 = vmul.f32 0.1, %v2764_v23  ;;  %v2767_v35 = vadd.f32 %v5164_v51, %v2766_v1 }
 0x2f6   : > { %v2908_v24 = vsel %vm2844_vm10, %v2772_v17, %v2876_v2  ;;  %vm2845_vm12 = vcmp.gt.f32.partialorder %v2775_v18, 0.0  ;;  %v2877_v31 = vmul.f32 0.1, %v2775_v18 }
 0x2f7   : > { %2940 = vst.msk [vmem:[%s5172_s28 + $0x90] sm:$0xff] %vm355_vm1, %v2908_v24  ;;  %v2906_v8 = vsel %vm2842_vm11, %v2764_v23, %v2874_v21  ;;  %vm2843_vm13 = vcmp.gt.f32.partialorder %v2767_v35, 0.0  ;;  %v2875_v54 = vmul.f32 0.1, %v2767_v35 }
 0x2f8   : > { %2938 = vst.msk [vmem:[%s5172_s28 + $0x80] sm:$0xff] %vm355_vm1, %v2906_v8  ;;  %v2909_v13 = vsel %vm2845_vm12, %v2775_v18, %v2877_v31 }
 0x2f9   : > { %2941 = vst.msk [vmem:[%s5172_s28 + $0x98] sm:$0xff] %vm355_vm1, %v2909_v13  ;;  %v2907_v30 = vsel %vm2843_vm13, %v2767_v35, %v2875_v54  ;;  %v3708_v36 = vpop.f32.mrb[52].mxu1 }
 0x2fa   : > { %2939 = vst.msk [vmem:[%s5172_s28 + $0x88] sm:$0xff] %vm355_vm1, %v2907_v30  ;;  %v2788_v47 = vadd.f32 %v3708_v36, %v5164_v51  ;;  %v2779_v7 = vpop.f32.mrb[53].mxu1 }
 0x2fb   : > { %v2780_v52 = vadd.f32 %v5164_v51, %v2779_v7  ;;  %v3709_v32 = vpop.f32.mrb[54].mxu1 }
 0x2fc   : > { %vm2848_vm14 = vcmp.gt.f32.partialorder %v2788_v47, 0.0  ;;  %v2880_v40 = vmul.f32 0.1, %v2788_v47  ;;  %v2791_v44 = vadd.f32 %v3709_v32, %v5164_v51  ;;  %v2782_v63 = vpop.f32.mrb[55].mxu1 }
 0x2fd   : > { %vm2846_vm15 = vcmp.gt.f32.partialorder %v2780_v52, 0.0  ;;  %v2878_v20 = vmul.f32 0.1, %v2780_v52  ;;  %v2783_v26 = vadd.f32 %v5164_v51, %v2782_v63 }
 0x2fe   : > { %v2912_v59 = vsel %vm2848_vm14, %v2788_v47, %v2880_v40  ;;  %vm2849_vm0 = vcmp.gt.f32.partialorder %v2791_v44, 0.0  ;;  %v2881_v16 = vmul.f32 0.1, %v2791_v44 }
 0x2ff   : > { %2944 = vst.msk [vmem:[%s5172_s28 + $0xb0] sm:$0xff] %vm355_vm1, %v2912_v59  ;;  %v2910_v45 = vsel %vm2846_vm15, %v2780_v52, %v2878_v20  ;;  %vm2847_vm2 = vcmp.gt.f32.partialorder %v2783_v26, 0.0  ;;  %v2879_v28 = vmul.f32 0.1, %v2783_v26 }
 0x300   : > { %2942 = vst.msk [vmem:[%s5172_s28 + $0xa0] sm:$0xff] %vm355_vm1, %v2910_v45  ;;  %v2913_v49 = vsel %vm2849_vm0, %v2791_v44, %v2881_v16 }
 0x301   : > { %2945 = vst.msk [vmem:[%s5172_s28 + $0xb8] sm:$0xff] %vm355_vm1, %v2913_v49  ;;  %v2911_v42 = vsel %vm2847_vm2, %v2783_v26, %v2879_v28  ;;  %v3712_v56 = vpop.f32.mrb[56].mxu1 }
 0x302   : > { %2943 = vst.msk [vmem:[%s5172_s28 + $0xa8] sm:$0xff] %vm355_vm1, %v2911_v42  ;;  %v2804_v9 = vadd.f32 %v3712_v56, %v5164_v51  ;;  %v2795_v19 = vpop.f32.mrb[57].mxu1 }
 0x303   : > { %v2796_v0 = vadd.f32 %v5164_v51, %v2795_v19  ;;  %v3713_v50 = vpop.f32.mrb[58].mxu1 }
 0x304   : > { %vm2852_vm3 = vcmp.gt.f32.partialorder %v2804_v9, 0.0  ;;  %v2884_v4 = vmul.f32 0.1, %v2804_v9  ;;  %v2807_v29 = vadd.f32 %v3713_v50, %v5164_v51  ;;  %v2798_v61 = vpop.f32.mrb[59].mxu1 }
 0x305   : > { %vm2850_vm4 = vcmp.gt.f32.partialorder %v2796_v0, 0.0  ;;  %v2882_v11 = vmul.f32 0.1, %v2796_v0  ;;  %v2799_v14 = vadd.f32 %v5164_v51, %v2798_v61 }
 0x306   : > { %v2916_v57 = vsel %vm2852_vm3, %v2804_v9, %v2884_v4  ;;  %vm2853_vm5 = vcmp.gt.f32.partialorder %v2807_v29, 0.0  ;;  %v2885_v10 = vmul.f32 0.1, %v2807_v29 }
 0x307   : > { %2948 = vst.msk [vmem:[%s5172_s28 + $0xd0] sm:$0xff] %vm355_vm1, %v2916_v57  ;;  %v2914_v38 = vsel %vm2850_vm4, %v2796_v0, %v2882_v11  ;;  %vm2851_vm6 = vcmp.gt.f32.partialorder %v2799_v14, 0.0  ;;  %v2883_v15 = vmul.f32 0.1, %v2799_v14 }
 0x308   : > { %2946 = vst.msk [vmem:[%s5172_s28 + $0xc0] sm:$0xff] %vm355_vm1, %v2914_v38  ;;  %v2917_v39 = vsel %vm2853_vm5, %v2807_v29, %v2885_v10 }
 0x309   : > { %2949 = vst.msk [vmem:[%s5172_s28 + $0xd8] sm:$0xff] %vm355_vm1, %v2917_v39  ;;  %v2915_v5 = vsel %vm2851_vm6, %v2799_v14, %v2883_v15  ;;  %v3716_v3 = vpop.f32.mrb[60].mxu1 }
 0x30a   : > { %2947 = vst.msk [vmem:[%s5172_s28 + $0xc8] sm:$0xff] %vm355_vm1, %v2915_v5  ;;  %v2820_v33 = vadd.f32 %v3716_v3, %v5164_v51  ;;  %v2811_v60 = vpop.f32.mrb[61].mxu1 }
 0x30b   : > { %v2812_v34 = vadd.f32 %v5164_v51, %v2811_v60  ;;  %v3717_v46 = vpop.f32.mrb[62].mxu1 }
 0x30c   : > { %vm2856_vm7 = vcmp.gt.f32.partialorder %v2820_v33, 0.0  ;;  %v2888_v62 = vmul.f32 0.1, %v2820_v33  ;;  %v2823_v6 = vadd.f32 %v3717_v46, %v5164_v51  ;;  %v2814_v12 = vpop.f32.mrb[63].mxu1 }
 0x30d   : > { %vm2854_vm8 = vcmp.gt.f32.partialorder %v2812_v34, 0.0  ;;  %v2886_v25 = vmul.f32 0.1, %v2812_v34  ;;  %v2815_v22 = vadd.f32 %v5164_v51, %v2814_v12 }
 0x30e   : > { %v2920_v58 = vsel %vm2856_vm7, %v2820_v33, %v2888_v62  ;;  %vm2857_vm9 = vcmp.gt.f32.partialorder %v2823_v6, 0.0  ;;  %v2889_v27 = vmul.f32 0.1, %v2823_v6 }
 0x30f   : > { %2952 = vst.msk [vmem:[%s5172_s28 + $0xf0] sm:$0xff] %vm355_vm1, %v2920_v58  ;;  %v2918_v43 = vsel %vm2854_vm8, %v2812_v34, %v2886_v25  ;;  %vm2855_vm10 = vcmp.gt.f32.partialorder %v2815_v22, 0.0  ;;  %v2887_v55 = vmul.f32 0.1, %v2815_v22 }
 0x310   : > { %2950 = vst.msk [vmem:[%s5172_s28 + $0xe0] sm:$0xff] %vm355_vm1, %v2918_v43  ;;  %v2921_v53 = vsel %vm2857_vm9, %v2823_v6, %v2889_v27 }
 0x311   : > { %2953 = vst.msk [vmem:[%s5172_s28 + $0xf8] sm:$0xff] %vm355_vm1, %v2921_v53  ;;  %v2919_v37 = vsel %vm2855_vm10, %v2815_v22, %v2887_v55 }
 0x312   : > { %2951 = vst.msk [vmem:[%s5172_s28 + $0xe8] sm:$0xff] %vm355_vm1, %v2919_v37 }
 0x313 PF: > { %s15_s18 = sadd.s32 1, %s4035_s18  }
 0x314   : > { %p12_p4 = scmp.ge.s32.totalorder %s15_s18, 4  }
 0x316   :  { %14 = sbr.rel (!%p12_p4) target bundleno = 1 (0x1), region = 78 }

// kernel: upsample_block_forward.6
= control target key start
LH: loop header
LB: loop body
LE: loop exit
PB: predicated region body
PF: predicated region fallthrough
CT: control target
= control target key end

     0   :  { %s4260_s18 = smov 0   ;;  %s5464_s0 = inlined_call_operand.vmem [shape: bf16[2,18,32,4], index: 0, kind: input, shape index: {}]   ;;  %s5465_s1 = inlined_call_operand.vmem [shape: bf16[3,3,4,8], index: 1, kind: input, shape index: {}]   ;;  %s5466_s2 = inlined_call_operand.vmem [shape: f32[1,1,8], index: 2, kind: input, shape index: {}]   ;;  %s5467_s3 = inlined_call_operand.vmem [shape: bf16[8,4], index: 3, kind: input, shape index: {}]   ;;  %s5468_s4 = inlined_call_operand.vmem [shape: f32[1,1,4], index: 4, kind: input, shape index: {}]   ;;  %s5469_s5 = inlined_call_operand.vmem [shape: bf16[2,16,16,4], index: 5, kind: output, shape index: {}]  }
   0x1 LB: > { %s3138_s19 = sadd.s32 4294967295, %s4228_s18   ;;  %p3142_p0 = scmp.ge.s32.totalorder %s4228_s18, 1  ;;  %s4228_s18 = sphi %s4260_s18, %s15_s18  }
   0x2   : > { %p187_p1 = scmp.lt.s32.totalorder %s4228_s18, 3 }
   0x4   : > { %p188_p2 = pnand %p3142_p0, %p187_p1 }
   0x6   : > { %191 = sbr.rel (%p188_p2) target bundleno = 789 (0x315), region = 40 }
   0xd   : > { %v3164_v0 = vld [vmem:[%s5465_s1 + $0x6] sm:$0x3]  ;;  %vm404_vm0 = vcmask 1041408   ;;  %p215_p3 = scmp.lt.s32.totalorder %s3138_s19, 1  ;;  %v991_v1 = vlaneseq  ;;  %v3231_v3 = vld [vmem:[%s5465_s1 + $0x8] sm:$0x3] }
   0xe   : > { %4167 = vmatprep.subr.msk.bf16.mxu1 %vm404_vm0, %v3164_v0  ;;  %v406_v2 = vsel %vm404_vm0, %v3164_v0, 0  ;;  %v3248_v4 = vld [vmem:[%s5465_s1 + $0xe] sm:$0x3]  ;;  %4171 = vmatprep.subr.msk.bf16.mxu0 %vm404_vm0, %v3231_v3  ;;  %v1300_v5 = vsel %vm404_vm0, %v3231_v3, 0  ;;  %v352_v6 = vld [vmem:[%s5465_s1] sm:$0x3] }
   0xf   : > { %3572 = vmatpush3.bf16.msra.mxu1 %v406_v2  ;;  %s5620_s19 = smov (!%p215_p3, %s3138_s19), 1  ;;  %v4286_v7 = vshrl.u32 %v991_v1, 7  ;;  %3708 = vmatpush3.bf16.msra.mxu0 %v1300_v5  ;;  %vm355_vm1 = vcmask 31744   ;;  %v573_v8 = vsel %vm404_vm0, %v352_v6, 0  ;;  %v4317_v18 = vld [vmem:[%s5465_s1 + $0xc] sm:$0x3] }
  0x10   : > { %4168 = vmatprep.subr.msk.bf16.mxu1 %vm404_vm0, %v352_v6  ;;  %s4177_s28 = smul.u32 288, %s5620_s19  ;;  %4172 = vmatprep.subr.msk.bf16.mxu0 %vm404_vm0, %v3248_v4  ;;  %v1501_v44 = vsel %vm404_vm0, %v3248_v4, 0  ;;  %v4379_v49 = vld [vmem:[%s5465_s1 + $0x4] sm:$0x3]  ;;  %vm2661_vm4 = vcmask 1043456   ;;  %vm2612_vm9 = vcmask 64512  }
  0x11   : > { %vm1750_vm2 = vcmp.lt.s32.totalorder %v4286_v7, 6  ;;  %vm993_vm3 = vcmp.lt.s32.totalorder %v4286_v7, 7  ;;  %5542 = vst [vmem:[#allocation8_spill] sm:$0xff] %v4379_v49  ;;  %s3368_s25 = sshll.u32 %s5620_s19, 7 }
  0x12   : > { %s4294_s6 = scalar_lea.vmem %s5464_s0, %s4177_s28  ;;  %s5367_s28 = scalar_lea.vmem %s5469_s5, %s3368_s25 }
  0x13   : > { %v4298_v9 = vld [vmem:[%s4294_s6 + $0x10] sm:$0xff]   ;;  %v4302_v10 = vld [vmem:[%s4294_s6 + $0x20] sm:$0xff]   ;;  %v4305_v11 = vld [vmem:[%s4294_s6 + $0x18] ss:$16 sps:$4 sm:$0xff]  }
  0x14   : > { %5536 = vst [vmem:[#allocation2_spill] sm:$0xff] %v4302_v10  ;;  %v283_v12 = vunpack.c.l.bf16 %v4298_v9  ;;  %v284_v13 = vunpack.c.h.bf16 %v4298_v9  ;;  %v286_v14 = vunpack.c.l.bf16 %v4302_v10  ;;  %v287_v15 = vunpack.c.h.bf16 %v4302_v10  ;;  %3573 = vmatprep.mubr.msk.bf16.mxu1 %vm355_vm1, %v4298_v9  ;;  %v4322_v23 = vld [vmem:[%s4294_s6 + $0x30] sm:$0xff]   ;;  %v4331_v26 = vld [vmem:[%s4294_s6 + $0x40] sm:$0xff]   ;;  %v4357_v41 = vld [vmem:[%s4294_s6 + $0x38] ss:$16 sps:$4 sm:$0xff]  }
  0x15   : > { %v285_v16 = vunpack.c.l.bf16 %v4305_v11  ;;  %v5477_v17 = vunpack.c.h.bf16 %v4305_v11  ;;  %5537 = vst [vmem:[#allocation3_spill] sm:$0xff] %v4322_v23  ;;  %3574 = vmatmul.mubr.msk.bf16.vlgmr.msra.gmra.mrb[0].mxu1 %vm355_vm1, %v4302_v10  ;;  %5538 = vst [vmem:[#allocation4_spill] sm:$0xff] %v4331_v26  ;;  %v289_v33 = vunpack.c.l.bf16 %v4322_v23  ;;  %v290_v34 = vunpack.c.h.bf16 %v4322_v23  ;;  %v4360_v42 = vld [vmem:[%s4294_s6 + $0x50] sm:$0xff]   ;;  %v4387_v53 = vld [vmem:[%s4294_s6 + $0x60] sm:$0xff]  }
  0x16   : > { %v938_v19 = vrot.slane %v283_v12, 1  ;;  %v956_v20 = vrot.slane %v284_v13, 1  ;;  %v1697_v21 = vrot.slane %v283_v12, 2  ;;  %v1715_v22 = vrot.slane %v284_v13, 2  ;;  %3606 = vmatpush3.bf16.msra.mxu1 %v573_v8  ;;  %5541 = vst [vmem:[#allocation7_spill] sm:$0xff] %v4360_v42  ;;  %3577 = vmatprep.mubr.msk.bf16.mxu1 %vm355_vm1, %v4322_v23  ;;  %5543 = vst [vmem:[#allocation9_spill] sm:$0xff] %v4387_v53 }
  0x17   : > { %v939_v24 = vrot.slane %v286_v14, 1  ;;  %v957_v25 = vrot.slane %v287_v15, 1  ;;  %v974_v28 = vrot.slane %v285_v16, 1  ;;  %v1733_v30 = vrot.slane %v285_v16, 2  ;;  %4169 = vmatprep.subr.msk.bf16.mxu1 %vm404_vm0, %v4317_v18  ;;  %v4410_v62 = vld [vmem:[%s4294_s6 + $0x58] ss:$16 sps:$4 sm:$0xff]  }
  0x18   : > { %v1770_v27 = vsel %vm1750_vm2, %v1697_v21, %v1715_v22  ;;  %v1013_v29 = vsel %vm993_vm3, %v938_v19, %v956_v20  ;;  %v975_v31 = vrot.slane %v5477_v17, 1  ;;  %v292_v37 = vunpack.c.l.bf16 %v4331_v26  ;;  %v4420_v3 = vld [vmem:[%s4294_s6 + $0x70] sm:$0xff]   ;;  %v4429_v8 = vld [vmem:[%s4294_s6 + $0x80] sm:$0xff]   ;;  %v4726_v10 = vld [vmem:[%s4294_s6 + $0x8] ss:$272 sps:$4 sm:$0xff]  }
  0x19   : > { %v1014_v32 = vsel %vm993_vm3, %v939_v24, %v957_v25  ;;  %v995_v35 = vsel %vm993_vm3, %v956_v20, %v974_v28  ;;  %v1752_v36 = vsel %vm1750_vm2, %v1715_v22, %v1733_v30  ;;  %v940_v45 = vrot.slane %v289_v33, 1  ;;  %5544 = vst [vmem:[#allocation10_spill] sm:$0xff] %v4420_v3  ;;  %5547 = vst [vmem:[#allocation13_spill] sm:$0xff] %v4429_v8 }
  0x1a   : > { %v4350_v38 = vpack.c.bf16 %v995_v35, %v1013_v29  ;;  %v4352_v39 = vpack.c.bf16 %v1752_v36, %v1770_v27  ;;  %v996_v40 = vsel %vm993_vm3, %v957_v25, %v975_v31  ;;  %v958_v46 = vrot.slane %v290_v34, 1  ;;  %v4452_v29 = vld [vmem:[%s4294_s6 + $0x78] ss:$16 sps:$4 sm:$0xff]   ;;  %5566 = vst [vmem:[#allocation27_spill] sm:$0xff] %v4726_v10 }
  0x1b   : > { %v4362_v43 = vpack.c.bf16 %v996_v40, %v1014_v32  ;;  %v293_v47 = vunpack.c.h.bf16 %v4331_v26  ;;  %v941_v48 = vrot.slane %v292_v37, 1  ;;  %v5476_v50 = vunpack.c.l.bf16 %v4357_v41  ;;  %v4471_v40 = vld [vmem:[%s4294_s6 + $0x90] sm:$0xff]  }
  0x1c   : > { %5539 = vst [vmem:[#allocation5_spill] sm:$0xff] %v4350_v38  ;;  %5540 = vst [vmem:[#allocation6_spill] sm:$0xff] %v4352_v39  ;;  %3709 = vmatprep.mubr.msk.bf16.mxu0 %vm355_vm1, %v4350_v38  ;;  %v5475_v51 = vunpack.c.h.bf16 %v4357_v41  ;;  %v295_v52 = vunpack.c.l.bf16 %v4360_v42  ;;  %v296_v55 = vunpack.c.h.bf16 %v4360_v42  ;;  %v1015_v57 = vsel %vm993_vm3, %v940_v45, %v958_v46 }
  0x1d   : > { %3710 = vmatmul.mubr.msk.bf16.vlgmr.msra.gmra.mrb[0].mxu0 %vm355_vm1, %v4362_v43  ;;  %3578 = vmatmul.mubr.msk.bf16.gmra.mrb[4].mxu1 %vm355_vm1, %v4331_v26  ;;  %v959_v54 = vrot.slane %v293_v47, 1  ;;  %v976_v56 = vrot.slane %v5476_v50, 1  ;;  %v298_v61 = vunpack.c.l.bf16 %v4387_v53  ;;  %v299_v2 = vunpack.c.h.bf16 %v4387_v53  ;;  %5549 = vst [vmem:[#allocation15_spill] sm:$0xff] %v4471_v40  ;;  %v4585_v50 = vld [vmem:[%s4294_s6 + $0xd0] sm:$0xff]  }
  0x1e   : > { %3742 = vmatpush3.bf16.msra.mxu0 %v1501_v44  ;;  %v977_v58 = vrot.slane %v5475_v51, 1  ;;  %3581 = vmatprep.mubr.msk.bf16.mxu1 %vm355_vm1, %v4360_v42  ;;  %v942_v60 = vrot.slane %v295_v52, 1  ;;  %v960_v1 = vrot.slane %v296_v55, 1  ;;  %v5473_v13 = vunpack.c.l.bf16 %v4410_v62  ;;  %5557 = vst [vmem:[#allocation23_spill] sm:$0xff] %v4585_v50 }
  0x1f   : > { %4173 = vmatprep.subr.msk.bf16.mxu0 %vm404_vm0, %v4379_v49  ;;  %v1016_v59 = vsel %vm993_vm3, %v941_v48, %v959_v54  ;;  %v997_v63 = vsel %vm993_vm3, %v958_v46, %v976_v56  ;;  %v943_v6 = vrot.slane %v298_v61, 1  ;;  %v961_v12 = vrot.slane %v299_v2, 1  ;;  %v4491_v56 = vld [vmem:[%s4294_s6 + $0xa0] sm:$0xff]  }
  0x20   : > { %v998_v0 = vsel %vm993_vm3, %v959_v54, %v977_v58  ;;  %v4422_v4 = vpack.c.bf16 %v997_v63, %v1015_v57  ;;  %v5472_v16 = vunpack.c.h.bf16 %v4410_v62  ;;  %v301_v19 = vunpack.c.l.bf16 %v4420_v3  ;;  %5552 = vst [vmem:[#allocation18_spill] sm:$0xff] %v4491_v56 }
  0x21   : > { %v4424_v5 = vpack.c.bf16 %v998_v0, %v1016_v59  ;;  %v302_v20 = vunpack.c.h.bf16 %v4420_v3  ;;  %v978_v21 = vrot.slane %v5473_v13, 1  ;;  %v1017_v22 = vsel %vm993_vm3, %v942_v60, %v960_v1 }
  0x22   : > { %5545 = vst [vmem:[#allocation11_spill] sm:$0xff] %v4422_v4  ;;  %3713 = vmatprep.mubr.msk.bf16.mxu0 %vm355_vm1, %v4422_v4  ;;  %v304_v24 = vunpack.c.l.bf16 %v4429_v8  ;;  %v979_v25 = vrot.slane %v5472_v16, 1  ;;  %v1018_v27 = vsel %vm993_vm3, %v943_v6, %v961_v12  ;;  %v5478_v28 = vunpack.c.h.bf16 %v4429_v8  ;;  %v4696_v4 = vld [vmem:[%s4294_s6] sm:$0xff]  }
  0x23   : > { %5546 = vst [vmem:[#allocation12_spill] sm:$0xff] %v4424_v5  ;;  %v4456_v30 = vsel %vm404_vm0, %v4317_v18, 0  ;;  %v4460_v31 = vrot.slane %v286_v14, 2  ;;  %v999_v32 = vsel %vm993_vm3, %v960_v1, %v978_v21  ;;  %v944_v35 = vrot.slane %v301_v19, 1 }
  0x24   : > { %5548 = vst [vmem:[#allocation14_spill] sm:$0xff] %v4456_v30  ;;  %v962_v36 = vrot.slane %v302_v20, 1  ;;  %v4475_v18 = vrot.slane %v287_v15, 2  ;;  %v4479_v14 = vrot.slane %v289_v33, 2  ;;  %v4481_v44 = vpack.c.bf16 %v999_v32, %v1017_v22 }
  0x25   : > { %3714 = vmatmul.mubr.msk.bf16.gmra.mrb[4].mxu0 %vm355_vm1, %v4424_v5  ;;  %3582 = vmatmul.mubr.msk.bf16.gmra.mrb[8].mxu1 %vm355_vm1, %v4387_v53  ;;  %v1000_v45 = vsel %vm993_vm3, %v961_v12, %v979_v25  ;;  %v945_v48 = vrot.slane %v304_v24, 1  ;;  %v5471_v54 = vunpack.c.l.bf16 %v4452_v29  ;;  %v963_v15 = vrot.slane %v5478_v28, 1  ;;  %v4520_v12 = vld [vmem:[%s4294_s6 + $0x98] ss:$16 sps:$4 sm:$0xff]  }
  0x26   : > { %3585 = vmatprep.mubr.msk.bf16.mxu1 %vm355_vm1, %v4420_v3  ;;  %5550 = vst [vmem:[#allocation16_spill] sm:$0xff] %v4481_v44  ;;  %v4485_v46 = vpack.c.bf16 %v1000_v45, %v1018_v27  ;;  %3717 = vmatprep.mubr.msk.bf16.mxu0 %vm355_vm1, %v4481_v44  ;;  %v5470_v33 = vunpack.c.h.bf16 %v4452_v29  ;;  %v307_v57 = vunpack.c.l.bf16 %v4471_v40  ;;  %v308_v58 = vunpack.c.h.bf16 %v4471_v40  ;;  %v4528_v27 = vld [vmem:[%s4294_s6 + $0xb0] sm:$0xff]  }
  0x27   : > { %v4502_v59 = vrot.slane %v290_v34, 2  ;;  %v980_v60 = vrot.slane %v5471_v54, 1  ;;  %v1019_v63 = vsel %vm993_vm3, %v944_v35, %v962_v36  ;;  %v4510_v0 = vrot.slane %v292_v37, 2  ;;  %5553 = vst [vmem:[#allocation19_spill] sm:$0xff] %v4528_v27  ;;  %v4567_v54 = vld [vmem:[%s4294_s6 + $0xc0] sm:$0xff]  }
  0x28   : > { %5551 = vst [vmem:[#allocation17_spill] sm:$0xff] %v4485_v46  ;;  %v4514_v1 = vrot.slane %v293_v47, 2  ;;  %v981_v6 = vrot.slane %v5470_v33, 1  ;;  %v310_v34 = vunpack.c.l.bf16 %v4491_v56  ;;  %v946_v22 = vrot.slane %v307_v57, 1  ;;  %5556 = vst [vmem:[#allocation22_spill] sm:$0xff] %v4567_v54 }
  0x29   : > { %v1001_v21 = vsel %vm993_vm3, %v962_v36, %v980_v60  ;;  %v964_v37 = vrot.slane %v308_v58, 1  ;;  %v311_v25 = vunpack.c.h.bf16 %v4491_v56  ;;  %v4532_v47 = vrot.slane %v295_v52, 2 }
  0x2a   : > { %v4536_v32 = vpack.c.bf16 %v1001_v21, %v1019_v63  ;;  %v1002_v35 = vsel %vm993_vm3, %v963_v15, %v981_v6  ;;  %v1020_v36 = vsel %vm993_vm3, %v945_v48, %v963_v15  ;;  %v4544_v45 = vrot.slane %v296_v55, 2 }
  0x2b   : > { %v4548_v52 = vrot.slane %v298_v61, 2  ;;  %v4550_v60 = vrot.slane %v299_v2, 2  ;;  %v5474_v63 = vunpack.c.l.bf16 %v4520_v12  ;;  %v947_v48 = vrot.slane %v310_v34, 1 }
  0x2c   : > { %5554 = vst [vmem:[#allocation20_spill] sm:$0xff] %v4536_v32  ;;  %v5479_v55 = vunpack.c.h.bf16 %v4520_v12  ;;  %v313_v15 = vunpack.c.l.bf16 %v4528_v27  ;;  %v314_v61 = vunpack.c.h.bf16 %v4528_v27  ;;  %v4560_v6 = vpack.c.bf16 %v1002_v35, %v1020_v36  ;;  %v4580_v36 = vld [vmem:[%s4294_s6 + $0xb8] ss:$16 sps:$4 sm:$0xff]  }
  0x2d   : > { %3718 = vmatmul.mubr.msk.bf16.gmra.mrb[8].mxu0 %vm355_vm1, %v4485_v46  ;;  %3586 = vmatmul.mubr.msk.bf16.gmra.mrb[12].mxu1 %vm355_vm1, %v4429_v8  ;;  %v965_v2 = vrot.slane %v311_v25, 1  ;;  %v982_v21 = vrot.slane %v5474_v63, 1  ;;  %v1021_v33 = vsel %vm993_vm3, %v946_v22, %v964_v37  ;;  %v4571_v16 = vrot.slane %v301_v19, 2  ;;  %v4644_v46 = vld [vmem:[%s4294_s6 + $0xf0] sm:$0xff]  }
  0x2e   : > { %3589 = vmatprep.mubr.msk.bf16.mxu1 %vm355_vm1, %v4471_v40  ;;  %3721 = vmatprep.mubr.msk.bf16.mxu0 %vm355_vm1, %v4536_v32  ;;  %5555 = vst [vmem:[#allocation21_spill] sm:$0xff] %v4560_v6  ;;  %v4575_v13 = vrot.slane %v302_v20, 2  ;;  %v983_v35 = vrot.slane %v5479_v55, 1  ;;  %v948_v22 = vrot.slane %v313_v15, 1  ;;  %v966_v51 = vrot.slane %v314_v61, 1 }
  0x2f   : > { %v1003_v63 = vsel %vm993_vm3, %v964_v37, %v982_v21  ;;  %v4589_v19 = vrot.slane %v304_v24, 2  ;;  %v316_v20 = vunpack.c.l.bf16 %v4567_v54  ;;  %v317_v28 = vunpack.c.h.bf16 %v4567_v54 }
  0x30   : > { %v4591_v17 = vpack.c.bf16 %v1003_v63, %v1021_v33  ;;  %v5559_v55 = vunpack.c.h.bf16 %v4429_v8  ;;  %v4601_v37 = vrot.slane %v307_v57, 2  ;;  %v1022_v21 = vsel %vm993_vm3, %v947_v48, %v965_v2  ;;  %v4607_v33 = vld [vmem:[%s4294_s6 + $0xe0] sm:$0xff]  }
  0x31   : > { %v1004_v63 = vsel %vm993_vm3, %v965_v2, %v983_v35  ;;  %v320_v48 = vunpack.c.h.bf16 %v4585_v50  ;;  %v4618_v39 = vrot.slane %v308_v58, 2  ;;  %v4620_v24 = vrot.slane %v310_v34, 2  ;;  %v4631_v58 = vld [vmem:[%s4294_s6 + $0xd8] ss:$16 sps:$4 sm:$0xff]  }
  0x32   : > { %5558 = vst [vmem:[#allocation24_spill] sm:$0xff] %v4591_v17  ;;  %v4597_v38 = vrot.slane %v5559_v55, 2  ;;  %v319_v55 = vunpack.c.l.bf16 %v4585_v50  ;;  %v1023_v2 = vsel %vm993_vm3, %v948_v22, %v966_v51  ;;  %v949_v35 = vrot.slane %v316_v20, 1 }
  0x33   : > { %v967_v57 = vrot.slane %v317_v28, 1  ;;  %v323_v8 = vunpack.c.h.bf16 %v4607_v33  ;;  %v4633_v34 = vrot.slane %v311_v25, 2  ;;  %v968_v53 = vrot.slane %v320_v48, 1 }
  0x34   : > { %v950_v32 = vrot.slane %v319_v55, 1  ;;  %v4646_v42 = vrot.slane %v313_v15, 2  ;;  %v4648_v44 = vrot.slane %v314_v61, 2  ;;  %v5508_v25 = vunpack.c.l.bf16 %v4631_v58 }
  0x35   : > { %3722 = vmatmul.mubr.msk.bf16.gmra.mrb[12].mxu0 %vm355_vm1, %v4560_v6  ;;  %3590 = vmatmul.mubr.msk.bf16.gmra.mrb[16].mxu1 %vm355_vm1, %v4491_v56  ;;  %v5560_v56 = vunpack.c.l.bf16 %v4580_v36  ;;  %v4635_v6 = vpack.c.bf16 %v1004_v63, %v1022_v21  ;;  %v1024_v21 = vsel %vm993_vm3, %v949_v35, %v967_v57  ;;  %v326_v35 = vunpack.c.h.bf16 %v4644_v46 }
  0x36   : > { %3725 = vmatprep.mubr.msk.bf16.mxu0 %vm355_vm1, %v4591_v17  ;;  %3593 = vmatprep.mubr.msk.bf16.mxu1 %vm355_vm1, %v4528_v27  ;;  %v322_v17 = vunpack.c.l.bf16 %v4607_v33  ;;  %v986_v61 = vrot.slane %v5508_v25, 1  ;;  %v4669_v63 = vrot.slane %v317_v28, 2  ;;  %v5564_v28 = vunpack.c.h.bf16 %v4631_v58 }
  0x37   : > { %v984_v40 = vrot.slane %v5560_v56, 1  ;;  %5561 = vst [vmem:[#allocation25_spill] sm:$0xff] %v4635_v6  ;;  %v5562_v56 = vunpack.c.h.bf16 %v4580_v36  ;;  %v4690_v26 = vrot.slane %v320_v48, 2  ;;  %v970_v23 = vrot.slane %v326_v35, 1 }
  0x38   : > { %v987_v25 = vrot.slane %v5564_v28, 1  ;;  %v280_v28 = vunpack.c.l.bf16 %v4696_v4  ;;  %v4713_v49 = vrot.slane %v323_v8, 2 }
  0x39   : > { %v1005_v27 = vsel %vm993_vm3, %v966_v51, %v984_v40  ;;  %v985_v3 = vrot.slane %v5562_v56, 1  ;;  %v951_v51 = vrot.slane %v322_v17, 1  ;;  %v969_v40 = vrot.slane %v323_v8, 1 }
  0x3a   : > { %v4641_v22 = vpack.c.bf16 %v1005_v27, %v1023_v2  ;;  %v4655_v27 = vld [vmem:[%s4294_s6 + $0x100] sm:$0xff]   ;;  %v325_v2 = vunpack.c.l.bf16 %v4644_v46  ;;  %v4667_v56 = vrot.slane %v316_v20, 2  ;;  %v1007_v20 = vsel %vm993_vm3, %v968_v53, %v986_v61 }
  0x3b   : > { %v1006_v15 = vsel %vm993_vm3, %v967_v57, %v985_v3  ;;  %v1025_v3 = vsel %vm993_vm3, %v950_v32, %v968_v53  ;;  %v4678_v57 = vld [vmem:[%s4294_s6 + $0xf8] ss:$16 sps:$4 sm:$0xff]   ;;  %v1026_v32 = vsel %vm993_vm3, %v951_v51, %v969_v40  ;;  %v1008_v48 = vsel %vm993_vm3, %v969_v40, %v987_v25 }
  0x3c   : > { %5563 = vst [vmem:[#allocation26_spill] sm:$0xff] %v4641_v22  ;;  %v952_v5 = vrot.slane %v325_v2, 1  ;;  %v4698_v53 = vpack.c.bf16 %v1007_v20, %v1025_v3  ;;  %v5528_v61 = vunpack.c.h.bf16 %v4678_v57  ;;  %v4711_v20 = vrot.slane %v322_v17, 2 }
  0x3d   : > { %3726 = vmatmul.mubr.msk.bf16.gmra.mrb[16].mxu0 %vm355_vm1, %v4635_v6  ;;  %3594 = vmatmul.mubr.msk.bf16.gmra.mrb[20].mxu1 %vm355_vm1, %v4567_v54  ;;  %v4673_v6 = vrot.slane %v319_v55, 2  ;;  %v5525_v54 = vunpack.c.l.bf16 %v4655_v27  ;;  %v4688_v55 = vpack.c.bf16 %v1006_v15, %v1024_v21  ;;  %v1696_v21 = vrot.slane %v280_v28, 2 }
  0x3e   : > { %3729 = vmatprep.mubr.msk.bf16.mxu0 %vm355_vm1, %v4641_v22  ;;  %3597 = vmatprep.mubr.msk.bf16.mxu1 %vm355_vm1, %v4585_v50  ;;  %v5524_v22 = vunpack.c.h.bf16 %v4655_v27  ;;  %v5529_v50 = vunpack.c.l.bf16 %v4678_v57  ;;  %v989_v30 = vrot.slane %v5528_v61, 1  ;;  %v4719_v25 = vrot.slane %v325_v2, 2 }
  0x3f   : > { %v953_v51 = vrot.slane %v5525_v54, 1  ;;  %v4721_v40 = vrot.slane %v326_v35, 2  ;;  %v4732_v17 = vpack.c.bf16 %v1008_v48, %v1026_v32  ;;  %v1027_v2 = vsel %vm993_vm3, %v952_v5, %v970_v23 }
  0x40   : > { %v971_v15 = vrot.slane %v5524_v22, 1  ;;  %v988_v3 = vrot.slane %v5529_v50, 1  ;;  %v5565_v22 = vunpack.c.h.bf16 %v4696_v4  ;;  %v5530_v35 = vunpack.c.l.bf16 %v4726_v10 }
  0x41   : > { %v4745_v50 = vrot.slane %v280_v28, 1  ;;  %v5569_v28 = vunpack.c.l.bf16 %v4357_v41 }
  0x42   : > { %v1714_v54 = vrot.slane %v5565_v22, 2  ;;  %v1009_v8 = vsel %vm993_vm3, %v970_v23, %v988_v3  ;;  %v1010_v22 = vsel %vm993_vm3, %v971_v15, %v989_v30  ;;  %v1028_v61 = vsel %vm993_vm3, %v953_v51, %v971_v15 }
  0x43   : > { %v1732_v32 = vrot.slane %v5530_v35, 2  ;;  %v5567_v23 = vunpack.c.h.bf16 %v4305_v11  ;;  %v1771_v30 = vsel %vm1750_vm2, %v4460_v31, %v4475_v18  ;;  %v4759_v3 = vpack.c.bf16 %v1009_v8, %v1027_v2 }
  0x44   : > { %v4751_v48 = vsel %vm1750_vm2, %v1696_v21, %v1714_v54  ;;  %v1735_v51 = vrot.slane %v5569_v28, 2  ;;  %v1772_v15 = vsel %vm1750_vm2, %v4479_v14, %v4502_v59  ;;  %v5570_v21 = vunpack.c.h.bf16 %v4357_v41 }
  0x45   : > { %3730 = vmatmul.mubr.msk.bf16.gmra.mrb[20].mxu0 %vm355_vm1, %v4688_v55  ;;  %3598 = vmatmul.mubr.msk.bf16.gmra.mrb[24].mxu1 %vm355_vm1, %v4607_v33  ;;  %v1734_v5 = vrot.slane %v5567_v23, 2  ;;  %5568 = vst [vmem:[#allocation28_spill] sm:$0xff] %v4759_v3  ;;  %v4769_v11 = vpack.c.bf16 %v1010_v22, %v1028_v61  ;;  %v4773_v23 = vsel %vm1750_vm2, %v1714_v54, %v1732_v32  ;;  %v5571_v22 = vunpack.c.l.bf16 %v4410_v62 }
  0x46   : > { %3733 = vmatprep.mubr.msk.bf16.mxu0 %vm355_vm1, %v4698_v53  ;;  %3601 = vmatprep.mubr.msk.bf16.mxu1 %vm355_vm1, %v4644_v46  ;;  %v1736_v35 = vrot.slane %v5570_v21, 2  ;;  %v1773_v8 = vsel %vm1750_vm2, %v4510_v0, %v4514_v1  ;;  %v1754_v61 = vsel %vm1750_vm2, %v4502_v59, %v1735_v51  ;;  %v1774_v32 = vsel %vm1750_vm2, %v4532_v47, %v4544_v45 }
  0x47   : > { %v1753_v31 = vsel %vm1750_vm2, %v4475_v18, %v1734_v5  ;;  %v4792_v2 = vpack.c.bf16 %v1754_v61, %v1772_v15  ;;  %v1737_v0 = vrot.slane %v5571_v22, 2  ;;  %v5572_v59 = vunpack.c.h.bf16 %v4410_v62 }
  0x48   : > { %v4784_v41 = vpack.c.bf16 %v1753_v31, %v1771_v30  ;;  %v1755_v54 = vsel %vm1750_vm2, %v4514_v1, %v1736_v35  ;;  %v1775_v1 = vsel %vm1750_vm2, %v4548_v52, %v4550_v60  ;;  %v5573_v35 = vunpack.c.l.bf16 %v4452_v29 }
  0x49   : > { %v4794_v18 = vpack.c.bf16 %v1755_v54, %v1773_v8  ;;  %v1738_v5 = vrot.slane %v5572_v59, 2  ;;  %v1776_v28 = vsel %vm1750_vm2, %v4571_v16, %v4575_v13  ;;  %v1756_v62 = vsel %vm1750_vm2, %v4544_v45, %v1737_v0 }
  0x4a   : > { %v1739_v30 = vrot.slane %v5573_v35, 2  ;;  %v5574_v47 = vunpack.c.h.bf16 %v4452_v29  ;;  %v1777_v51 = vsel %vm1750_vm2, %v4589_v19, %v4597_v38  ;;  %v5575_v16 = vunpack.c.l.bf16 %v4520_v12 }
  0x4b   : > { %v4833_v21 = vpack.c.bf16 %v1756_v62, %v1774_v32  ;;  %v1757_v45 = vsel %vm1750_vm2, %v4550_v60, %v1738_v5  ;;  %v1778_v19 = vsel %vm1750_vm2, %v4601_v37, %v4618_v39  ;;  %v5576_v22 = vunpack.c.h.bf16 %v4520_v12 }
  0x4c   : > { %v1740_v52 = vrot.slane %v5574_v47, 2  ;;  %v1741_v15 = vrot.slane %v5575_v16, 2  ;;  %v1758_v29 = vsel %vm1750_vm2, %v4575_v13, %v1739_v30  ;;  %v4845_v31 = vpack.c.bf16 %v1757_v45, %v1775_v1  ;;  %v5584_v45 = vld [vmem:[#allocation14_spill] sm:$0xff] }
  0x4d   : > { %3734 = vmatmul.mubr.msk.bf16.gmra.mrb[24].mxu0 %vm355_vm1, %v4732_v17  ;;  %3602 = vmatmul.mubr.msk.bf16.gmra.mrb[28].mxu1 %vm355_vm1, %v4655_v27  ;;  %v4847_v8 = vpack.c.bf16 %v1758_v29, %v1776_v28  ;;  %v1742_v0 = vrot.slane %v5576_v22, 2  ;;  %v1779_v37 = vsel %vm1750_vm2, %v4620_v24, %v4633_v34  ;;  %v5577_v32 = vunpack.c.l.bf16 %v4580_v36 }
  0x4e   : > { %3737 = vmatprep.mubr.msk.bf16.mxu0 %vm355_vm1, %v4759_v3  ;;  %3607 = vmatprep.mubr.msk.bf16.mxu1 %vm355_vm1, %v4696_v4  ;;  %v1759_v61 = vsel %vm1750_vm2, %v4597_v38, %v1740_v52  ;;  %v1760_v60 = vsel %vm1750_vm2, %v4618_v39, %v1741_v15  ;;  %v1780_v38 = vsel %vm1750_vm2, %v4646_v42, %v4648_v44  ;;  %v5578_v39 = vunpack.c.h.bf16 %v4580_v36  ;;  %v5583_v15 = vld [vmem:[#allocation2_spill] sm:$0xff] }
  0x4f   : > { %v4855_v54 = vpack.c.bf16 %v1759_v61, %v1777_v51  ;;  %v4857_v13 = vpack.c.bf16 %v1760_v60, %v1778_v19  ;;  %v1743_v59 = vrot.slane %v5577_v32, 2  ;;  %v1781_v12 = vsel %vm1750_vm2, %v4667_v56, %v4669_v63  ;;  %v3282_v32 = vld [vmem:[%s5465_s1 + $0xa] sm:$0x3] }
  0x50   : > { %v1744_v5 = vrot.slane %v5578_v39, 2  ;;  %v5579_v1 = vunpack.c.h.bf16 %v4696_v4  ;;  %v1761_v24 = vsel %vm1750_vm2, %v4633_v34, %v1742_v0  ;;  %v5580_v30 = vunpack.c.l.bf16 %v4631_v58  ;;  %v5586_v0 = vld [vmem:[#allocation8_spill] sm:$0xff] }
  0x51   : > { %v1782_v42 = vsel %vm1750_vm2, %v4673_v6, %v4690_v26  ;;  %v4888_v36 = vpack.c.bf16 %v1761_v24, %v1779_v37  ;;  %v1762_v56 = vsel %vm1750_vm2, %v4648_v44, %v1743_v59  ;;  %v5581_v34 = vunpack.c.h.bf16 %v4631_v58  ;;  %v4910_v44 = vld [vmem:[%s5465_s1 + $0x2] sm:$0x3]  ;;  %v5587_v37 = vld [vmem:[#allocation11_spill] sm:$0xff]  ;;  %v5589_v59 = vld [vmem:[#allocation12_spill] sm:$0xff] }
  0x52   : > { %v955_v35 = vrot.slane %v5579_v1, 1  ;;  %v1745_v28 = vrot.slane %v5580_v30, 2  ;;  %v1763_v4 = vsel %vm1750_vm2, %v4669_v63, %v1744_v5  ;;  %v4900_v47 = vpack.c.bf16 %v1762_v56, %v1780_v38  ;;  %v5590_v38 = vld [vmem:[#allocation4_spill] sm:$0xff]  ;;  %v5592_v5 = vld [vmem:[#allocation7_spill] sm:$0xff]  ;;  %v5594_v1 = vld [vmem:[#allocation9_spill] sm:$0xff] }
  0x53   : > { %v1746_v62 = vrot.slane %v5581_v34, 2  ;;  %v4902_v52 = vpack.c.bf16 %v1763_v4, %v1781_v12  ;;  %v1783_v58 = vsel %vm1750_vm2, %v4711_v20, %v4713_v49  ;;  %v5582_v51 = vunpack.c.l.bf16 %v4678_v57  ;;  %v5591_v39 = vld [vmem:[#allocation16_spill] sm:$0xff]  ;;  %v5593_v12 = vld [vmem:[#allocation17_spill] sm:$0xff]  ;;  %v5596_v24 = vld [vmem:[#allocation10_spill] sm:$0xff] }
  0x54   : > { %v1764_v6 = vsel %vm1750_vm2, %v4690_v26, %v1745_v28  ;;  %v5585_v29 = vunpack.c.l.bf16 %v4726_v10  ;;  %v5597_v30 = vld [vmem:[#allocation21_spill] sm:$0xff]  ;;  %v5600_v56 = vld [vmem:[#allocation15_spill] sm:$0xff]  ;;  %v5602_v34 = vld [vmem:[#allocation18_spill] sm:$0xff] }
  0x55   : > { %3738 = vmatmul.mubr.msk.bf16.gmra.mrb[28].mxu0 %vm355_vm1, %v4769_v11  ;;  %3608 = vmatmul.mubr.msk.bf16.vlgmr.msra.gmra.mrb[0].mxu1 %vm355_vm1, %v4298_v9  ;;  %v4920_v63 = vpack.c.bf16 %v1764_v6, %v1782_v42  ;;  %v1765_v26 = vsel %vm1750_vm2, %v4713_v49, %v1746_v62  ;;  %v1747_v16 = vrot.slane %v5582_v51, 2  ;;  %v1784_v9 = vsel %vm1750_vm2, %v4719_v25, %v4721_v40  ;;  %v5598_v28 = vld [vmem:[#allocation13_spill] sm:$0xff]  ;;  %v5599_v42 = vld [vmem:[#allocation24_spill] sm:$0xff]  ;;  %v5603_v62 = vld [vmem:[#allocation26_spill] sm:$0xff] }
  0x56   : > { %3743 = vmatprep.mubr.msk.bf16.mxu0 %vm355_vm1, %v4362_v43  ;;  %3611 = vmatprep.mubr.msk.bf16.mxu1 %vm355_vm1, %v5583_v15  ;;  %v4930_v20 = vpack.c.bf16 %v1765_v26, %v1783_v58  ;;  %v973_v19 = vrot.slane %v5585_v29, 1  ;;  %v4941_v49 = vsel %vm993_vm3, %v4745_v50, %v955_v35  ;;  %v1856_v50 = vsel %vm404_vm0, %v5586_v0, 0  ;;  %v5601_v4 = vld [vmem:[#allocation25_spill] sm:$0xff]  ;;  %v5604_v6 = vld [vmem:[#allocation19_spill] sm:$0xff]  ;;  %v5605_v58 = vld [vmem:[#allocation22_spill] sm:$0xff] }
  0x57   : > { %3640 = vmatpush3.bf16.msra.mxu1 %v5584_v45  ;;  %v1766_v61 = vsel %vm1750_vm2, %v4721_v40, %v1747_v16  ;;  %v5588_v40 = vld [vmem:[#allocation3_spill] sm:$0xff]  ;;  %v5003_v26 = vld [vmem:[%s4294_s6 + $0x110] sm:$0xff]   ;;  %v5607_v29 = vunpack.c.l.bf16 %v4655_v27 }
  0x58   : > { %4170 = vmatprep.subr.msk.bf16.mxu1 %vm404_vm0, %v4910_v44  ;;  %v4948_v60 = vpack.c.bf16 %v1766_v61, %v1784_v9  ;;  %v4952_v25 = vsel %vm993_vm3, %v955_v35, %v973_v19  ;;  %v5595_v35 = vld [vmem:[#allocation20_spill] sm:$0xff]  ;;  %v5606_v51 = vld [vmem:[#allocation23_spill] sm:$0xff]  ;;  %v5532_v16 = vunpack.c.l.bf16 %v5003_v26  ;;  %v5531_v45 = vunpack.c.h.bf16 %v5003_v26 }
  0x59   : > { %v5533_v9 = vunpack.c.h.bf16 %v4726_v10  ;;  %v1712_v19 = vrot.slane %v5607_v29, 2  ;;  %v5608_v61 = vunpack.c.h.bf16 %v4655_v27 }
  0x5a   : > { %v972_v22 = vrot.slane %v5531_v45, 1  ;;  %v5609_v45 = vunpack.c.h.bf16 %v4678_v57  ;;  %v5610_v57 = vpack.c.bf16 %v4773_v23, %v4751_v48  ;;  %v5616_v23 = vunpack.c.h.bf16 %v5003_v26 }
  0x5b   : > { %v1730_v0 = vrot.slane %v5608_v61, 2  ;;  %v990_v14 = vrot.slane %v5533_v9, 1 }
  0x5d   : > { %3744 = vmatmul.mubr.msk.bf16.vlgmr.msra.gmra.mrb[0].mxu0 %vm355_vm1, %v5587_v37  ;;  %3612 = vmatmul.mubr.msk.bf16.gmra.mrb[4].mxu1 %vm355_vm1, %v5588_v40  ;;  %v1011_v29 = vsel %vm993_vm3, %v972_v22, %v990_v14  ;;  %v1785_v9 = vsel %vm1750_vm2, %v1712_v19, %v1730_v0  ;;  %v1099_v14 = vsel %vm404_vm0, %v4910_v44, 0 }
  0x5e   : > { %3776 = vmatpush3.bf16.msra.mxu0 %v1856_v50  ;;  %3747 = vmatprep.mubr.msk.bf16.mxu0 %vm355_vm1, %v5589_v59  ;;  %v954_v50 = vrot.slane %v5532_v16, 1  ;;  %v1748_v16 = vrot.slane %v5609_v45, 2 }
  0x5f   : > { %3615 = vmatprep.mubr.msk.bf16.mxu1 %vm355_vm1, %v5590_v38  ;;  %4174 = vmatprep.subr.msk.bf16.mxu0 %vm404_vm0, %v3282_v32 }
  0x60   : > { %v1029_v61 = vsel %vm993_vm3, %v954_v50, %v972_v22  ;;  %v1767_v10 = vsel %vm1750_vm2, %v1730_v0, %v1748_v16 }
  0x65   : > { %3748 = vmatmul.mubr.msk.bf16.gmra.mrb[4].mxu0 %vm355_vm1, %v5591_v39  ;;  %3616 = vmatmul.mubr.msk.bf16.gmra.mrb[8].mxu1 %vm355_vm1, %v5592_v5 }
  0x66   : > { %3751 = vmatprep.mubr.msk.bf16.mxu0 %vm355_vm1, %v5593_v12  ;;  %3619 = vmatprep.mubr.msk.bf16.mxu1 %vm355_vm1, %v5594_v1 }
  0x6d   : > { %3752 = vmatmul.mubr.msk.bf16.gmra.mrb[8].mxu0 %vm355_vm1, %v5595_v35  ;;  %3620 = vmatmul.mubr.msk.bf16.gmra.mrb[12].mxu1 %vm355_vm1, %v5596_v24 }
  0x6e   : > { %3755 = vmatprep.mubr.msk.bf16.mxu0 %vm355_vm1, %v5597_v30  ;;  %3623 = vmatprep.mubr.msk.bf16.mxu1 %vm355_vm1, %v5598_v28 }
  0x75   : > { %3756 = vmatmul.mubr.msk.bf16.gmra.mrb[12].mxu0 %vm355_vm1, %v5599_v42  ;;  %3624 = vmatmul.mubr.msk.bf16.gmra.mrb[16].mxu1 %vm355_vm1, %v5600_v56 }
  0x76   : > { %3759 = vmatprep.mubr.msk.bf16.mxu0 %vm355_vm1, %v5601_v4  ;;  %3627 = vmatprep.mubr.msk.bf16.mxu1 %vm355_vm1, %v5602_v34 }
  0x7d   : > { %3760 = vmatmul.mubr.msk.bf16.gmra.mrb[16].mxu0 %vm355_vm1, %v5603_v62  ;;  %3628 = vmatmul.mubr.msk.bf16.gmra.mrb[20].mxu1 %vm355_vm1, %v5604_v6 }
  0x7e   : > { %3763 = vmatprep.mubr.msk.bf16.mxu0 %vm355_vm1, %v4688_v55  ;;  %3631 = vmatprep.mubr.msk.bf16.mxu1 %vm355_vm1, %v5605_v58 }
  0x85   : > { %3764 = vmatmul.mubr.msk.bf16.gmra.mrb[20].mxu0 %vm355_vm1, %v4698_v53  ;;  %3632 = vmatmul.mubr.msk.bf16.gmra.mrb[24].mxu1 %vm355_vm1, %v5606_v51 }
  0x86   : > { %3767 = vmatprep.mubr.msk.bf16.mxu0 %vm355_vm1, %v4732_v17  ;;  %3635 = vmatprep.mubr.msk.bf16.mxu1 %vm355_vm1, %v4607_v33 }
  0x8d   : > { %3768 = vmatmul.mubr.msk.bf16.gmra.mrb[24].mxu0 %vm355_vm1, %v4759_v3  ;;  %3636 = vmatmul.mubr.msk.bf16.gmra.mrb[28].mxu1 %vm355_vm1, %v4644_v46  ;;  %v1047_v3 = vpack.c.bf16 %v1011_v29, %v1029_v61 }
  0x8e   : > { %3771 = vmatprep.mubr.msk.bf16.mxu0 %vm355_vm1, %v4769_v11  ;;  %3641 = vmatprep.mubr.msk.bf16.mxu1 %vm355_vm1, %v5583_v15  ;;  %v5044_v11 = vpack.c.bf16 %v1767_v10, %v1785_v9  ;;  %v2057_v10 = vsel %vm404_vm0, %v3282_v32, 0  ;;  %v5611_v15 = vld [vmem:[#allocation6_spill] sm:$0xff] }
  0x95   : > { %3772 = vmatmul.mubr.msk.bf16.gmra.mrb[28].mxu0 %vm355_vm1, %v1047_v3  ;;  %3642 = vmatmul.mubr.msk.bf16.vlgmr.msra.gmra.mrb[0].mxu1 %vm355_vm1, %v5588_v40  ;;  %v3299_v3 = vld [vmem:[%s5465_s1 + $0x10] sm:$0x3] }
  0x96   : > { %3777 = vmatprep.mubr.msk.bf16.mxu0 %vm355_vm1, %v5610_v57  ;;  %3645 = vmatprep.mubr.msk.bf16.mxu1 %vm355_vm1, %v5590_v38 }
  0x97   : > { %3674 = vmatpush3.bf16.msra.mxu1 %v1099_v14 }
  0x9d   : > { %3778 = vmatmul.mubr.msk.bf16.vlgmr.msra.gmra.mrb[0].mxu0 %vm355_vm1, %v5611_v15  ;;  %3646 = vmatmul.mubr.msk.bf16.gmra.mrb[4].mxu1 %vm355_vm1, %v5592_v5 }
  0x9e   : > { %3810 = vmatpush3.bf16.msra.mxu0 %v2057_v10  ;;  %3781 = vmatprep.mubr.msk.bf16.mxu0 %vm355_vm1, %v4784_v41 }
  0x9f   : > { %3649 = vmatprep.mubr.msk.bf16.mxu1 %vm355_vm1, %v5594_v1  ;;  %4175 = vmatprep.subr.msk.bf16.mxu0 %vm404_vm0, %v3299_v3 }
  0xa5   : > { %3782 = vmatmul.mubr.msk.bf16.gmra.mrb[4].mxu0 %vm355_vm1, %v4792_v2  ;;  %3650 = vmatmul.mubr.msk.bf16.gmra.mrb[8].mxu1 %vm355_vm1, %v5596_v24 }
  0xa6   : > { %3785 = vmatprep.mubr.msk.bf16.mxu0 %vm355_vm1, %v4794_v18  ;;  %3653 = vmatprep.mubr.msk.bf16.mxu1 %vm355_vm1, %v5598_v28 }
  0xad   : > { %3786 = vmatmul.mubr.msk.bf16.gmra.mrb[8].mxu0 %vm355_vm1, %v4833_v21  ;;  %3654 = vmatmul.mubr.msk.bf16.gmra.mrb[12].mxu1 %vm355_vm1, %v5600_v56 }
  0xae   : > { %3789 = vmatprep.mubr.msk.bf16.mxu0 %vm355_vm1, %v4845_v31  ;;  %3657 = vmatprep.mubr.msk.bf16.mxu1 %vm355_vm1, %v5602_v34 }
  0xb5   : > { %3790 = vmatmul.mubr.msk.bf16.gmra.mrb[12].mxu0 %vm355_vm1, %v4847_v8  ;;  %3658 = vmatmul.mubr.msk.bf16.gmra.mrb[16].mxu1 %vm355_vm1, %v5604_v6 }
  0xb6   : > { %3793 = vmatprep.mubr.msk.bf16.mxu0 %vm355_vm1, %v4855_v54  ;;  %3661 = vmatprep.mubr.msk.bf16.mxu1 %vm355_vm1, %v5605_v58 }
  0xbd   : > { %3794 = vmatmul.mubr.msk.bf16.gmra.mrb[16].mxu0 %vm355_vm1, %v4857_v13  ;;  %3662 = vmatmul.mubr.msk.bf16.gmra.mrb[20].mxu1 %vm355_vm1, %v5606_v51  ;;  %v5280_v51 = vld [vmem:[%s5466_s2] ss:$0 sm:$0xff] }
  0xbe   : > { %3797 = vmatprep.mubr.msk.bf16.mxu0 %vm355_vm1, %v4888_v36  ;;  %3665 = vmatprep.mubr.msk.bf16.mxu1 %vm355_vm1, %v4607_v33  ;;  %v5612_v33 = vpack.c.bf16 %v4952_v25, %v4941_v49 }
  0xc5   : > { %3798 = vmatmul.mubr.msk.bf16.gmra.mrb[20].mxu0 %vm355_vm1, %v4900_v47  ;;  %3666 = vmatmul.mubr.msk.bf16.gmra.mrb[24].mxu1 %vm355_vm1, %v4644_v46  ;;  %v5613_v46 = vld [vmem:[#allocation5_spill] sm:$0xff] }
  0xc6   : > { %3801 = vmatprep.mubr.msk.bf16.mxu0 %vm355_vm1, %v4902_v52  ;;  %3669 = vmatprep.mubr.msk.bf16.mxu1 %vm355_vm1, %v4655_v27  ;;  %v2258_v27 = vsel %vm404_vm0, %v3299_v3, 0 }
  0xcd   : > { %3802 = vmatmul.mubr.msk.bf16.gmra.mrb[24].mxu0 %vm355_vm1, %v4920_v63  ;;  %3670 = vmatmul.mubr.msk.bf16.gmra.mrb[28].mxu1 %vm355_vm1, %v5003_v26 }
  0xce   : > { %3805 = vmatprep.mubr.msk.bf16.mxu0 %vm355_vm1, %v4930_v20  ;;  %3675 = vmatprep.mubr.msk.bf16.mxu1 %vm355_vm1, %v5612_v33 }
  0xd5   : > { %3806 = vmatmul.mubr.msk.bf16.gmra.mrb[28].mxu0 %vm355_vm1, %v4948_v60  ;;  %3676 = vmatmul.mubr.msk.bf16.vlgmr.msra.gmra.mrb[0].mxu1 %vm355_vm1, %v5613_v46 }
  0xd6   : > { %3811 = vmatprep.mubr.msk.bf16.mxu0 %vm355_vm1, %v5611_v15  ;;  %3679 = vmatprep.mubr.msk.bf16.mxu1 %vm355_vm1, %v4362_v43  ;;  %v5614_v43 = vld [vmem:[#allocation28_spill] sm:$0xff] }
  0xdd   : > { %3812 = vmatmul.mubr.msk.bf16.vlgmr.msra.gmra.mrb[0].mxu0 %vm355_vm1, %v4784_v41  ;;  %3680 = vmatmul.mubr.msk.bf16.gmra.mrb[4].mxu1 %vm355_vm1, %v5587_v37 }
  0xde   : > { %3844 = vmatpush3.bf16.msra.mxu0 %v2258_v27  ;;  %3815 = vmatprep.mubr.msk.bf16.mxu0 %vm355_vm1, %v4792_v2 }
  0xdf   : > { %3683 = vmatprep.mubr.msk.bf16.mxu1 %vm355_vm1, %v5589_v59 }
  0xe5   : > { %3816 = vmatmul.mubr.msk.bf16.gmra.mrb[4].mxu0 %vm355_vm1, %v4794_v18  ;;  %3684 = vmatmul.mubr.msk.bf16.gmra.mrb[8].mxu1 %vm355_vm1, %v5591_v39 }
  0xe6   : > { %3819 = vmatprep.mubr.msk.bf16.mxu0 %vm355_vm1, %v4833_v21  ;;  %3687 = vmatprep.mubr.msk.bf16.mxu1 %vm355_vm1, %v5593_v12 }
  0xed   : > { %3820 = vmatmul.mubr.msk.bf16.gmra.mrb[8].mxu0 %vm355_vm1, %v4845_v31  ;;  %3688 = vmatmul.mubr.msk.bf16.gmra.mrb[12].mxu1 %vm355_vm1, %v5595_v35 }
  0xee   : > { %3823 = vmatprep.mubr.msk.bf16.mxu0 %vm355_vm1, %v4847_v8  ;;  %3691 = vmatprep.mubr.msk.bf16.mxu1 %vm355_vm1, %v5597_v30 }
  0xf5   : > { %3824 = vmatmul.mubr.msk.bf16.gmra.mrb[12].mxu0 %vm355_vm1, %v4855_v54  ;;  %3692 = vmatmul.mubr.msk.bf16.gmra.mrb[16].mxu1 %vm355_vm1, %v5599_v42 }
  0xf6   : > { %3827 = vmatprep.mubr.msk.bf16.mxu0 %vm355_vm1, %v4857_v13  ;;  %3695 = vmatprep.mubr.msk.bf16.mxu1 %vm355_vm1, %v5601_v4 }
  0xfd   : > { %3828 = vmatmul.mubr.msk.bf16.gmra.mrb[16].mxu0 %vm355_vm1, %v4888_v36  ;;  %3696 = vmatmul.mubr.msk.bf16.gmra.mrb[20].mxu1 %vm355_vm1, %v5603_v62 }
  0xfe   : > { %3831 = vmatprep.mubr.msk.bf16.mxu0 %vm355_vm1, %v4900_v47  ;;  %3699 = vmatprep.mubr.msk.bf16.mxu1 %vm355_vm1, %v4688_v55  ;;  %v2604_v55 = vld [vmem:[%s5467_s3] sm:$0xf] }
  0xff   : > { %4176 = vmatprep.subr.msk.bf16.mxu1 %vm2661_vm4, %v2604_v55 }
 0x105   : > { %3832 = vmatmul.mubr.msk.bf16.gmra.mrb[20].mxu0 %vm355_vm1, %v4902_v52  ;;  %3700 = vmatmul.mubr.msk.bf16.gmra.mrb[24].mxu1 %vm355_vm1, %v4698_v53  ;;  %v2663_v53 = vsel %vm2661_vm4, %v2604_v55, 0 }
 0x106   : > { %3835 = vmatprep.mubr.msk.bf16.mxu0 %vm355_vm1, %v4920_v63  ;;  %3703 = vmatprep.mubr.msk.bf16.mxu1 %vm355_vm1, %v4732_v17  ;;  %v5615_v17 = vunpack.c.l.bf16 %v5003_v26 }
 0x107   : > { %3878 = vmatpush3.bf16.msra.mxu1 %v2663_v53 }
 0x108   : > { %v1713_v48 = vrot.slane %v5615_v17, 2 }
 0x10d   : > { %3836 = vmatmul.mubr.msk.bf16.gmra.mrb[24].mxu0 %vm355_vm1, %v4930_v20  ;;  %3704 = vmatmul.mubr.msk.bf16.gmra.mrb[28].mxu1 %vm355_vm1, %v5614_v43 }
 0x10e   : > { %3839 = vmatprep.mubr.msk.bf16.mxu0 %vm355_vm1, %v4948_v60 }
 0x115   : > { %3840 = vmatmul.mubr.msk.bf16.gmra.mrb[28].mxu0 %vm355_vm1, %v5044_v11 }
 0x116   : > { %3845 = vmatprep.mubr.msk.bf16.mxu0 %vm355_vm1, %v4784_v41  ;;  %v1731_v41 = vrot.slane %v5616_v23, 2 }
 0x11d   : > { %3846 = vmatmul.mubr.msk.bf16.vlgmr.msra.gmra.mrb[0].mxu0 %vm355_vm1, %v4792_v2  ;;  %v5617_v2 = vld [vmem:[#allocation27_spill] sm:$0xff] }
 0x11e   : > { %3849 = vmatprep.mubr.msk.bf16.mxu0 %vm355_vm1, %v4794_v18  ;;  %v5618_v18 = vunpack.c.h.bf16 %v5617_v2 }
 0x125   : > { %3850 = vmatmul.mubr.msk.bf16.gmra.mrb[4].mxu0 %vm355_vm1, %v4833_v21  ;;  %v1749_v21 = vrot.slane %v5618_v18, 2 }
 0x126   : > { %3853 = vmatprep.mubr.msk.bf16.mxu0 %vm355_vm1, %v4845_v31 }
 0x127   : > { %v1768_v31 = vsel %vm1750_vm2, %v1731_v41, %v1749_v21 }
 0x12d   : > { %3854 = vmatmul.mubr.msk.bf16.gmra.mrb[8].mxu0 %vm355_vm1, %v4847_v8  ;;  %v1786_v8 = vsel %vm1750_vm2, %v1713_v48, %v1731_v41 }
 0x12e   : > { %3857 = vmatprep.mubr.msk.bf16.mxu0 %vm355_vm1, %v4855_v54  ;;  %v1804_v54 = vpack.c.bf16 %v1768_v31, %v1786_v8 }
 0x135   : > { %3858 = vmatmul.mubr.msk.bf16.gmra.mrb[12].mxu0 %vm355_vm1, %v4857_v13 }
 0x136   : > { %3861 = vmatprep.mubr.msk.bf16.mxu0 %vm355_vm1, %v4888_v36 }
 0x13d   : > { %3862 = vmatmul.mubr.msk.bf16.gmra.mrb[16].mxu0 %vm355_vm1, %v4900_v47 }
 0x13e   : > { %3865 = vmatprep.mubr.msk.bf16.mxu0 %vm355_vm1, %v4902_v52 }
 0x145   : > { %3866 = vmatmul.mubr.msk.bf16.gmra.mrb[20].mxu0 %vm355_vm1, %v4920_v63 }
 0x146   : > { %3869 = vmatprep.mubr.msk.bf16.mxu0 %vm355_vm1, %v4930_v20 }
 0x14d   : > { %3870 = vmatmul.mubr.msk.bf16.gmra.mrb[24].mxu0 %vm355_vm1, %v4948_v60 }
 0x14e   : > { %3873 = vmatprep.mubr.msk.bf16.mxu0 %vm355_vm1, %v5044_v11 }
 0x155   : > { %3874 = vmatmul.mubr.msk.bf16.gmra.mrb[28].mxu0 %vm355_vm1, %v1804_v54 }
 0x1a8   : > { %v3677_v13 = vpop.f32.mrb[0].mxu1 }
 0x1a9   : > { %v1135_v36 = vpop.f32.mrb[1].mxu1 }
 0x1aa   : > { %v3678_v47 = vpop.f32.mrb[2].mxu1 }
 0x1ab   : > { %v1138_v52 = vpop.f32.mrb[3].mxu1 }
 0x1b0   : > { %v3681_v44 = vpop.f32.mrb[4].mxu1 }
 0x1b1   : > { %v1151_v63 = vpop.f32.mrb[5].mxu1 }
 0x1b2   : > { %v3682_v20 = vpop.f32.mrb[6].mxu1 }
 0x1b3   : > { %v1154_v49 = vpop.f32.mrb[7].mxu1 }
 0x1b8   : > { %v5229_v60 = vpop.f32.mrb[8].mxu1 }
 0x1b9   : > { %v5231_v25 = vpop.f32.mrb[9].mxu1 }
 0x1ba   : > { %v5233_v22 = vpop.f32.mrb[10].mxu1 }
 0x1bb   : > { %v5235_v37 = vpop.f32.mrb[11].mxu1 }
 0x1c0   : > { %v5237_v7 = vpop.f32.mrb[12].mxu1 }
 0x1c1   : > { %v5239_v32 = vpop.f32.mrb[13].mxu1 }
 0x1c2   : > { %v5241_v40 = vpop.f32.mrb[14].mxu1 }
 0x1c3   : > { %v5243_v59 = vpop.f32.mrb[15].mxu1 }
 0x1c8   : > { %v5245_v38 = vpop.f32.mrb[16].mxu1 }
 0x1c9   : > { %v5247_v39 = vpop.f32.mrb[17].mxu1 }
 0x1ca   : > { %v5249_v5 = vpop.f32.mrb[18].mxu1 }
 0x1cb   : > { %v5251_v12 = vpop.f32.mrb[19].mxu1 }
 0x1d0   : > { %v5253_v1 = vpop.f32.mrb[20].mxu1 }
 0x1d1   : > { %v5255_v35 = vpop.f32.mrb[21].mxu1 }
 0x1d2   : > { %v5257_v24 = vpop.f32.mrb[22].mxu1 }
 0x1d3   : > { %v5259_v30 = vpop.f32.mrb[23].mxu1 }
 0x1d8   : > { %v5261_v28 = vpop.f32.mrb[24].mxu1 }
 0x1d9   : > { %v5263_v42 = vpop.f32.mrb[25].mxu1 }
 0x1da   : > { %v5265_v56 = vpop.f32.mrb[26].mxu1 }
 0x1db   : > { %v5267_v4 = vpop.f32.mrb[27].mxu1 }
 0x1e0   : > { %v5269_v34 = vpop.f32.mrb[28].mxu1 }
 0x1e1   : > { %v5271_v62 = vpop.f32.mrb[29].mxu1 }
 0x1e2   : > { %v5273_v6 = vpop.f32.mrb[30].mxu1 }
 0x1e3   : > { %v5275_v58 = vpop.f32.mrb[31].mxu1 }
 0x1f0   : > { %v3847_v26 = vpop.f32.mrb[0].mxu0 }
 0x1f1   : > { %v3911_v16 = vadd.f32 %v3847_v26, %v3677_v13  ;;  %v2294_v45 = vpop.f32.mrb[1].mxu0 }
 0x1f2   : > { %v3912_v9 = vadd.f32 %v2294_v45, %v1135_v36  ;;  %v3848_v19 = vpop.f32.mrb[2].mxu0 }
 0x1f3   : > { %v2462_v0 = vadd.f32 %v3911_v16, %v5280_v51  ;;  %v3913_v50 = vadd.f32 %v3848_v19, %v3678_v47  ;;  %v2297_v29 = vpop.f32.mrb[3].mxu0 }
 0x1f4   : > { %v2460_v61 = vadd.f32 %v3912_v9, %v5280_v51  ;;  %v3914_v11 = vadd.f32 %v2297_v29, %v1138_v52 }
 0x1f5   : > { %v2526_v14 = vmul.f32 0.1, %v2462_v0  ;;  %v2463_v57 = vadd.f32 %v3913_v50, %v5280_v51  ;;  %vm2494_vm5 = vcmp.gt.f32.partialorder %v2462_v0, 0.0 }
 0x1f6   : > { %v2524_v10 = vmul.f32 0.1, %v2460_v61  ;;  %v2461_v15 = vadd.f32 %v3914_v11, %v5280_v51  ;;  %vm2492_vm6 = vcmp.gt.f32.partialorder %v2460_v61, 0.0 }
 0x1f7   : > { %vm2495_vm7 = vcmp.gt.f32.partialorder %v2463_v57, 0.0  ;;  %v2527_v3 = vmul.f32 0.1, %v2463_v57  ;;  %v2558_v27 = vsel %vm2494_vm5, %v2462_v0, %v2526_v14 }
 0x1f8   : > { %vm2493_vm8 = vcmp.gt.f32.partialorder %v2461_v15, 0.0  ;;  %v2525_v33 = vmul.f32 0.1, %v2461_v15  ;;  %v3851_v46 = vpop.f32.mrb[4].mxu0  ;;  %v2556_v17 = vsel %vm2492_vm6, %v2460_v61, %v2524_v10 }
 0x1f9   : > { %v2559_v43 = vsel %vm2495_vm7, %v2463_v57, %v2527_v3  ;;  %v3915_v55 = vadd.f32 %v3851_v46, %v3681_v44  ;;  %v2310_v53 = vpop.f32.mrb[5].mxu0 }
 0x1fa   : > { %v2589_v48 = vpack.c.bf16 %v2559_v43, %v2558_v27  ;;  %v2557_v23 = vsel %vm2493_vm8, %v2461_v15, %v2525_v33  ;;  %v3916_v41 = vadd.f32 %v2310_v53, %v1151_v63  ;;  %v3852_v2 = vpop.f32.mrb[6].mxu0 }
 0x1fb   : > { %v2466_v18 = vadd.f32 %v3915_v55, %v5280_v51  ;;  %v3917_v21 = vadd.f32 %v3852_v2, %v3682_v20  ;;  %v2313_v31 = vpop.f32.mrb[7].mxu0  ;;  %v2588_v8 = vpack.c.bf16 %v2557_v23, %v2556_v17 }
 0x1fc   : > { %v2464_v54 = vadd.f32 %v3916_v41, %v5280_v51  ;;  %v3918_v13 = vadd.f32 %v2313_v31, %v1154_v49 }
 0x1fd   : > { %v2530_v36 = vmul.f32 0.1, %v2466_v18  ;;  %v2467_v47 = vadd.f32 %v3917_v21, %v5280_v51  ;;  %3879 = vmatprep.mubr.msk.bf16.mxu1 %vm2612_vm9, %v2588_v8  ;;  %vm2498_vm10 = vcmp.gt.f32.partialorder %v2466_v18, 0.0 }
 0x1fe   : > { %v2528_v52 = vmul.f32 0.1, %v2464_v54  ;;  %v2465_v44 = vadd.f32 %v3918_v13, %v5280_v51  ;;  %3880 = vmatmul.mubr.msk.bf16.vlgmr.msra.gmra.mrb[32].mxu1 %vm2612_vm9, %v2589_v48  ;;  %vm2496_vm11 = vcmp.gt.f32.partialorder %v2464_v54, 0.0 }
 0x1ff   : > { %vm2499_vm12 = vcmp.gt.f32.partialorder %v2467_v47, 0.0  ;;  %v2531_v63 = vmul.f32 0.1, %v2467_v47  ;;  %v2562_v16 = vsel %vm2498_vm10, %v2466_v18, %v2530_v36 }
 0x200   : > { %vm2497_vm13 = vcmp.gt.f32.partialorder %v2465_v44, 0.0  ;;  %v2529_v20 = vmul.f32 0.1, %v2465_v44  ;;  %v3855_v26 = vpop.f32.mrb[8].mxu0  ;;  %v2560_v19 = vsel %vm2496_vm11, %v2464_v54, %v2528_v52 }
 0x201   : > { %v2563_v45 = vsel %vm2499_vm12, %v2467_v47, %v2531_v63  ;;  %v3919_v49 = vadd.f32 %v3855_v26, %v5229_v60  ;;  %v2326_v9 = vpop.f32.mrb[9].mxu0 }
 0x202   : > { %v2561_v0 = vsel %vm2497_vm13, %v2465_v44, %v2529_v20  ;;  %v3920_v50 = vadd.f32 %v2326_v9, %v5231_v25  ;;  %v3856_v29 = vpop.f32.mrb[10].mxu0  ;;  %v2591_v61 = vpack.c.bf16 %v2563_v45, %v2562_v16 }
 0x203   : > { %v2470_v11 = vadd.f32 %v3919_v49, %v5280_v51  ;;  %v3921_v14 = vadd.f32 %v3856_v29, %v5233_v22  ;;  %v2329_v57 = vpop.f32.mrb[11].mxu0  ;;  %v2590_v10 = vpack.c.bf16 %v2561_v0, %v2560_v19 }
 0x204   : > { %v2468_v15 = vadd.f32 %v3920_v50, %v5280_v51  ;;  %v3922_v3 = vadd.f32 %v2329_v57, %v5235_v37 }
 0x205   : > { %v2534_v33 = vmul.f32 0.1, %v2470_v11  ;;  %v2471_v60 = vadd.f32 %v3921_v14, %v5280_v51  ;;  %3883 = vmatprep.mubr.msk.bf16.mxu1 %vm2612_vm9, %v2590_v10  ;;  %vm2502_vm14 = vcmp.gt.f32.partialorder %v2470_v11, 0.0 }
 0x206   : > { %v2532_v46 = vmul.f32 0.1, %v2468_v15  ;;  %v2469_v25 = vadd.f32 %v3922_v3, %v5280_v51  ;;  %3884 = vmatmul.mubr.msk.bf16.gmra.mrb[36].mxu1 %vm2612_vm9, %v2591_v61  ;;  %vm2500_vm15 = vcmp.gt.f32.partialorder %v2468_v15, 0.0 }
 0x207   : > { %vm2503_vm0 = vcmp.gt.f32.partialorder %v2471_v60, 0.0  ;;  %v2535_v22 = vmul.f32 0.1, %v2471_v60  ;;  %v2566_v55 = vsel %vm2502_vm14, %v2470_v11, %v2534_v33 }
 0x208   : > { %vm2501_vm1 = vcmp.gt.f32.partialorder %v2469_v25, 0.0  ;;  %v2533_v27 = vmul.f32 0.1, %v2469_v25  ;;  %v3859_v43 = vpop.f32.mrb[12].mxu0  ;;  %v2564_v48 = vsel %vm2500_vm15, %v2468_v15, %v2532_v46 }
 0x209   : > { %v2567_v53 = vsel %vm2503_vm0, %v2471_v60, %v2535_v22  ;;  %v3923_v37 = vadd.f32 %v3859_v43, %v5237_v7  ;;  %v2342_v17 = vpop.f32.mrb[13].mxu0 }
 0x20a   : > { %v2565_v23 = vsel %vm2501_vm1, %v2469_v25, %v2533_v27  ;;  %v3924_v41 = vadd.f32 %v2342_v17, %v5239_v32  ;;  %v3860_v2 = vpop.f32.mrb[14].mxu0  ;;  %v2593_v18 = vpack.c.bf16 %v2567_v53, %v2566_v55 }
 0x20b   : > { %v2474_v21 = vadd.f32 %v3923_v37, %v5280_v51  ;;  %v3925_v31 = vadd.f32 %v3860_v2, %v5241_v40  ;;  %v2345_v8 = vpop.f32.mrb[15].mxu0  ;;  %v2592_v54 = vpack.c.bf16 %v2565_v23, %v2564_v48 }
 0x20c   : > { %v2472_v13 = vadd.f32 %v3924_v41, %v5280_v51  ;;  %v3926_v36 = vadd.f32 %v2345_v8, %v5243_v59 }
 0x20d   : > { %v2538_v47 = vmul.f32 0.1, %v2474_v21  ;;  %v2475_v7 = vadd.f32 %v3925_v31, %v5280_v51  ;;  %3887 = vmatprep.mubr.msk.bf16.mxu1 %vm2612_vm9, %v2592_v54  ;;  %vm2506_vm2 = vcmp.gt.f32.partialorder %v2474_v21, 0.0 }
 0x20e   : > { %v2536_v52 = vmul.f32 0.1, %v2472_v13  ;;  %v2473_v32 = vadd.f32 %v3926_v36, %v5280_v51  ;;  %3888 = vmatmul.mubr.msk.bf16.gmra.mrb[40].mxu1 %vm2612_vm9, %v2593_v18  ;;  %vm2504_vm3 = vcmp.gt.f32.partialorder %v2472_v13, 0.0 }
 0x20f   : > { %vm2507_vm4 = vcmp.gt.f32.partialorder %v2475_v7, 0.0  ;;  %v2539_v40 = vmul.f32 0.1, %v2475_v7  ;;  %v2570_v20 = vsel %vm2506_vm2, %v2474_v21, %v2538_v47 }
 0x210   : > { %vm2505_vm5 = vcmp.gt.f32.partialorder %v2473_v32, 0.0  ;;  %v2537_v44 = vmul.f32 0.1, %v2473_v32  ;;  %v3863_v63 = vpop.f32.mrb[16].mxu0  ;;  %v2568_v45 = vsel %vm2504_vm3, %v2472_v13, %v2536_v52 }
 0x211   : > { %v2571_v26 = vsel %vm2507_vm4, %v2475_v7, %v2539_v40  ;;  %v3927_v59 = vadd.f32 %v3863_v63, %v5245_v38  ;;  %v2358_v16 = vpop.f32.mrb[17].mxu0 }
 0x212   : > { %v2569_v49 = vsel %vm2505_vm5, %v2473_v32, %v2537_v44  ;;  %v3928_v9 = vadd.f32 %v2358_v16, %v5247_v39  ;;  %v3864_v19 = vpop.f32.mrb[18].mxu0  ;;  %v2595_v0 = vpack.c.bf16 %v2571_v26, %v2570_v20 }
 0x213   : > { %v2478_v50 = vadd.f32 %v3927_v59, %v5280_v51  ;;  %v3929_v29 = vadd.f32 %v3864_v19, %v5249_v5  ;;  %v2361_v61 = vpop.f32.mrb[19].mxu0  ;;  %v2594_v11 = vpack.c.bf16 %v2569_v49, %v2568_v45 }
 0x214   : > { %v2476_v14 = vadd.f32 %v3928_v9, %v5280_v51  ;;  %v3930_v57 = vadd.f32 %v2361_v61, %v5251_v12 }
 0x215   : > { %v2542_v10 = vmul.f32 0.1, %v2478_v50  ;;  %v2479_v38 = vadd.f32 %v3929_v29, %v5280_v51  ;;  %3891 = vmatprep.mubr.msk.bf16.mxu1 %vm2612_vm9, %v2594_v11  ;;  %vm2510_vm6 = vcmp.gt.f32.partialorder %v2478_v50, 0.0 }
 0x216   : > { %v2540_v15 = vmul.f32 0.1, %v2476_v14  ;;  %v2477_v39 = vadd.f32 %v3930_v57, %v5280_v51  ;;  %3892 = vmatmul.mubr.msk.bf16.gmra.mrb[44].mxu1 %vm2612_vm9, %v2595_v0  ;;  %vm2508_vm7 = vcmp.gt.f32.partialorder %v2476_v14, 0.0 }
 0x217   : > { %vm2511_vm8 = vcmp.gt.f32.partialorder %v2479_v38, 0.0  ;;  %v2543_v5 = vmul.f32 0.1, %v2479_v38  ;;  %v2574_v60 = vsel %vm2510_vm6, %v2478_v50, %v2542_v10 }
 0x218   : > { %vm2509_vm10 = vcmp.gt.f32.partialorder %v2477_v39, 0.0  ;;  %v2541_v3 = vmul.f32 0.1, %v2477_v39  ;;  %v3867_v33 = vpop.f32.mrb[20].mxu0  ;;  %v2572_v22 = vsel %vm2508_vm7, %v2476_v14, %v2540_v15 }
 0x219   : > { %v2575_v46 = vsel %vm2511_vm8, %v2479_v38, %v2543_v5  ;;  %v3931_v12 = vadd.f32 %v3867_v33, %v5253_v1  ;;  %v2374_v25 = vpop.f32.mrb[21].mxu0 }
 0x21a   : > { %v2573_v27 = vsel %vm2509_vm10, %v2477_v39, %v2541_v3  ;;  %v3932_v43 = vadd.f32 %v2374_v25, %v5255_v35  ;;  %v3868_v55 = vpop.f32.mrb[22].mxu0  ;;  %v2597_v53 = vpack.c.bf16 %v2575_v46, %v2574_v60 }
 0x21b   : > { %v2482_v37 = vadd.f32 %v3931_v12, %v5280_v51  ;;  %v3933_v17 = vadd.f32 %v3868_v55, %v5257_v24  ;;  %v2377_v48 = vpop.f32.mrb[23].mxu0  ;;  %v2596_v23 = vpack.c.bf16 %v2573_v27, %v2572_v22 }
 0x21c   : > { %v2480_v41 = vadd.f32 %v3932_v43, %v5280_v51  ;;  %v3934_v2 = vadd.f32 %v2377_v48, %v5259_v30 }
 0x21d   : > { %v2546_v18 = vmul.f32 0.1, %v2482_v37  ;;  %v2483_v1 = vadd.f32 %v3933_v17, %v5280_v51  ;;  %3895 = vmatprep.mubr.msk.bf16.mxu1 %vm2612_vm9, %v2596_v23  ;;  %vm2514_vm11 = vcmp.gt.f32.partialorder %v2482_v37, 0.0 }
 0x21e   : > { %v2544_v21 = vmul.f32 0.1, %v2480_v41  ;;  %v2481_v35 = vadd.f32 %v3934_v2, %v5280_v51  ;;  %3896 = vmatmul.mubr.msk.bf16.gmra.mrb[48].mxu1 %vm2612_vm9, %v2597_v53  ;;  %vm2512_vm12 = vcmp.gt.f32.partialorder %v2480_v41, 0.0 }
 0x21f   : > { %vm2515_vm13 = vcmp.gt.f32.partialorder %v2483_v1, 0.0  ;;  %v2547_v24 = vmul.f32 0.1, %v2483_v1  ;;  %v2578_v54 = vsel %vm2514_vm11, %v2482_v37, %v2546_v18 }
 0x220   : > { %vm2513_vm14 = vcmp.gt.f32.partialorder %v2481_v35, 0.0  ;;  %v2545_v31 = vmul.f32 0.1, %v2481_v35  ;;  %v3871_v8 = vpop.f32.mrb[24].mxu0  ;;  %v2576_v47 = vsel %vm2512_vm12, %v2480_v41, %v2544_v21 }
 0x221   : > { %v2579_v13 = vsel %vm2515_vm13, %v2483_v1, %v2547_v24  ;;  %v3935_v30 = vadd.f32 %v3871_v8, %v5261_v28  ;;  %v2390_v36 = vpop.f32.mrb[25].mxu0 }
 0x222   : > { %v2577_v7 = vsel %vm2513_vm14, %v2481_v35, %v2545_v31  ;;  %v3936_v52 = vadd.f32 %v2390_v36, %v5263_v42  ;;  %v3872_v32 = vpop.f32.mrb[26].mxu0  ;;  %v2599_v40 = vpack.c.bf16 %v2579_v13, %v2578_v54 }
 0x223   : > { %v2486_v44 = vadd.f32 %v3935_v30, %v5280_v51  ;;  %v3937_v63 = vadd.f32 %v3872_v32, %v5265_v56  ;;  %v2393_v20 = vpop.f32.mrb[27].mxu0  ;;  %v2598_v26 = vpack.c.bf16 %v2577_v7, %v2576_v47 }
 0x224   : > { %v2484_v59 = vadd.f32 %v3936_v52, %v5280_v51  ;;  %v3938_v16 = vadd.f32 %v2393_v20, %v5267_v4 }
 0x225   : > { %v2550_v45 = vmul.f32 0.1, %v2486_v44  ;;  %v2487_v28 = vadd.f32 %v3937_v63, %v5280_v51  ;;  %3899 = vmatprep.mubr.msk.bf16.mxu1 %vm2612_vm9, %v2598_v26  ;;  %vm2518_vm15 = vcmp.gt.f32.partialorder %v2486_v44, 0.0 }
 0x226   : > { %v2548_v49 = vmul.f32 0.1, %v2484_v59  ;;  %v2485_v42 = vadd.f32 %v3938_v16, %v5280_v51  ;;  %3900 = vmatmul.mubr.msk.bf16.gmra.mrb[52].mxu1 %vm2612_vm9, %v2599_v40  ;;  %vm2516_vm0 = vcmp.gt.f32.partialorder %v2484_v59, 0.0 }
 0x227   : > { %vm2519_vm1 = vcmp.gt.f32.partialorder %v2487_v28, 0.0  ;;  %v2551_v56 = vmul.f32 0.1, %v2487_v28  ;;  %v2582_v0 = vsel %vm2518_vm15, %v2486_v44, %v2550_v45 }
 0x228   : > { %vm2517_vm2 = vcmp.gt.f32.partialorder %v2485_v42, 0.0  ;;  %v2549_v9 = vmul.f32 0.1, %v2485_v42  ;;  %v3875_v19 = vpop.f32.mrb[28].mxu0  ;;  %v2580_v61 = vsel %vm2516_vm0, %v2484_v59, %v2548_v49 }
 0x229   : > { %v2583_v50 = vsel %vm2519_vm1, %v2487_v28, %v2551_v56  ;;  %v3939_v4 = vadd.f32 %v3875_v19, %v5269_v34  ;;  %v2406_v29 = vpop.f32.mrb[29].mxu0 }
 0x22a   : > { %v2581_v11 = vsel %vm2517_vm2, %v2485_v42, %v2549_v9  ;;  %v3940_v14 = vadd.f32 %v2406_v29, %v5271_v62  ;;  %v3876_v57 = vpop.f32.mrb[30].mxu0  ;;  %v2601_v10 = vpack.c.bf16 %v2583_v50, %v2582_v0 }
 0x22b   : > { %v2490_v38 = vadd.f32 %v3939_v4, %v5280_v51  ;;  %v3941_v15 = vadd.f32 %v3876_v57, %v5273_v6  ;;  %v2409_v39 = vpop.f32.mrb[31].mxu0  ;;  %v2600_v5 = vpack.c.bf16 %v2581_v11, %v2580_v61 }
 0x22c   : > { %v2488_v3 = vadd.f32 %v3940_v14, %v5280_v51  ;;  %v3942_v33 = vadd.f32 %v2409_v39, %v5275_v58 }
 0x22d   : > { %v2554_v60 = vmul.f32 0.1, %v2490_v38  ;;  %v2491_v34 = vadd.f32 %v3941_v15, %v5280_v51  ;;  %3903 = vmatprep.mubr.msk.bf16.mxu1 %vm2612_vm9, %v2600_v5  ;;  %vm2522_vm3 = vcmp.gt.f32.partialorder %v2490_v38, 0.0 }
 0x22e   : > { %v2552_v46 = vmul.f32 0.1, %v2488_v3  ;;  %v2489_v62 = vadd.f32 %v3942_v33, %v5280_v51  ;;  %3904 = vmatmul.mubr.msk.bf16.gmra.mrb[56].mxu1 %vm2612_vm9, %v2601_v10  ;;  %vm2520_vm4 = vcmp.gt.f32.partialorder %v2488_v3, 0.0  ;;  %v5357_v51 = vld [vmem:[%s5468_s4] ss:$0 sm:$0xff] }
 0x22f   : > { %vm2523_vm5 = vcmp.gt.f32.partialorder %v2491_v34, 0.0  ;;  %v2555_v6 = vmul.f32 0.1, %v2491_v34  ;;  %v2586_v25 = vsel %vm2522_vm3, %v2490_v38, %v2554_v60 }
 0x230   : > { %vm2521_vm6 = vcmp.gt.f32.partialorder %v2489_v62, 0.0  ;;  %v2553_v12 = vmul.f32 0.1, %v2489_v62  ;;  %v2584_v58 = vsel %vm2520_vm4, %v2488_v3, %v2552_v46 }
 0x231   : > { %v2587_v22 = vsel %vm2523_vm5, %v2491_v34, %v2555_v6 }
 0x232   : > { %v2585_v27 = vsel %vm2521_vm6, %v2489_v62, %v2553_v12  ;;  %v2603_v43 = vpack.c.bf16 %v2587_v22, %v2586_v25 }
 0x233   : > { %v2602_v55 = vpack.c.bf16 %v2585_v27, %v2584_v58 }
 0x235   : > { %3907 = vmatprep.mubr.msk.bf16.mxu1 %vm2612_vm9, %v2602_v55 }
 0x236   : > { %3908 = vmatmul.mubr.msk.bf16.gmra.mrb[60].mxu1 %vm2612_vm9, %v2603_v43  ;;  %vm3050_vm9 = vcmask 27648  }
 0x2d1   : > { %v3881_v53 = vpop.f32.mrb[32].mxu1 }
 0x2d2   : > { %v2708_v37 = vadd.f32 %v3881_v53, %v5357_v51  ;;  %v2699_v17 = vpop.f32.mrb[33].mxu1 }
 0x2d3   : > { %v2700_v48 = vadd.f32 %v5357_v51, %v2699_v17  ;;  %v3882_v23 = vpop.f32.mrb[34].mxu1 }
 0x2d4   : > { %vm2828_vm7 = vcmp.gt.f32.partialorder %v2708_v37, 0.0  ;;  %v2860_v41 = vmul.f32 0.1, %v2708_v37  ;;  %v2711_v2 = vadd.f32 %v3882_v23, %v5357_v51  ;;  %v2702_v18 = vpop.f32.mrb[35].mxu1 }
 0x2d5   : > { %vm2826_vm8 = vcmp.gt.f32.partialorder %v2700_v48, 0.0  ;;  %v2858_v1 = vmul.f32 0.1, %v2700_v48  ;;  %v2703_v21 = vadd.f32 %v5357_v51, %v2702_v18 }
 0x2d6   : > { %v2892_v35 = vsel %vm2828_vm7, %v2708_v37, %v2860_v41  ;;  %vm2829_vm10 = vcmp.gt.f32.partialorder %v2711_v2, 0.0  ;;  %v2861_v24 = vmul.f32 0.1, %v2711_v2 }
 0x2d7   : > { %v3371_v31 = vpack.c.bf16 %v2892_v35, %v2892_v35  ;;  %v2890_v8 = vsel %vm2826_vm8, %v2700_v48, %v2858_v1  ;;  %vm2827_vm11 = vcmp.gt.f32.partialorder %v2703_v21, 0.0  ;;  %v2859_v54 = vmul.f32 0.1, %v2703_v21 }
 0x2d8   : > { %v3369_v13 = vpack.c.bf16 %v2890_v8, %v2890_v8  ;;  %v2893_v30 = vsel %vm2829_vm10, %v2711_v2, %v2861_v24 }
 0x2d9   : > { %3053 = vst.msk [vmem:[%s5367_s28 + $0x8] sm:$0xf] %vm3050_vm9, %v3371_v31  ;;  %v3372_v36 = vpack.c.bf16 %v2893_v30, %v2893_v30  ;;  %v2891_v47 = vsel %vm2827_vm11, %v2703_v21, %v2859_v54  ;;  %v3885_v7 = vpop.f32.mrb[36].mxu1 }
 0x2da   : > { %3051 = vst.msk [vmem:[%s5367_s28] sm:$0xf] %vm3050_vm9, %v3369_v13  ;;  %v3370_v52 = vpack.c.bf16 %v2891_v47, %v2891_v47  ;;  %v2724_v32 = vadd.f32 %v3885_v7, %v5357_v51  ;;  %v2715_v40 = vpop.f32.mrb[37].mxu1 }
 0x2db   : > { %3054 = vst.msk [vmem:[%s5367_s28 + $0xc] sm:$0xf] %vm3050_vm9, %v3372_v36  ;;  %v2716_v44 = vadd.f32 %v5357_v51, %v2715_v40  ;;  %v3886_v63 = vpop.f32.mrb[38].mxu1 }
 0x2dc   : > { %3052 = vst.msk [vmem:[%s5367_s28 + $0x4] sm:$0xf] %vm3050_vm9, %v3370_v52  ;;  %vm2832_vm12 = vcmp.gt.f32.partialorder %v2724_v32, 0.0  ;;  %v2864_v20 = vmul.f32 0.1, %v2724_v32  ;;  %v2727_v26 = vadd.f32 %v3886_v63, %v5357_v51  ;;  %v2718_v59 = vpop.f32.mrb[39].mxu1 }
 0x2dd   : > { %vm2830_vm13 = vcmp.gt.f32.partialorder %v2716_v44, 0.0  ;;  %v2862_v16 = vmul.f32 0.1, %v2716_v44  ;;  %v2719_v45 = vadd.f32 %v5357_v51, %v2718_v59 }
 0x2de   : > { %v2896_v28 = vsel %vm2832_vm12, %v2724_v32, %v2864_v20  ;;  %vm2833_vm14 = vcmp.gt.f32.partialorder %v2727_v26, 0.0  ;;  %v2865_v49 = vmul.f32 0.1, %v2727_v26 }
 0x2df   : > { %v3375_v42 = vpack.c.bf16 %v2896_v28, %v2896_v28  ;;  %v2894_v56 = vsel %vm2830_vm13, %v2716_v44, %v2862_v16  ;;  %vm2831_vm15 = vcmp.gt.f32.partialorder %v2719_v45, 0.0  ;;  %v2863_v9 = vmul.f32 0.1, %v2719_v45 }
 0x2e0   : > { %v3373_v19 = vpack.c.bf16 %v2894_v56, %v2894_v56  ;;  %v2897_v0 = vsel %vm2833_vm14, %v2727_v26, %v2865_v49 }
 0x2e1   : > { %3057 = vst.msk [vmem:[%s5367_s28 + $0x18] sm:$0xf] %vm3050_vm9, %v3375_v42  ;;  %v3376_v50 = vpack.c.bf16 %v2897_v0, %v2897_v0  ;;  %v2895_v4 = vsel %vm2831_vm15, %v2719_v45, %v2863_v9  ;;  %v3889_v29 = vpop.f32.mrb[40].mxu1 }
 0x2e2   : > { %3055 = vst.msk [vmem:[%s5367_s28 + $0x10] sm:$0xf] %vm3050_vm9, %v3373_v19  ;;  %v3374_v61 = vpack.c.bf16 %v2895_v4, %v2895_v4  ;;  %v2740_v11 = vadd.f32 %v3889_v29, %v5357_v51  ;;  %v2731_v14 = vpop.f32.mrb[41].mxu1 }
 0x2e3   : > { %3058 = vst.msk [vmem:[%s5367_s28 + $0x1c] sm:$0xf] %vm3050_vm9, %v3376_v50  ;;  %v2732_v57 = vadd.f32 %v5357_v51, %v2731_v14  ;;  %v3890_v10 = vpop.f32.mrb[42].mxu1 }
 0x2e4   : > { %3056 = vst.msk [vmem:[%s5367_s28 + $0x14] sm:$0xf] %vm3050_vm9, %v3374_v61  ;;  %vm2836_vm0 = vcmp.gt.f32.partialorder %v2740_v11, 0.0  ;;  %v2868_v38 = vmul.f32 0.1, %v2740_v11  ;;  %v2743_v15 = vadd.f32 %v3890_v10, %v5357_v51  ;;  %v2734_v39 = vpop.f32.mrb[43].mxu1 }
 0x2e5   : > { %vm2834_vm1 = vcmp.gt.f32.partialorder %v2732_v57, 0.0  ;;  %v2866_v5 = vmul.f32 0.1, %v2732_v57  ;;  %v2735_v3 = vadd.f32 %v5357_v51, %v2734_v39 }
 0x2e6   : > { %v2900_v33 = vsel %vm2836_vm0, %v2740_v11, %v2868_v38  ;;  %vm2837_vm2 = vcmp.gt.f32.partialorder %v2743_v15, 0.0  ;;  %v2869_v60 = vmul.f32 0.1, %v2743_v15 }
 0x2e7   : > { %v3379_v34 = vpack.c.bf16 %v2900_v33, %v2900_v33  ;;  %v2898_v46 = vsel %vm2834_vm1, %v2732_v57, %v2866_v5  ;;  %vm2835_vm3 = vcmp.gt.f32.partialorder %v2735_v3, 0.0  ;;  %v2867_v62 = vmul.f32 0.1, %v2735_v3 }
 0x2e8   : > { %v3377_v6 = vpack.c.bf16 %v2898_v46, %v2898_v46  ;;  %v2901_v12 = vsel %vm2837_vm2, %v2743_v15, %v2869_v60 }
 0x2e9   : > { %3061 = vst.msk [vmem:[%s5367_s28 + $0x28] sm:$0xf] %vm3050_vm9, %v3379_v34  ;;  %v3380_v25 = vpack.c.bf16 %v2901_v12, %v2901_v12  ;;  %v2899_v22 = vsel %vm2835_vm3, %v2735_v3, %v2867_v62  ;;  %v3893_v58 = vpop.f32.mrb[44].mxu1 }
 0x2ea   : > { %3059 = vst.msk [vmem:[%s5367_s28 + $0x20] sm:$0xf] %vm3050_vm9, %v3377_v6  ;;  %v3378_v27 = vpack.c.bf16 %v2899_v22, %v2899_v22  ;;  %v2756_v43 = vadd.f32 %v3893_v58, %v5357_v51  ;;  %v2747_v55 = vpop.f32.mrb[45].mxu1 }
 0x2eb   : > { %3062 = vst.msk [vmem:[%s5367_s28 + $0x2c] sm:$0xf] %vm3050_vm9, %v3380_v25  ;;  %v2748_v53 = vadd.f32 %v5357_v51, %v2747_v55  ;;  %v3894_v37 = vpop.f32.mrb[46].mxu1 }
 0x2ec   : > { %3060 = vst.msk [vmem:[%s5367_s28 + $0x24] sm:$0xf] %vm3050_vm9, %v3378_v27  ;;  %vm2840_vm4 = vcmp.gt.f32.partialorder %v2756_v43, 0.0  ;;  %v2872_v17 = vmul.f32 0.1, %v2756_v43  ;;  %v2759_v48 = vadd.f32 %v3894_v37, %v5357_v51  ;;  %v2750_v23 = vpop.f32.mrb[47].mxu1 }
 0x2ed   : > { %vm2838_vm5 = vcmp.gt.f32.partialorder %v2748_v53, 0.0  ;;  %v2870_v41 = vmul.f32 0.1, %v2748_v53  ;;  %v2751_v2 = vadd.f32 %v5357_v51, %v2750_v23 }
 0x2ee   : > { %v2904_v18 = vsel %vm2840_vm4, %v2756_v43, %v2872_v17  ;;  %vm2841_vm6 = vcmp.gt.f32.partialorder %v2759_v48, 0.0  ;;  %v2873_v1 = vmul.f32 0.1, %v2759_v48 }
 0x2ef   : > { %v3383_v21 = vpack.c.bf16 %v2904_v18, %v2904_v18  ;;  %v2902_v35 = vsel %vm2838_vm5, %v2748_v53, %v2870_v41  ;;  %vm2839_vm7 = vcmp.gt.f32.partialorder %v2751_v2, 0.0  ;;  %v2871_v24 = vmul.f32 0.1, %v2751_v2 }
 0x2f0   : > { %v3381_v31 = vpack.c.bf16 %v2902_v35, %v2902_v35  ;;  %v2905_v8 = vsel %vm2841_vm6, %v2759_v48, %v2873_v1 }
 0x2f1   : > { %3065 = vst.msk [vmem:[%s5367_s28 + $0x38] sm:$0xf] %vm3050_vm9, %v3383_v21  ;;  %v3384_v54 = vpack.c.bf16 %v2905_v8, %v2905_v8  ;;  %v2903_v13 = vsel %vm2839_vm7, %v2751_v2, %v2871_v24  ;;  %v3897_v30 = vpop.f32.mrb[48].mxu1 }
 0x2f2   : > { %3063 = vst.msk [vmem:[%s5367_s28 + $0x30] sm:$0xf] %vm3050_vm9, %v3381_v31  ;;  %v3382_v36 = vpack.c.bf16 %v2903_v13, %v2903_v13  ;;  %v2772_v47 = vadd.f32 %v3897_v30, %v5357_v51  ;;  %v2763_v7 = vpop.f32.mrb[49].mxu1 }
 0x2f3   : > { %3066 = vst.msk [vmem:[%s5367_s28 + $0x3c] sm:$0xf] %vm3050_vm9, %v3384_v54  ;;  %v2764_v52 = vadd.f32 %v5357_v51, %v2763_v7  ;;  %v3898_v32 = vpop.f32.mrb[50].mxu1 }
 0x2f4   : > { %3064 = vst.msk [vmem:[%s5367_s28 + $0x34] sm:$0xf] %vm3050_vm9, %v3382_v36  ;;  %vm2844_vm8 = vcmp.gt.f32.partialorder %v2772_v47, 0.0  ;;  %v2876_v40 = vmul.f32 0.1, %v2772_v47  ;;  %v2775_v44 = vadd.f32 %v3898_v32, %v5357_v51  ;;  %v2766_v63 = vpop.f32.mrb[51].mxu1 }
 0x2f5   : > { %vm2842_vm10 = vcmp.gt.f32.partialorder %v2764_v52, 0.0  ;;  %v2874_v20 = vmul.f32 0.1, %v2764_v52  ;;  %v2767_v26 = vadd.f32 %v5357_v51, %v2766_v63 }
 0x2f6   : > { %v2908_v59 = vsel %vm2844_vm8, %v2772_v47, %v2876_v40  ;;  %vm2845_vm11 = vcmp.gt.f32.partialorder %v2775_v44, 0.0  ;;  %v2877_v16 = vmul.f32 0.1, %v2775_v44 }
 0x2f7   : > { %v3387_v45 = vpack.c.bf16 %v2908_v59, %v2908_v59  ;;  %v2906_v28 = vsel %vm2842_vm10, %v2764_v52, %v2874_v20  ;;  %vm2843_vm12 = vcmp.gt.f32.partialorder %v2767_v26, 0.0  ;;  %v2875_v49 = vmul.f32 0.1, %v2767_v26 }
 0x2f8   : > { %v3385_v42 = vpack.c.bf16 %v2906_v28, %v2906_v28  ;;  %v2909_v56 = vsel %vm2845_vm11, %v2775_v44, %v2877_v16 }
 0x2f9   : > { %3069 = vst.msk [vmem:[%s5367_s28 + $0x48] sm:$0xf] %vm3050_vm9, %v3387_v45  ;;  %v3388_v9 = vpack.c.bf16 %v2909_v56, %v2909_v56  ;;  %v2907_v19 = vsel %vm2843_vm12, %v2767_v26, %v2875_v49  ;;  %v3901_v0 = vpop.f32.mrb[52].mxu1 }
 0x2fa   : > { %3067 = vst.msk [vmem:[%s5367_s28 + $0x40] sm:$0xf] %vm3050_vm9, %v3385_v42  ;;  %v3386_v50 = vpack.c.bf16 %v2907_v19, %v2907_v19  ;;  %v2788_v4 = vadd.f32 %v3901_v0, %v5357_v51  ;;  %v2779_v29 = vpop.f32.mrb[53].mxu1 }
 0x2fb   : > { %3070 = vst.msk [vmem:[%s5367_s28 + $0x4c] sm:$0xf] %vm3050_vm9, %v3388_v9  ;;  %v2780_v61 = vadd.f32 %v5357_v51, %v2779_v29  ;;  %v3902_v11 = vpop.f32.mrb[54].mxu1 }
 0x2fc   : > { %3068 = vst.msk [vmem:[%s5367_s28 + $0x44] sm:$0xf] %vm3050_vm9, %v3386_v50  ;;  %vm2848_vm13 = vcmp.gt.f32.partialorder %v2788_v4, 0.0  ;;  %v2880_v14 = vmul.f32 0.1, %v2788_v4  ;;  %v2791_v57 = vadd.f32 %v3902_v11, %v5357_v51  ;;  %v2782_v10 = vpop.f32.mrb[55].mxu1 }
 0x2fd   : > { %vm2846_vm14 = vcmp.gt.f32.partialorder %v2780_v61, 0.0  ;;  %v2878_v38 = vmul.f32 0.1, %v2780_v61  ;;  %v2783_v15 = vadd.f32 %v5357_v51, %v2782_v10 }
 0x2fe   : > { %v2912_v39 = vsel %vm2848_vm13, %v2788_v4, %v2880_v14  ;;  %vm2849_vm15 = vcmp.gt.f32.partialorder %v2791_v57, 0.0  ;;  %v2881_v5 = vmul.f32 0.1, %v2791_v57 }
 0x2ff   : > { %v3391_v3 = vpack.c.bf16 %v2912_v39, %v2912_v39  ;;  %v2910_v33 = vsel %vm2846_vm14, %v2780_v61, %v2878_v38  ;;  %vm2847_vm0 = vcmp.gt.f32.partialorder %v2783_v15, 0.0  ;;  %v2879_v60 = vmul.f32 0.1, %v2783_v15 }
 0x300   : > { %v3389_v34 = vpack.c.bf16 %v2910_v33, %v2910_v33  ;;  %v2913_v46 = vsel %vm2849_vm15, %v2791_v57, %v2881_v5 }
 0x301   : > { %3073 = vst.msk [vmem:[%s5367_s28 + $0x58] sm:$0xf] %vm3050_vm9, %v3391_v3  ;;  %v3392_v62 = vpack.c.bf16 %v2913_v46, %v2913_v46  ;;  %v2911_v6 = vsel %vm2847_vm0, %v2783_v15, %v2879_v60  ;;  %v3905_v12 = vpop.f32.mrb[56].mxu1 }
 0x302   : > { %3071 = vst.msk [vmem:[%s5367_s28 + $0x50] sm:$0xf] %vm3050_vm9, %v3389_v34  ;;  %v3390_v25 = vpack.c.bf16 %v2911_v6, %v2911_v6  ;;  %v2804_v22 = vadd.f32 %v3905_v12, %v5357_v51  ;;  %v2795_v58 = vpop.f32.mrb[57].mxu1 }
 0x303   : > { %3074 = vst.msk [vmem:[%s5367_s28 + $0x5c] sm:$0xf] %vm3050_vm9, %v3392_v62  ;;  %v2796_v27 = vadd.f32 %v5357_v51, %v2795_v58  ;;  %v3906_v43 = vpop.f32.mrb[58].mxu1 }
 0x304   : > { %3072 = vst.msk [vmem:[%s5367_s28 + $0x54] sm:$0xf] %vm3050_vm9, %v3390_v25  ;;  %vm2852_vm1 = vcmp.gt.f32.partialorder %v2804_v22, 0.0  ;;  %v2884_v55 = vmul.f32 0.1, %v2804_v22  ;;  %v2807_v53 = vadd.f32 %v3906_v43, %v5357_v51  ;;  %v2798_v37 = vpop.f32.mrb[59].mxu1 }
 0x305   : > { %vm2850_vm2 = vcmp.gt.f32.partialorder %v2796_v27, 0.0  ;;  %v2882_v17 = vmul.f32 0.1, %v2796_v27  ;;  %v2799_v48 = vadd.f32 %v5357_v51, %v2798_v37 }
 0x306   : > { %v2916_v23 = vsel %vm2852_vm1, %v2804_v22, %v2884_v55  ;;  %vm2853_vm3 = vcmp.gt.f32.partialorder %v2807_v53, 0.0  ;;  %v2885_v41 = vmul.f32 0.1, %v2807_v53 }
 0x307   : > { %v3395_v2 = vpack.c.bf16 %v2916_v23, %v2916_v23  ;;  %v2914_v18 = vsel %vm2850_vm2, %v2796_v27, %v2882_v17  ;;  %vm2851_vm4 = vcmp.gt.f32.partialorder %v2799_v48, 0.0  ;;  %v2883_v1 = vmul.f32 0.1, %v2799_v48 }
 0x308   : > { %v3393_v21 = vpack.c.bf16 %v2914_v18, %v2914_v18  ;;  %v2917_v35 = vsel %vm2853_vm3, %v2807_v53, %v2885_v41 }
 0x309   : > { %3077 = vst.msk [vmem:[%s5367_s28 + $0x68] sm:$0xf] %vm3050_vm9, %v3395_v2  ;;  %v3396_v24 = vpack.c.bf16 %v2917_v35, %v2917_v35  ;;  %v2915_v31 = vsel %vm2851_vm4, %v2799_v48, %v2883_v1  ;;  %v3909_v8 = vpop.f32.mrb[60].mxu1 }
 0x30a   : > { %3075 = vst.msk [vmem:[%s5367_s28 + $0x60] sm:$0xf] %vm3050_vm9, %v3393_v21  ;;  %v3394_v54 = vpack.c.bf16 %v2915_v31, %v2915_v31  ;;  %v2820_v13 = vadd.f32 %v3909_v8, %v5357_v51  ;;  %v2811_v30 = vpop.f32.mrb[61].mxu1 }
 0x30b   : > { %3078 = vst.msk [vmem:[%s5367_s28 + $0x6c] sm:$0xf] %vm3050_vm9, %v3396_v24  ;;  %v2812_v36 = vadd.f32 %v5357_v51, %v2811_v30  ;;  %v3910_v47 = vpop.f32.mrb[62].mxu1 }
 0x30c   : > { %3076 = vst.msk [vmem:[%s5367_s28 + $0x64] sm:$0xf] %vm3050_vm9, %v3394_v54  ;;  %vm2856_vm5 = vcmp.gt.f32.partialorder %v2820_v13, 0.0  ;;  %v2888_v7 = vmul.f32 0.1, %v2820_v13  ;;  %v2823_v52 = vadd.f32 %v3910_v47, %v5357_v51  ;;  %v2814_v32 = vpop.f32.mrb[63].mxu1 }
 0x30d   : > { %vm2854_vm6 = vcmp.gt.f32.partialorder %v2812_v36, 0.0  ;;  %v2886_v40 = vmul.f32 0.1, %v2812_v36  ;;  %v2815_v44 = vadd.f32 %v5357_v51, %v2814_v32 }
 0x30e   : > { %v2920_v63 = vsel %vm2856_vm5, %v2820_v13, %v2888_v7  ;;  %vm2857_vm7 = vcmp.gt.f32.partialorder %v2823_v52, 0.0  ;;  %v2889_v20 = vmul.f32 0.1, %v2823_v52 }
 0x30f   : > { %v3399_v26 = vpack.c.bf16 %v2920_v63, %v2920_v63  ;;  %v2918_v59 = vsel %vm2854_vm6, %v2812_v36, %v2886_v40  ;;  %vm2855_vm8 = vcmp.gt.f32.partialorder %v2815_v44, 0.0  ;;  %v2887_v16 = vmul.f32 0.1, %v2815_v44 }
 0x310   : > { %v3397_v45 = vpack.c.bf16 %v2918_v59, %v2918_v59  ;;  %v2921_v28 = vsel %vm2857_vm7, %v2823_v52, %v2889_v20 }
 0x311   : > { %3081 = vst.msk [vmem:[%s5367_s28 + $0x78] sm:$0xf] %vm3050_vm9, %v3399_v26  ;;  %v3400_v49 = vpack.c.bf16 %v2921_v28, %v2921_v28  ;;  %v2919_v42 = vsel %vm2855_vm8, %v2815_v44, %v2887_v16 }
 0x312   : > { %3079 = vst.msk [vmem:[%s5367_s28 + $0x70] sm:$0xf] %vm3050_vm9, %v3397_v45  ;;  %v3398_v56 = vpack.c.bf16 %v2919_v42, %v2919_v42 }
 0x313   : > { %3082 = vst.msk [vmem:[%s5367_s28 + $0x7c] sm:$0xf] %vm3050_vm9, %v3400_v49 }
 0x314   : > { %3080 = vst.msk [vmem:[%s5367_s28 + $0x74] sm:$0xf] %vm3050_vm9, %v3398_v56 }
 0x315 PF: > { %s15_s18 = sadd.s32 1, %s4228_s18  }
 0x316   : > { %p12_p4 = scmp.ge.s32.totalorder %s15_s18, 4  }
 0x318   :  { %14 = sbr.rel (!%p12_p4) target bundleno = 1 (0x1), region = 78 }

</bundles_post_ra>
